<compile_context>
chip_gen: v7x
topology: tpu7x:2x2x1
jax: 0.10.0
libtpu: 0.0.40
codegen_flags: <defaults>
</compile_context>

<pallas_src>
import jax
import jax.numpy as jnp
from jax.experimental import pallas as pl
from jax.experimental.pallas import tpu as pltpu

HID = 256                # hidden width
TB_MAX = 256             # max batch tile (fills the 256-row MXU on v6e/v7x)
MXU_DTYPE = jnp.bfloat16 # dtype fed to the MXU for the interior 256x256 layers


def _round_up(n, m):
    return ((n + m - 1) // m) * m


# ----- kernel ----------------------------------------------------------------
def dense_kernel(alpha_ref,               # (4,)  SMEM  : PReLU slopes
                 x_ref,                   # (TB, 1)     f32
                 w1_ref, b1_ref,          # (1, HID)    f32 , (1, HID) f32
                 w2_ref, b2_ref,          # (HID, HID)  bf16, (1, HID) f32
                 w3_ref, b3_ref,          # (HID, HID)  bf16, (1, HID) f32
                 w4_ref, b4_ref,          # (HID, HID)  bf16, (1, HID) f32
                 w5t_ref, b5_ref,         # (1, HID)    f32 , (1, 1)   f32
                 o_ref):                  # (TB, 1)     f32
    def prelu(h, a):
        return jnp.where(h >= 0.0, h, a * h)

    def mxu_linear(h, w_ref, b_ref):
        # bf16 operands, f32 accumulation; bias add / PReLU stay f32 on the VPU.
        return jnp.dot(h.astype(MXU_DTYPE), w_ref[...],
                       preferred_element_type=jnp.float32) + b_ref[...]

    # Layer 1: in_features == 1 -> pure VPU broadcast (no zero-padded matmul).
    h = prelu(x_ref[...] * w1_ref[...] + b1_ref[...], alpha_ref[0])
    h = prelu(mxu_linear(h, w2_ref, b2_ref), alpha_ref[1])
    h = prelu(mxu_linear(h, w3_ref, b3_ref), alpha_ref[2])
    h = prelu(mxu_linear(h, w4_ref, b4_ref), alpha_ref[3])
    # Output layer: out_features == 1 -> lane reduce, (TB, 1) writeback only.
    o_ref[...] = (jnp.sum(h * w5t_ref[...], axis=-1, keepdims=True)
                  + b5_ref[...]).astype(o_ref.dtype)


# ----- wrapper ---------------------------------------------------------------
@jax.jit
def dense_nn_forward(x, params):
    """x: (B, 1) float32 -> (B, 1) float32."""
    (w1, b1), (w2, b2), (w3, b3), (w4, b4), (w5, b5), alphas = params
    B = x.shape[0]
    TB = min(TB_MAX, _round_up(B, 8))
    B_pad = _round_up(B, TB)

    x_pad = jnp.pad(x.astype(jnp.float32), ((0, B_pad - B), (0, 0)))
    w5t = jnp.transpose(w5)                 # (1, HID): output layer as a reduce

    const = lambda shape: pl.BlockSpec(shape, lambda i, alphas: (0, 0))

    out = pl.pallas_call(
        dense_kernel,
        out_shape=jax.ShapeDtypeStruct((B_pad, 1), jnp.float32),
        grid_spec=pltpu.PrefetchScalarGridSpec(
            num_scalar_prefetch=1,                       # alphas -> SMEM
            grid=(B_pad // TB,),
            in_specs=[
                pl.BlockSpec((TB, 1), lambda i, alphas: (i, 0)),   # x
                const((1, HID)), const((1, HID)),                  # layer 1
                const((HID, HID)), const((1, HID)),                # layer 2
                const((HID, HID)), const((1, HID)),                # layer 3
                const((HID, HID)), const((1, HID)),                # layer 4
                const((1, HID)), const((1, 1)),                    # output
            ],
            out_specs=pl.BlockSpec((TB, 1), lambda i, alphas: (i, 0)),
        ),
        compiler_params=pltpu.CompilerParams(
            dimension_semantics=("parallel",)),
    )(alphas, x_pad,
      w1, b1,
      w2.astype(MXU_DTYPE), b2,
      w3.astype(MXU_DTYPE), b3,
      w4.astype(MXU_DTYPE), b4,
      w5t, b5)

    return out[:B]


# ----- deterministic parameter init (PyTorch-Linear-style uniform) -----------
def init_params(key):
    def linear_init(k, fan_in, fan_out):
        kw, kb = jax.random.split(k)
        bound = 1.0 / (fan_in ** 0.5)
        # stored as (in, out) so forward is x @ W + b
        w = jax.random.uniform(kw, (fan_in, fan_out), jnp.float32, -bound, bound)
        b = jax.random.uniform(kb, (1, fan_out), jnp.float32, -bound, bound)
        return w, b

    keys = jax.random.split(key, 5)
    layers = [
        linear_init(keys[0], 1, HID),
        linear_init(keys[1], HID, HID),
        linear_init(keys[2], HID, HID),
        linear_init(keys[3], HID, HID),
        linear_init(keys[4], HID, 1),
    ]
    alphas = jnp.full((4,), 0.25, jnp.float32)   # nn.PReLU() default init
    return (*layers, alphas)


# ----- pure-JAX reference (same precision policy) for verification -----------
def reference_forward(x, params):
    (w1, b1), (w2, b2), (w3, b3), (w4, b4), (w5, b5), a = params
    prelu = lambda h, s: jnp.where(h >= 0, h, s * h)

    def mxu_linear(h, w, b):
        return jnp.dot(h.astype(MXU_DTYPE), w.astype(MXU_DTYPE),
                       preferred_element_type=jnp.float32) + b

    h = prelu(x * w1 + b1, a[0])                 # in_features == 1
    h = prelu(mxu_linear(h, w2, b2), a[1])
    h = prelu(mxu_linear(h, w3, b3), a[2])
    h = prelu(mxu_linear(h, w4, b4), a[3])
    return jnp.sum(h * jnp.transpose(w5), axis=-1, keepdims=True) + b5


if __name__ == "__main__":
    key = jax.random.PRNGKey(0)
    k_param, k_x = jax.random.split(key)

    params = init_params(k_param)
    B = 300                                   # exercises batch padding + grid of 2
    x = jax.random.normal(k_x, (B, 1), jnp.float32)

    out = jax.block_until_ready(dense_nn_forward(x, params))
    ref = reference_forward(x, params)

    assert out.shape == (B, 1)
    assert jnp.allclose(out, ref, atol=2e-3, rtol=2e-3), "mismatch vs reference"

    print("KERNEL_OK")
</pallas_src>

<mosaic_0001>
module attributes {stable_mosaic.version = 11 : i64} {
  func.func @dense_kernel(%arg0: i32, %arg1: memref<4xf32, #tpu.memory_space<smem>>, %arg2: memref<256x1xf32, #tpu.memory_space<vmem>>, %arg3: memref<1x256xf32, #tpu.memory_space<vmem>>, %arg4: memref<1x256xf32, #tpu.memory_space<vmem>>, %arg5: memref<256x256xbf16, #tpu.memory_space<vmem>>, %arg6: memref<1x256xf32, #tpu.memory_space<vmem>>, %arg7: memref<256x256xbf16, #tpu.memory_space<vmem>>, %arg8: memref<1x256xf32, #tpu.memory_space<vmem>>, %arg9: memref<256x256xbf16, #tpu.memory_space<vmem>>, %arg10: memref<1x256xf32, #tpu.memory_space<vmem>>, %arg11: memref<1x256xf32, #tpu.memory_space<vmem>>, %arg12: memref<1x1xf32, #tpu.memory_space<vmem>>, %arg13: memref<256x1xf32, #tpu.memory_space<vmem>>) attributes {dimension_semantics = [#tpu.dimension_semantics<parallel>], iteration_bounds = array<i64: 2>, scalar_prefetch = 1 : i64, scratch_operands = 0 : i64, tpu.core_type = #tpu.core_type<tc>, window_params = [{transform_indices = @transform_0, window_bounds = array<i64: 256, 1>}, {pipeline_mode = #tpu.pipeline_mode<synchronous>, transform_indices = @transform_1, window_bounds = array<i64: 1, 256>}, {pipeline_mode = #tpu.pipeline_mode<synchronous>, transform_indices = @transform_2, window_bounds = array<i64: 1, 256>}, {pipeline_mode = #tpu.pipeline_mode<synchronous>, transform_indices = @transform_3, window_bounds = array<i64: 256, 256>}, {pipeline_mode = #tpu.pipeline_mode<synchronous>, transform_indices = @transform_4, window_bounds = array<i64: 1, 256>}, {pipeline_mode = #tpu.pipeline_mode<synchronous>, transform_indices = @transform_5, window_bounds = array<i64: 256, 256>}, {pipeline_mode = #tpu.pipeline_mode<synchronous>, transform_indices = @transform_6, window_bounds = array<i64: 1, 256>}, {pipeline_mode = #tpu.pipeline_mode<synchronous>, transform_indices = @transform_7, window_bounds = array<i64: 256, 256>}, {pipeline_mode = #tpu.pipeline_mode<synchronous>, transform_indices = @transform_8, window_bounds = array<i64: 1, 256>}, {pipeline_mode = #tpu.pipeline_mode<synchronous>, transform_indices = @transform_9, window_bounds = array<i64: 1, 256>}, {pipeline_mode = #tpu.pipeline_mode<synchronous>, transform_indices = @transform_10, window_bounds = array<i64: 1, 1>}, {transform_indices = @transform_11, window_bounds = array<i64: 256, 1>}]} {
    %c0 = arith.constant 0 : index
    %c0_0 = arith.constant 0 : index
    %0 = vector.load %arg2[%c0, %c0_0] : memref<256x1xf32, #tpu.memory_space<vmem>>, vector<256x1xf32>
    %c0_1 = arith.constant 0 : index
    %c0_2 = arith.constant 0 : index
    %1 = vector.load %arg3[%c0_1, %c0_2] : memref<1x256xf32, #tpu.memory_space<vmem>>, vector<1x256xf32>
    %2 = vector.broadcast %0 : vector<256x1xf32> to vector<256x256xf32>
    %3 = vector.broadcast %1 : vector<1x256xf32> to vector<256x256xf32>
    %4 = arith.mulf %2, %3 : vector<256x256xf32>
    %c0_3 = arith.constant 0 : index
    %c0_4 = arith.constant 0 : index
    %5 = vector.load %arg4[%c0_3, %c0_4] : memref<1x256xf32, #tpu.memory_space<vmem>>, vector<1x256xf32>
    %6 = vector.broadcast %5 : vector<1x256xf32> to vector<256x256xf32>
    %7 = arith.addf %4, %6 : vector<256x256xf32>
    %c0_5 = arith.constant 0 : index
    %8 = memref.load %arg1[%c0_5] : memref<4xf32, #tpu.memory_space<smem>>
    %cst = arith.constant 0.000000e+00 : f32
    %9 = vector.broadcast %cst : f32 to vector<256x256xf32>
    %10 = arith.cmpf oge, %7, %9 : vector<256x256xf32>
    %11 = vector.broadcast %8 : f32 to vector<256x256xf32>
    %12 = arith.mulf %11, %7 : vector<256x256xf32>
    %13 = arith.select %10, %7, %12 : vector<256x256xi1>, vector<256x256xf32>
    %14 = arith.truncf %13 : vector<256x256xf32> to vector<256x256xbf16>
    %c0_6 = arith.constant 0 : index
    %c0_7 = arith.constant 0 : index
    %15 = vector.load %arg5[%c0_6, %c0_7] : memref<256x256xbf16, #tpu.memory_space<vmem>>, vector<256x256xbf16>
    %cst_8 = arith.constant dense<0.000000e+00> : vector<256x256xf32>
    %16 = tpu.matmul %14, %15, %cst_8 {dimension_numbers = #tpu.dot_dimension_numbers<[1], [0], [0], [1], [0, 0, 1, 1], [], []>} : vector<256x256xbf16>, vector<256x256xbf16>, vector<256x256xf32> -> vector<256x256xf32>
    %c0_9 = arith.constant 0 : index
    %c0_10 = arith.constant 0 : index
    %17 = vector.load %arg6[%c0_9, %c0_10] : memref<1x256xf32, #tpu.memory_space<vmem>>, vector<1x256xf32>
    %18 = vector.broadcast %17 : vector<1x256xf32> to vector<256x256xf32>
    %19 = arith.addf %16, %18 : vector<256x256xf32>
    %c1 = arith.constant 1 : index
    %20 = memref.load %arg1[%c1] : memref<4xf32, #tpu.memory_space<smem>>
    %cst_11 = arith.constant 0.000000e+00 : f32
    %21 = vector.broadcast %cst_11 : f32 to vector<256x256xf32>
    %22 = arith.cmpf oge, %19, %21 : vector<256x256xf32>
    %23 = vector.broadcast %20 : f32 to vector<256x256xf32>
    %24 = arith.mulf %23, %19 : vector<256x256xf32>
    %25 = arith.select %22, %19, %24 : vector<256x256xi1>, vector<256x256xf32>
    %26 = arith.truncf %25 : vector<256x256xf32> to vector<256x256xbf16>
    %c0_12 = arith.constant 0 : index
    %c0_13 = arith.constant 0 : index
    %27 = vector.load %arg7[%c0_12, %c0_13] : memref<256x256xbf16, #tpu.memory_space<vmem>>, vector<256x256xbf16>
    %cst_14 = arith.constant dense<0.000000e+00> : vector<256x256xf32>
    %28 = tpu.matmul %26, %27, %cst_14 {dimension_numbers = #tpu.dot_dimension_numbers<[1], [0], [0], [1], [0, 0, 1, 1], [], []>} : vector<256x256xbf16>, vector<256x256xbf16>, vector<256x256xf32> -> vector<256x256xf32>
    %c0_15 = arith.constant 0 : index
    %c0_16 = arith.constant 0 : index
    %29 = vector.load %arg8[%c0_15, %c0_16] : memref<1x256xf32, #tpu.memory_space<vmem>>, vector<1x256xf32>
    %30 = vector.broadcast %29 : vector<1x256xf32> to vector<256x256xf32>
    %31 = arith.addf %28, %30 : vector<256x256xf32>
    %c2 = arith.constant 2 : index
    %32 = memref.load %arg1[%c2] : memref<4xf32, #tpu.memory_space<smem>>
    %cst_17 = arith.constant 0.000000e+00 : f32
    %33 = vector.broadcast %cst_17 : f32 to vector<256x256xf32>
    %34 = arith.cmpf oge, %31, %33 : vector<256x256xf32>
    %35 = vector.broadcast %32 : f32 to vector<256x256xf32>
    %36 = arith.mulf %35, %31 : vector<256x256xf32>
    %37 = arith.select %34, %31, %36 : vector<256x256xi1>, vector<256x256xf32>
    %38 = arith.truncf %37 : vector<256x256xf32> to vector<256x256xbf16>
    %c0_18 = arith.constant 0 : index
    %c0_19 = arith.constant 0 : index
    %39 = vector.load %arg9[%c0_18, %c0_19] : memref<256x256xbf16, #tpu.memory_space<vmem>>, vector<256x256xbf16>
    %cst_20 = arith.constant dense<0.000000e+00> : vector<256x256xf32>
    %40 = tpu.matmul %38, %39, %cst_20 {dimension_numbers = #tpu.dot_dimension_numbers<[1], [0], [0], [1], [0, 0, 1, 1], [], []>} : vector<256x256xbf16>, vector<256x256xbf16>, vector<256x256xf32> -> vector<256x256xf32>
    %c0_21 = arith.constant 0 : index
    %c0_22 = arith.constant 0 : index
    %41 = vector.load %arg10[%c0_21, %c0_22] : memref<1x256xf32, #tpu.memory_space<vmem>>, vector<1x256xf32>
    %42 = vector.broadcast %41 : vector<1x256xf32> to vector<256x256xf32>
    %43 = arith.addf %40, %42 : vector<256x256xf32>
    %c3 = arith.constant 3 : index
    %44 = memref.load %arg1[%c3] : memref<4xf32, #tpu.memory_space<smem>>
    %cst_23 = arith.constant 0.000000e+00 : f32
    %45 = vector.broadcast %cst_23 : f32 to vector<256x256xf32>
    %46 = arith.cmpf oge, %43, %45 : vector<256x256xf32>
    %47 = vector.broadcast %44 : f32 to vector<256x256xf32>
    %48 = arith.mulf %47, %43 : vector<256x256xf32>
    %49 = arith.select %46, %43, %48 : vector<256x256xi1>, vector<256x256xf32>
    %c0_24 = arith.constant 0 : index
    %c0_25 = arith.constant 0 : index
    %50 = vector.load %arg11[%c0_24, %c0_25] : memref<1x256xf32, #tpu.memory_space<vmem>>, vector<1x256xf32>
    %51 = vector.broadcast %50 : vector<1x256xf32> to vector<256x256xf32>
    %52 = arith.mulf %49, %51 : vector<256x256xf32>
    %cst_26 = arith.constant dense<0.000000e+00> : vector<256xf32>
    %53 = vector.multi_reduction <add>, %52, %cst_26 [1] : vector<256x256xf32> to vector<256xf32>
    %54 = vector.shape_cast %53 : vector<256xf32> to vector<256x1xf32>
    %c0_27 = arith.constant 0 : index
    %c0_28 = arith.constant 0 : index
    %55 = vector.load %arg12[%c0_27, %c0_28] : memref<1x1xf32, #tpu.memory_space<vmem>>, vector<1x1xf32>
    %56 = vector.broadcast %55 : vector<1x1xf32> to vector<256x1xf32>
    %57 = arith.addf %54, %56 : vector<256x1xf32>
    %c0_29 = arith.constant 0 : index
    %c0_30 = arith.constant 0 : index
    %58 = vector.load %arg13[%c0_29, %c0_30] : memref<256x1xf32, #tpu.memory_space<vmem>>, vector<256x1xf32>
    tpu.vector_store %arg13[%c0_29, %c0_30], %57 {strides = array<i32>} : memref<256x1xf32, #tpu.memory_space<vmem>>, vector<256x1xf32>,
    return
  }
  func.func @transform_0(%arg0: i32, %arg1: memref<4xf32, #tpu.memory_space<smem>>) -> (i32, i32) {
    %c0_i32 = arith.constant 0 : i32
    %c0_i32_0 = arith.constant 0 : i32
    return %arg0, %c0_i32 : i32, i32
  }
  func.func @transform_1(%arg0: i32, %arg1: memref<4xf32, #tpu.memory_space<smem>>) -> (i32, i32) {
    %c0_i32 = arith.constant 0 : i32
    %c0_i32_0 = arith.constant 0 : i32
    %c0_i32_1 = arith.constant 0 : i32
    return %c0_i32, %c0_i32_0 : i32, i32
  }
  func.func @transform_2(%arg0: i32, %arg1: memref<4xf32, #tpu.memory_space<smem>>) -> (i32, i32) {
    %c0_i32 = arith.constant 0 : i32
    %c0_i32_0 = arith.constant 0 : i32
    %c0_i32_1 = arith.constant 0 : i32
    return %c0_i32, %c0_i32_0 : i32, i32
  }
  func.func @transform_3(%arg0: i32, %arg1: memref<4xf32, #tpu.memory_space<smem>>) -> (i32, i32) {
    %c0_i32 = arith.constant 0 : i32
    %c0_i32_0 = arith.constant 0 : i32
    %c0_i32_1 = arith.constant 0 : i32
    return %c0_i32, %c0_i32_0 : i32, i32
  }
  func.func @transform_4(%arg0: i32, %arg1: memref<4xf32, #tpu.memory_space<smem>>) -> (i32, i32) {
    %c0_i32 = arith.constant 0 : i32
    %c0_i32_0 = arith.constant 0 : i32
    %c0_i32_1 = arith.constant 0 : i32
    return %c0_i32, %c0_i32_0 : i32, i32
  }
  func.func @transform_5(%arg0: i32, %arg1: memref<4xf32, #tpu.memory_space<smem>>) -> (i32, i32) {
    %c0_i32 = arith.constant 0 : i32
    %c0_i32_0 = arith.constant 0 : i32
    %c0_i32_1 = arith.constant 0 : i32
    return %c0_i32, %c0_i32_0 : i32, i32
  }
  func.func @transform_6(%arg0: i32, %arg1: memref<4xf32, #tpu.memory_space<smem>>) -> (i32, i32) {
    %c0_i32 = arith.constant 0 : i32
    %c0_i32_0 = arith.constant 0 : i32
    %c0_i32_1 = arith.constant 0 : i32
    return %c0_i32, %c0_i32_0 : i32, i32
  }
  func.func @transform_7(%arg0: i32, %arg1: memref<4xf32, #tpu.memory_space<smem>>) -> (i32, i32) {
    %c0_i32 = arith.constant 0 : i32
    %c0_i32_0 = arith.constant 0 : i32
    %c0_i32_1 = arith.constant 0 : i32
    return %c0_i32, %c0_i32_0 : i32, i32
  }
  func.func @transform_8(%arg0: i32, %arg1: memref<4xf32, #tpu.memory_space<smem>>) -> (i32, i32) {
    %c0_i32 = arith.constant 0 : i32
    %c0_i32_0 = arith.constant 0 : i32
    %c0_i32_1 = arith.constant 0 : i32
    return %c0_i32, %c0_i32_0 : i32, i32
  }
  func.func @transform_9(%arg0: i32, %arg1: memref<4xf32, #tpu.memory_space<smem>>) -> (i32, i32) {
    %c0_i32 = arith.constant 0 : i32
    %c0_i32_0 = arith.constant 0 : i32
    %c0_i32_1 = arith.constant 0 : i32
    return %c0_i32, %c0_i32_0 : i32, i32
  }
  func.func @transform_10(%arg0: i32, %arg1: memref<4xf32, #tpu.memory_space<smem>>) -> (i32, i32) {
    %c0_i32 = arith.constant 0 : i32
    %c0_i32_0 = arith.constant 0 : i32
    %c0_i32_1 = arith.constant 0 : i32
    return %c0_i32, %c0_i32_0 : i32, i32
  }
  func.func @transform_11(%arg0: i32, %arg1: memref<4xf32, #tpu.memory_space<smem>>) -> (i32, i32) {
    %c0_i32 = arith.constant 0 : i32
    %c0_i32_0 = arith.constant 0 : i32
    return %arg0, %c0_i32 : i32, i32
  }
}

</mosaic_0001>

<bundles_post_ra>
// kernel: dense_nn_forward.1
= control target key start
LH: loop header
LB: loop body
LE: loop exit
PB: predicated region body
PF: predicated region fallthrough
CT: control target
= control target key end

     0   :  { %s4953_s0 = inlined_call_operand.vmem [shape: f32[4], index: 0, kind: input, shape index: {}]   ;;  %s4954_s1 = inlined_call_operand.vmem [shape: f32[512,1], index: 1, kind: input, shape index: {}]   ;;  %s4955_s2 = inlined_call_operand.vmem [shape: f32[1,256], index: 2, kind: input, shape index: {}]   ;;  %s4956_s3 = inlined_call_operand.vmem [shape: f32[1,256], index: 3, kind: input, shape index: {}]   ;;  %s4957_s4 = inlined_call_operand.vmem [shape: bf16[256,256], index: 4, kind: input, shape index: {}]   ;;  %s4958_s5 = inlined_call_operand.vmem [shape: f32[1,256], index: 5, kind: input, shape index: {}]   ;;  %s4959_s6 = inlined_call_operand.vmem [shape: bf16[256,256], index: 6, kind: input, shape index: {}]   ;;  %s4960_s7 = inlined_call_operand.vmem [shape: f32[1,256], index: 7, kind: input, shape index: {}]   ;;  %s4961_s8 = inlined_call_operand.vmem [shape: bf16[256,256], index: 8, kind: input, shape index: {}]   ;;  %s4962_s9 = inlined_call_operand.vmem [shape: f32[1,256], index: 9, kind: input, shape index: {}]   ;;  %s4963_s10 = inlined_call_operand.vmem [shape: f32[1,256], index: 10, kind: input, shape index: {}]   ;;  %s4964_s12 = inlined_call_operand.vmem [shape: f32[512,1], index: 12, kind: output, shape index: {}]   ;;  %s4965_s11 = inlined_call_operand.<no memory space> [shape: f32[1,1], index: 11, kind: input, shape index: {}]  }
   0x1   :  { %s17_s23 = sshll.u32 %s4953_s0, 4  ;;  %v21_v0 = vstv %s4965_s11  ;;  %s18_s23 = int_to_ptr.vmem [resolvable:$true] %s17_s23 }
   0x2   :  { %22 = vst [vmem:[#allocation4] sm:$0x1] %v21_v0  ;;  %s3405_s26 = scalar_lea.vmem %s18_s23, 16  ;;  %p3410_p1 = scmp.lt.s32.totalorder %s18_s23, %s18_s23 }
   0x3   :  { %p3406_p0 = scmp.ne.s32.totalorder %s18_s23, %s3405_s26  ;;  %p3411_p2 = scmp.lt.s32.totalorder %s3405_s26, %s3405_s26 }
   0x5   :  { %p3412_p3 = por %p3411_p2, %p3410_p1 }
   0x7   :  { %p3413_p4 = pnand %p3412_p3, %p3406_p0 }
   0x9   :  { %3416 = shalt.err (!%p3413_p4)  }
   0xa   :  { %s3427_s27 = smov [#allocation3]  }
   0xb   :  { %20 = dma.vmem_to_smem %s18_s23, 16, %s3427_s27, [#allocation2] }
   0xc   :  { %3421 = dma.done.wait [#allocation2], 16 }
   0xd   :  { %3422 = vsyncadd [#allocation2], 4294967280 }
   0xe   :  { %24 = sfence }
   0xf   :  { %s3500_s28 = smov 0  }
  0x10 LB: > { %s3106_s0 = sadd.s32 4294967295, %s3425_s28   ;;  %p3110_p5 = scmp.ge.s32.totalorder %s3425_s28, 1  ;;  %s3425_s28 = sphi %s3500_s28, %s30_s28  }
  0x11   : > { %p347_p6 = scmp.lt.s32.totalorder %s3425_s28, 3 }
  0x13   : > { %p348_p7 = pnand %p3110_p5, %p347_p6 }
  0x14   : > { %s3111_s11 = sshll.u32 (!%p348_p7), %s3106_s0, 5  ;;  %v3261_v1 = vld [vmem:[%s4957_s4 + $0x4] ss:$8 sps:$4 sm:$0xff] (!%p348_p7)   ;;  %v3428_v2 = vmov (!%p348_p7), 0   ;;  %v3263_v3 = vld [vmem:[%s4957_s4] ss:$8 sps:$4 sm:$0xff] (!%p348_p7)  }
  0x15   : > { %351 = sbr.rel (%p348_p7) target bundleno = 1119 (0x45f), region = 64  ;;  %3260 = vset.pattern.permute.xlu1 (!%p348_p7), %v3428_v2  ;;  %3259 = vset.pattern.permute.xlu0 (!%p348_p7), %v3428_v2  ;;  %p388_p8 = scmp.lt.s32.totalorder (!%p348_p7), %s3111_s11, 63  ;;  %v3264_v4 = vld [vmem:[%s4957_s4 + $0x14] ss:$8 sps:$4 sm:$0xff] (!%p348_p7)   ;;  %v3266_v5 = vld [vmem:[%s4957_s4 + $0x10] ss:$8 sps:$4 sm:$0xff] (!%p348_p7)  }
  0x16   : > { %1173 = vmatprep.subr.bf16.mxu0 (!%p348_p7), %v3261_v1  ;;  %3217 = vmatprep.subr.bf16.mxu1 (!%p348_p7), %v3261_v1  ;;  %v3267_v6 = vld [vmem:[%s4957_s4 + $0x24] ss:$8 sps:$4 sm:$0xff] (!%p348_p7)   ;;  %v3269_v9 = vld [vmem:[%s4957_s4 + $0x20] ss:$8 sps:$4 sm:$0xff] (!%p348_p7)   ;;  %v3270_v12 = vld [vmem:[%s4957_s4 + $0x34] ss:$8 sps:$4 sm:$0xff] (!%p348_p7)  }
  0x17   : > { %1174 = vmatpush1.bf16.msra.mxu0 (!%p348_p7), %v3263_v3  ;;  %3233 = vmatpush1.bf16.msra.mxu1 (!%p348_p7), %v3263_v3  ;;  %v3272_v13 = vld [vmem:[%s4957_s4 + $0x30] ss:$8 sps:$4 sm:$0xff] (!%p348_p7)   ;;  %v3273_v16 = vld [vmem:[%s4957_s4 + $0x44] ss:$8 sps:$4 sm:$0xff] (!%p348_p7)   ;;  %v3275_v17 = vld [vmem:[%s4957_s4 + $0x40] ss:$8 sps:$4 sm:$0xff] (!%p348_p7)   ;;  %v593_v3 = vlaneseq (!%p348_p7) }
  0x18   : > { %1175 = vmatprep.subr.bf16.mxu0 (!%p348_p7), %v3264_v4  ;;  %3218 = vmatprep.subr.bf16.mxu1 (!%p348_p7), %v3264_v4  ;;  %v3276_v20 = vld [vmem:[%s4957_s4 + $0x54] ss:$8 sps:$4 sm:$0xff] (!%p348_p7)   ;;  %v3278_v22 = vld [vmem:[%s4957_s4 + $0x50] ss:$8 sps:$4 sm:$0xff] (!%p348_p7)   ;;  %v3279_v24 = vld [vmem:[%s4957_s4 + $0x64] ss:$8 sps:$4 sm:$0xff] (!%p348_p7)  }
  0x19   : > { %v3281_v26 = vld [vmem:[%s4957_s4 + $0x60] ss:$8 sps:$4 sm:$0xff] (!%p348_p7)   ;;  %v3282_v28 = vld [vmem:[%s4957_s4 + $0x74] ss:$8 sps:$4 sm:$0xff] (!%p348_p7)   ;;  %v3284_v29 = vld [vmem:[%s4957_s4 + $0x70] ss:$8 sps:$4 sm:$0xff] (!%p348_p7)  }
  0x1a   : > { %v3285_v32 = vld [vmem:[%s4957_s4 + $0x84] ss:$8 sps:$4 sm:$0xff] (!%p348_p7)   ;;  %v3287_v34 = vld [vmem:[%s4957_s4 + $0x80] ss:$8 sps:$4 sm:$0xff] (!%p348_p7)   ;;  %v3288_v36 = vld [vmem:[%s4957_s4 + $0x94] ss:$8 sps:$4 sm:$0xff] (!%p348_p7)  }
  0x1b   : > { %1176 = vmatpush1.bf16.msra.mxu0 (!%p348_p7), %v3266_v5  ;;  %3234 = vmatpush1.bf16.msra.mxu1 (!%p348_p7), %v3266_v5  ;;  %v3290_v37 = vld [vmem:[%s4957_s4 + $0x90] ss:$8 sps:$4 sm:$0xff] (!%p348_p7)   ;;  %v3291_v40 = vld [vmem:[%s4957_s4 + $0xa4] ss:$8 sps:$4 sm:$0xff] (!%p348_p7)   ;;  %v3293_v41 = vld [vmem:[%s4957_s4 + $0xa0] ss:$8 sps:$4 sm:$0xff] (!%p348_p7)  }
  0x1c   : > { %s4967_s11 = smov (!%p388_p8, %s3111_s11), 63  ;;  %1177 = vmatprep.subr.bf16.mxu0 %v3267_v6  ;;  %3219 = vmatprep.subr.bf16.mxu1 %v3267_v6  ;;  %v3294_v44 = vld [vmem:[%s4957_s4 + $0xb4] ss:$8 sps:$4 sm:$0xff]   ;;  %v3296_v45 = vld [vmem:[%s4957_s4 + $0xb0] ss:$8 sps:$4 sm:$0xff]   ;;  %v594_v4 = vshrl.u32 %v593_v3, 7 }
  0x1d   : > { %s3112_s19 = sshll.u32 %s4967_s11, 3  ;;  %v3297_v48 = vld [vmem:[%s4957_s4 + $0xc4] ss:$8 sps:$4 sm:$0xff]   ;;  %v3299_v49 = vld [vmem:[%s4957_s4 + $0xc0] ss:$8 sps:$4 sm:$0xff]   ;;  %s743_s18 = sld [smem:[#allocation3]] }
  0x1e   : > { %s3531_s24 = scalar_lea.vmem %s4954_s1, %s3112_s19  ;;  %v3300_v52 = vld [vmem:[%s4957_s4 + $0xd4] ss:$8 sps:$4 sm:$0xff]   ;;  %v3302_v53 = vld [vmem:[%s4957_s4 + $0xd0] ss:$8 sps:$4 sm:$0xff]   ;;  %v3303_v56 = vld [vmem:[%s4957_s4 + $0xe4] ss:$8 sps:$4 sm:$0xff]   ;;  %s4852_s23 = scalar_lea.vmem %s4964_s12, %s3112_s19 }
  0x1f   : > { %v401_v7 = vld [vmem:[%s3531_s24 + $0x10] sm:$0xff]  ;;  %v399_v8 = vld [vmem:[%s3531_s24] sm:$0xff]  ;;  %v402_v10 = vld [vmem:[%s3531_s24 + $0x18] sm:$0xff]  ;;  %1178 = vmatpush1.bf16.msra.mxu0 %v3269_v9  ;;  %3235 = vmatpush1.bf16.msra.mxu1 %v3269_v9  ;;  %v3649_v5 = vsub.s32 1, %v594_v4  ;;  %s3147_s14 = sld [smem:[#allocation3 + $0x1]]  ;;  %s3180_s13 = sld [smem:[#allocation3 + $0x2]] }
  0x20   : > { %444 = vperm.xlu1 %3260, %v401_v7   ;;  %434 = vperm.xlu0 %3259, %v399_v8   ;;  %v400_v11 = vld [vmem:[%s3531_s24 + $0x8] sm:$0xff]  ;;  %v403_v15 = vld [vmem:[%s3531_s24 + $0x20] sm:$0xff]  ;;  %v406_v18 = vld [vmem:[%s3531_s24 + $0x38] sm:$0xff]  ;;  %v3654_v7 = vsub.s32 0, %v594_v4  ;;  %s3213_s16 = sld [smem:[#allocation3 + $0x3]] }
  0x21   : > { %v404_v14 = vld [vmem:[%s3531_s24 + $0x28] sm:$0xff]  ;;  %1179 = vmatprep.subr.bf16.mxu0 %v3270_v12  ;;  %3220 = vmatprep.subr.bf16.mxu1 %v3270_v12  ;;  %v405_v19 = vld [vmem:[%s3531_s24 + $0x30] sm:$0xff]  ;;  %v407_v23 = vld [vmem:[%s3531_s24 + $0x40] sm:$0xff] }
  0x22   : > { %v408_v21 = vld [vmem:[%s3531_s24 + $0x48] sm:$0xff]  ;;  %v410_v25 = vld [vmem:[%s3531_s24 + $0x58] sm:$0xff]  ;;  %v409_v27 = vld [vmem:[%s3531_s24 + $0x50] sm:$0xff] }
  0x23   : > { %1180 = vmatpush1.bf16.msra.mxu0 %v3272_v13  ;;  %3236 = vmatpush1.bf16.msra.mxu1 %v3272_v13  ;;  %v412_v30 = vld [vmem:[%s3531_s24 + $0x68] sm:$0xff]  ;;  %v411_v31 = vld [vmem:[%s3531_s24 + $0x60] sm:$0xff]  ;;  %v414_v33 = vld [vmem:[%s3531_s24 + $0x78] sm:$0xff] }
  0x24   : > { %449 = vperm.xlu1 %3260, %v402_v10   ;;  %439 = vperm.xlu0 %3259, %v400_v11   ;;  %v413_v35 = vld [vmem:[%s3531_s24 + $0x70] sm:$0xff]  ;;  %v416_v38 = vld [vmem:[%s3531_s24 + $0x88] sm:$0xff]  ;;  %v415_v39 = vld [vmem:[%s3531_s24 + $0x80] sm:$0xff] }
  0x25   : > { %1181 = vmatprep.subr.bf16.mxu0 %v3273_v16  ;;  %3221 = vmatprep.subr.bf16.mxu1 %v3273_v16  ;;  %v418_v42 = vld [vmem:[%s3531_s24 + $0x98] sm:$0xff]  ;;  %v417_v43 = vld [vmem:[%s3531_s24 + $0x90] sm:$0xff]  ;;  %v420_v46 = vld [vmem:[%s3531_s24 + $0xa8] sm:$0xff] }
  0x26   : > { %v419_v47 = vld [vmem:[%s3531_s24 + $0xa0] sm:$0xff]  ;;  %v422_v50 = vld [vmem:[%s3531_s24 + $0xb8] sm:$0xff]  ;;  %v421_v51 = vld [vmem:[%s3531_s24 + $0xb0] sm:$0xff] }
  0x27   : > { %1182 = vmatpush1.bf16.msra.mxu0 %v3275_v17  ;;  %3237 = vmatpush1.bf16.msra.mxu1 %v3275_v17  ;;  %v424_v54 = vld [vmem:[%s3531_s24 + $0xc8] sm:$0xff]  ;;  %v423_v55 = vld [vmem:[%s3531_s24 + $0xc0] sm:$0xff]  ;;  %v426_v58 = vld [vmem:[%s3531_s24 + $0xd8] sm:$0xff] }
  0x28   : > { %459 = vperm.xlu1 %3260, %v404_v14   ;;  %454 = vperm.xlu0 %3259, %v403_v15   ;;  %v3305_v57 = vld [vmem:[%s4957_s4 + $0xe0] ss:$8 sps:$4 sm:$0xff]   ;;  %v425_v59 = vld [vmem:[%s3531_s24 + $0xd0] sm:$0xff]  ;;  %v430_v0 = vld [vmem:[%s3531_s24 + $0xf8] sm:$0xff] }
  0x29   : > { %1183 = vmatprep.subr.bf16.mxu0 %v3276_v20  ;;  %3222 = vmatprep.subr.bf16.mxu1 %v3276_v20  ;;  %v3306_v60 = vld [vmem:[%s4957_s4 + $0xf4] ss:$8 sps:$4 sm:$0xff]   ;;  %v3308_v61 = vld [vmem:[%s4957_s4 + $0xf0] ss:$8 sps:$4 sm:$0xff]   ;;  %v428_v62 = vld [vmem:[%s3531_s24 + $0xe8] sm:$0xff] }
  0x2a   : > { %v427_v63 = vld [vmem:[%s3531_s24 + $0xe0] sm:$0xff]  ;;  %v429_v1 = vld [vmem:[%s3531_s24 + $0xf0] sm:$0xff] }
  0x2b   : > { %1184 = vmatpush1.bf16.msra.mxu0 %v3278_v22  ;;  %3238 = vmatpush1.bf16.msra.mxu1 %v3278_v22  ;;  %v3311_v2 = vld [vmem:[%s4959_s6 + $0x4] ss:$8 sps:$4 sm:$0xff]   ;;  %v431_v6 = vld [vmem:[%s4955_s2] sm:$0x3] }
  0x2c   : > { %469 = vperm.xlu1 %3260, %v406_v18   ;;  %464 = vperm.xlu0 %3259, %v405_v19   ;;  %v3657_v8 = vrot.slane %v431_v6, %v3649_v5  ;;  %v3660_v9 = vrot.slane %v431_v6, %v3654_v7  ;;  %v667_v10 = vld [vmem:[%s4956_s3] sm:$0x3] }
  0x2d   : > { %1185 = vmatprep.subr.bf16.mxu0 %v3279_v24  ;;  %3223 = vmatprep.subr.bf16.mxu1 %v3279_v24  ;;  %v3666_v13 = vrot.slane %v667_v10, %v3649_v5  ;;  %v3671_v16 = vrot.slane %v667_v10, %v3654_v7 }
  0x2f   : > { %1186 = vmatpush1.bf16.msra.mxu0 %v3281_v26  ;;  %3239 = vmatpush1.bf16.msra.mxu1 %v3281_v26 }
  0x30   : > { %479 = vperm.xlu1 %3260, %v408_v21   ;;  %474 = vperm.xlu0 %3259, %v407_v23  }
  0x31   : > { %1187 = vmatprep.subr.bf16.mxu0 %v3282_v28  ;;  %3224 = vmatprep.subr.bf16.mxu1 %v3282_v28 }
  0x33   : > { %1188 = vmatpush1.bf16.msra.mxu0 %v3284_v29  ;;  %3240 = vmatpush1.bf16.msra.mxu1 %v3284_v29 }
  0x34   : > { %489 = vperm.xlu1 %3260, %v410_v25   ;;  %484 = vperm.xlu0 %3259, %v409_v27   ;;  %v3679_v25 = vstv %s743_s18 }
  0x35   : > { %1189 = vmatprep.subr.bf16.mxu0 %v3285_v32  ;;  %3225 = vmatprep.subr.bf16.mxu1 %v3285_v32 }
  0x37   : > { %1190 = vmatpush1.bf16.msra.mxu0 %v3287_v34  ;;  %3241 = vmatpush1.bf16.msra.mxu1 %v3287_v34 }
  0x38   : > { %499 = vperm.xlu1 %3260, %v412_v30   ;;  %494 = vperm.xlu0 %3259, %v411_v31  }
  0x39   : > { %1191 = vmatprep.subr.bf16.mxu0 %v3288_v36  ;;  %3226 = vmatprep.subr.bf16.mxu1 %v3288_v36 }
  0x3b   : > { %1192 = vmatpush1.bf16.msra.mxu0 %v3290_v37  ;;  %3242 = vmatpush1.bf16.msra.mxu1 %v3290_v37 }
  0x3c   : > { %509 = vperm.xlu1 %3260, %v414_v33   ;;  %504 = vperm.xlu0 %3259, %v413_v35  }
  0x3d   : > { %1193 = vmatprep.subr.bf16.mxu0 %v3291_v40  ;;  %3227 = vmatprep.subr.bf16.mxu1 %v3291_v40 }
  0x3f   : > { %1194 = vmatpush1.bf16.msra.mxu0 %v3293_v41  ;;  %3243 = vmatpush1.bf16.msra.mxu1 %v3293_v41 }
  0x40   : > { %519 = vperm.xlu1 %3260, %v416_v38   ;;  %514 = vperm.xlu0 %3259, %v415_v39  }
  0x41   : > { %1195 = vmatprep.subr.bf16.mxu0 %v3294_v44  ;;  %3228 = vmatprep.subr.bf16.mxu1 %v3294_v44 }
  0x43   : > { %1196 = vmatpush1.bf16.msra.mxu0 %v3296_v45  ;;  %3244 = vmatpush1.bf16.msra.mxu1 %v3296_v45 }
  0x44   : > { %529 = vperm.xlu1 %3260, %v418_v42   ;;  %524 = vperm.xlu0 %3259, %v417_v43  }
  0x45   : > { %1197 = vmatprep.subr.bf16.mxu0 %v3297_v48  ;;  %3229 = vmatprep.subr.bf16.mxu1 %v3297_v48 }
  0x47   : > { %1198 = vmatpush1.bf16.msra.mxu0 %v3299_v49  ;;  %3245 = vmatpush1.bf16.msra.mxu1 %v3299_v49 }
  0x48   : > { %539 = vperm.xlu1 %3260, %v420_v46   ;;  %534 = vperm.xlu0 %3259, %v419_v47  }
  0x49   : > { %1199 = vmatprep.subr.bf16.mxu0 %v3300_v52  ;;  %3230 = vmatprep.subr.bf16.mxu1 %v3300_v52 }
  0x4b   : > { %1200 = vmatpush1.bf16.msra.mxu0 %v3302_v53  ;;  %3246 = vmatpush1.bf16.msra.mxu1 %v3302_v53 }
  0x4c   : > { %549 = vperm.xlu1 %3260, %v422_v50   ;;  %544 = vperm.xlu0 %3259, %v421_v51  }
  0x4d   : > { %1201 = vmatprep.subr.bf16.mxu0 %v3303_v56  ;;  %3231 = vmatprep.subr.bf16.mxu1 %v3303_v56 }
  0x4f   : > { %1202 = vmatpush1.bf16.msra.mxu0 %v3305_v57  ;;  %3247 = vmatpush1.bf16.msra.mxu1 %v3305_v57 }
  0x50   : > { %559 = vperm.xlu1 %3260, %v424_v54   ;;  %554 = vperm.xlu0 %3259, %v423_v55  }
  0x51   : > { %1203 = vmatprep.subr.bf16.mxu0 %v3306_v60  ;;  %3232 = vmatprep.subr.bf16.mxu1 %v3306_v60 }
  0x53   : > { %1204 = vmatpush1.bf16.msra.mxu0 %v3308_v61  ;;  %3248 = vmatpush1.bf16.msra.mxu1 %v3308_v61 }
  0x54   : > { %569 = vperm.xlu1 %3260, %v426_v58   ;;  %564 = vperm.xlu0 %3259, %v425_v59  }
  0x55   : > { %1796 = vmatprep.subr.bf16.mxu1 %v3311_v2 }
  0x58   : > { %579 = vperm.xlu1 %3260, %v428_v62   ;;  %574 = vperm.xlu0 %3259, %v427_v63  }
  0x5c   : > { %589 = vperm.xlu1 %3260, %v430_v0   ;;  %584 = vperm.xlu0 %3259, %v429_v1  }
  0x9f   : > { %v445_v11 = vpop.permute.xlu1 %444  ;;  %v435_v12 = vpop.permute.xlu0 %434 }
  0xa0   : > { %v608_v14 = vmul.f32 %v3657_v8, %v445_v11  ;;  %v604_v15 = vmul.f32 %v3657_v8, %v435_v12  ;;  %v603_v17 = vmul.f32 %v3660_v9, %v435_v12  ;;  %v607_v31 = vmul.f32 %v3660_v9, %v445_v11 }
  0xa2   : > { %v684_v23 = vadd.f32 %v3666_v13, %v608_v14  ;;  %v680_v24 = vadd.f32 %v3666_v13, %v604_v15  ;;  %v679_v26 = vadd.f32 %v3671_v16, %v603_v17  ;;  %v683_v41 = vadd.f32 %v3671_v16, %v607_v31 }
  0xa3   : > { %v450_v18 = vpop.permute.xlu1 %449  ;;  %v440_v19 = vpop.permute.xlu0 %439 }
  0xa4   : > { %v610_v20 = vmul.f32 %v3657_v8, %v450_v18  ;;  %v605_v21 = vmul.f32 %v3660_v9, %v440_v19  ;;  %v606_v22 = vmul.f32 %v3657_v8, %v440_v19  ;;  %v609_v32 = vmul.f32 %v3660_v9, %v450_v18 }
  0xa5   : > { %v814_v34 = vmul.f32 %v3679_v25, %v684_v23  ;;  %v810_v36 = vmul.f32 %v3679_v25, %v680_v24  ;;  %v809_v38 = vmul.f32 %v3679_v25, %v679_v26  ;;  %vm745_vm0 = vcmp.ge.f32.partialorder %v680_v24, 0.0 }
  0xa6   : > { %v681_v27 = vadd.f32 %v3671_v16, %v605_v21  ;;  %v682_v28 = vadd.f32 %v3666_v13, %v606_v22  ;;  %v686_v33 = vadd.f32 %v3666_v13, %v610_v20  ;;  %vm744_vm3 = vcmp.ge.f32.partialorder %v679_v26, 0.0 }
  0xa7   : > { %v460_v29 = vpop.permute.xlu1 %459  ;;  %v455_v30 = vpop.permute.xlu0 %454  ;;  %vm749_vm4 = vcmp.ge.f32.partialorder %v684_v23, 0.0  ;;  %v685_v42 = vadd.f32 %v3671_v16, %v609_v32  ;;  %v874_v46 = vsel %vm745_vm0, %v680_v24, %v810_v36  ;;  %v873_v51 = vsel %vm744_vm3, %v679_v26, %v809_v38 }
  0xa8   : > { %v811_v35 = vmul.f32 %v3679_v25, %v681_v27  ;;  %v812_v37 = vmul.f32 %v3679_v25, %v682_v28  ;;  %vm747_vm1 = vcmp.ge.f32.partialorder %v682_v28, 0.0  ;;  %vm746_vm2 = vcmp.ge.f32.partialorder %v681_v27, 0.0 }
  0xa9   : > { %v816_v43 = vmul.f32 %v3679_v25, %v686_v33  ;;  %v614_v44 = vmul.f32 %v3657_v8, %v460_v29  ;;  %v612_v45 = vmul.f32 %v3657_v8, %v455_v30  ;;  %vm751_vm5 = vcmp.ge.f32.partialorder %v686_v33, 0.0 }
  0xaa   : > { %v876_v47 = vsel %vm747_vm1, %v682_v28, %v812_v37  ;;  %v875_v48 = vsel %vm746_vm2, %v681_v27, %v811_v35  ;;  %v611_v49 = vmul.f32 %v3660_v9, %v455_v30  ;;  %v878_v53 = vsel %vm749_vm4, %v684_v23, %v814_v34 }
  0xab   : > { %v470_v39 = vpop.permute.xlu1 %469  ;;  %v465_v40 = vpop.permute.xlu0 %464  ;;  %v938_v50 = vpack.c.bf16 %v876_v47, %v874_v46  ;;  %v937_v55 = vpack.c.bf16 %v875_v48, %v873_v51  ;;  %v690_v56 = vadd.f32 %v3666_v13, %v614_v44  ;;  %v880_v57 = vsel %vm751_vm5, %v686_v33, %v816_v43 }
  0xac   : > { %v813_v58 = vmul.f32 %v3679_v25, %v683_v41  ;;  %v815_v59 = vmul.f32 %v3679_v25, %v685_v42  ;;  %v688_v60 = vadd.f32 %v3666_v13, %v612_v45  ;;  %v940_v61 = vpack.c.bf16 %v880_v57, %v878_v53 }
  0xad   : > { %1205 = vmatprep.mubr.bf16.mxu0 %v938_v50  ;;  %v613_v62 = vmul.f32 %v3660_v9, %v460_v29  ;;  %v687_v63 = vadd.f32 %v3671_v16, %v611_v49  ;;  %vm748_vm6 = vcmp.ge.f32.partialorder %v683_v41, 0.0  ;;  %vm750_vm7 = vcmp.ge.f32.partialorder %v685_v42, 0.0 }
  0xae   : > { %1206 = vmatmul.mubr.bf16.vlgmr.msra.gmra.mrb[0].mxu0 %v937_v55  ;;  %v617_v2 = vmul.f32 %v3660_v9, %v470_v39  ;;  %v820_v3 = vmul.f32 %v3679_v25, %v690_v56  ;;  %v618_v4 = vmul.f32 %v3657_v8, %v470_v39  ;;  %v615_v6 = vmul.f32 %v3660_v9, %v465_v40 }
  0xaf   : > { %v480_v52 = vpop.permute.xlu1 %479  ;;  %v475_v54 = vpop.permute.xlu0 %474  ;;  %1215 = vmatprep.mubr.bf16.mxu0 %v940_v61  ;;  %v818_v10 = vmul.f32 %v3679_v25, %v688_v60  ;;  %v616_v11 = vmul.f32 %v3657_v8, %v465_v40  ;;  %v877_v12 = vsel %vm748_vm6, %v683_v41, %v813_v58  ;;  %v879_v14 = vsel %vm750_vm7, %v685_v42, %v815_v59 }
  0xb0   : > { %v689_v15 = vadd.f32 %v3671_v16, %v613_v62  ;;  %v817_v17 = vmul.f32 %v3679_v25, %v687_v63  ;;  %v621_v18 = vmul.f32 %v3660_v9, %v480_v52  ;;  %vm753_vm8 = vcmp.ge.f32.partialorder %v688_v60, 0.0 }
  0xb1   : > { %v3716_v21 = vadd.f32 %v3671_v16, %v617_v2  ;;  %v622_v22 = vmul.f32 %v3657_v8, %v480_v52  ;;  %v619_v23 = vmul.f32 %v3660_v9, %v475_v54  ;;  %v939_v24 = vpack.c.bf16 %v879_v14, %v877_v12 }
  0xb2   : > { %v694_v26 = vadd.f32 %v3666_v13, %v618_v4  ;;  %v3722_v27 = vadd.f32 %v3671_v16, %v615_v6  ;;  %v620_v28 = vmul.f32 %v3657_v8, %v475_v54  ;;  %vm755_vm9 = vcmp.ge.f32.partialorder %v690_v56, 0.0 }
  0xb3   : > { %v490_v0 = vpop.permute.xlu1 %489  ;;  %v485_v1 = vpop.permute.xlu0 %484  ;;  %v692_v29 = vadd.f32 %v3666_v13, %v616_v11  ;;  %v882_v31 = vsel %vm753_vm8, %v688_v60, %v818_v10  ;;  %v884_v32 = vsel %vm755_vm9, %v690_v56, %v820_v3  ;;  %v3728_v33 = vadd.f32 %v3671_v16, %v621_v18 }
  0xb4   : > { %v625_v30 = vmul.f32 %v3660_v9, %v490_v0  ;;  %v626_v34 = vmul.f32 %v3657_v8, %v490_v0  ;;  %v942_v35 = vpack.c.bf16 %v884_v32, %v882_v31  ;;  %vm752_vm10 = vcmp.ge.f32.partialorder %v687_v63, 0.0 }
  0xb5   : > { %v819_v38 = vmul.f32 %v3679_v25, %v689_v15  ;;  %v823_v39 = vmul.f32 %v3679_v25, %v3716_v21  ;;  %v3739_v40 = vadd.f32 %v3666_v13, %v622_v22  ;;  %v3742_v41 = vadd.f32 %v3671_v16, %v619_v23 }
  0xb6   : > { %1216 = vmatmul.mubr.bf16.gmra.mrb[4].mxu0 %v939_v24  ;;  %v824_v42 = vmul.f32 %v3679_v25, %v694_v26  ;;  %v3746_v43 = vadd.f32 %v3666_v13, %v620_v28  ;;  %v623_v44 = vmul.f32 %v3660_v9, %v485_v1  ;;  %v624_v45 = vmul.f32 %v3657_v8, %v485_v1 }
  0xb7   : > { %v500_v19 = vpop.permute.xlu1 %499  ;;  %v3713_v20 = vpop.permute.xlu0 %494  ;;  %1225 = vmatprep.mubr.bf16.mxu0 %v942_v35  ;;  %v821_v46 = vmul.f32 %v3679_v25, %v3722_v27  ;;  %v3753_v47 = vadd.f32 %v3671_v16, %v625_v30  ;;  %vm754_vm11 = vcmp.ge.f32.partialorder %v689_v15, 0.0  ;;  %v881_v48 = vsel %vm752_vm10, %v687_v63, %v817_v17 }
  0xb8   : > { %v822_v49 = vmul.f32 %v3679_v25, %v692_v29  ;;  %v3758_v50 = vmul.f32 %v3679_v25, %v3728_v33  ;;  %v3761_v51 = vadd.f32 %v3666_v13, %v626_v34  ;;  %v629_v52 = vmul.f32 %v3660_v9, %v500_v19 }
  0xb9   : > { %v828_v55 = vmul.f32 %v3679_v25, %v3739_v40  ;;  %v3768_v56 = vmul.f32 %v3679_v25, %v3742_v41  ;;  %v630_v57 = vmul.f32 %v3657_v8, %v500_v19  ;;  %v883_v58 = vsel %vm754_vm11, %v689_v15, %v819_v38 }
  0xba   : > { %v826_v59 = vmul.f32 %v3679_v25, %v3746_v43  ;;  %v3774_v60 = vadd.f32 %v3671_v16, %v623_v44  ;;  %v3777_v61 = vadd.f32 %v3666_v13, %v624_v45  ;;  %v941_v62 = vpack.c.bf16 %v883_v58, %v881_v48 }
  0xbb   : > { %v3731_v36 = vpop.permute.xlu1 %509  ;;  %v3733_v37 = vpop.permute.xlu0 %504  ;;  %v3781_v63 = vmul.f32 %v3679_v25, %v3753_v47  ;;  %vm757_vm12 = vcmp.ge.f32.partialorder %v692_v29, 0.0  ;;  %vm759_vm13 = vcmp.ge.f32.partialorder %v694_v26, 0.0  ;;  %v3786_v1 = vmul.f32 %v3679_v25, %v3761_v51 }
  0xbc   : > { %v3789_v2 = vadd.f32 %v3671_v16, %v629_v52  ;;  %v886_v3 = vsel %vm757_vm12, %v692_v29, %v822_v49  ;;  %v888_v4 = vsel %vm759_vm13, %v694_v26, %v824_v42  ;;  %v3792_v6 = vadd.f32 %v3666_v13, %v630_v57 }
  0xbd   : > { %v944_v11 = vpack.c.bf16 %v888_v4, %v886_v3  ;;  %v3798_v17 = vmul.f32 %v3679_v25, %v3774_v60  ;;  %v3802_v18 = vmul.f32 %v3679_v25, %v3777_v61  ;;  %v627_v19 = vmul.f32 %v3660_v9, %v3713_v20 }
  0xbe   : > { %1226 = vmatmul.mubr.bf16.gmra.mrb[8].mxu0 %v941_v62  ;;  %v628_v23 = vmul.f32 %v3657_v8, %v3713_v20  ;;  %vm756_vm14 = vcmp.ge.f32.partialorder %v3722_v27, 0.0  ;;  %vm758_vm15 = vcmp.ge.f32.partialorder %v3716_v21, 0.0  ;;  %v3814_v26 = vmul.f32 %v3679_v25, %v3789_v2 }
  0xbf   : > { %v520_v53 = vpop.permute.xlu1 %519  ;;  %v515_v54 = vpop.permute.xlu0 %514  ;;  %1235 = vmatprep.mubr.bf16.mxu0 %v944_v11  ;;  %v885_v30 = vsel %vm756_vm14, %v3722_v27, %v821_v46  ;;  %v3821_v20 = vmul.f32 %v3679_v25, %v3792_v6  ;;  %v887_v34 = vsel %vm758_vm15, %v3716_v21, %v823_v39  ;;  %v633_v35 = vmul.f32 %v3660_v9, %v3731_v36 }
  0xc0   : > { %v635_v0 = vmul.f32 %v3660_v9, %v515_v54  ;;  %v637_v10 = vmul.f32 %v3660_v9, %v520_v53  ;;  %v636_v12 = vmul.f32 %v3657_v8, %v515_v54  ;;  %v638_v22 = vmul.f32 %v3657_v8, %v520_v53 }
  0xc1   : > { %v634_v38 = vmul.f32 %v3657_v8, %v3731_v36  ;;  %v943_v44 = vpack.c.bf16 %v887_v34, %v885_v30  ;;  %v3832_v27 = vadd.f32 %v3671_v16, %v627_v19  ;;  %vm761_vm0 = vcmp.ge.f32.partialorder %v3746_v43, 0.0 }
  0xc2   : > { %v711_v24 = vadd.f32 %v3671_v16, %v635_v0  ;;  %v713_v31 = vadd.f32 %v3671_v16, %v637_v10  ;;  %v712_v32 = vadd.f32 %v3666_v13, %v636_v12  ;;  %v714_v42 = vadd.f32 %v3666_v13, %v638_v22 }
  0xc3   : > { %v530_v14 = vpop.permute.xlu1 %529  ;;  %v525_v15 = vpop.permute.xlu0 %524  ;;  %vm763_vm1 = vcmp.ge.f32.partialorder %v3739_v40, 0.0  ;;  %v890_v46 = vsel %vm761_vm0, %v3746_v43, %v826_v59  ;;  %v3844_v53 = vadd.f32 %v3666_v13, %v628_v23  ;;  %v631_v54 = vmul.f32 %v3660_v9, %v3733_v37  ;;  %v3309_v23 = vld [vmem:[%s4959_s6] ss:$8 sps:$4 sm:$0xff]  }
  0xc4   : > { %v642_v28 = vmul.f32 %v3657_v8, %v530_v14  ;;  %v640_v29 = vmul.f32 %v3657_v8, %v525_v15  ;;  %v841_v45 = vmul.f32 %v3679_v25, %v711_v24  ;;  %v892_v36 = vsel %vm763_vm1, %v3739_v40, %v828_v55 }
  0xc5   : > { %v843_v48 = vmul.f32 %v3679_v25, %v713_v31  ;;  %v641_v49 = vmul.f32 %v3660_v9, %v530_v14  ;;  %v946_v52 = vpack.c.bf16 %v892_v36, %v890_v46  ;;  %vm777_vm2 = vcmp.ge.f32.partialorder %v712_v32, 0.0 }
  0xc6   : > { %v718_v21 = vadd.f32 %v3666_v13, %v642_v28  ;;  %v716_v39 = vadd.f32 %v3666_v13, %v640_v29  ;;  %1236 = vmatmul.mubr.bf16.gmra.mrb[12].mxu0 %v943_v44  ;;  %vm779_vm3 = vcmp.ge.f32.partialorder %v714_v42, 0.0  ;;  %v842_v57 = vmul.f32 %v3679_v25, %v712_v32 }
  0xc7   : > { %v639_v58 = vmul.f32 %v3660_v9, %v525_v15  ;;  %v540_v43 = vpop.permute.xlu1 %539  ;;  %1245 = vmatprep.mubr.bf16.mxu0 %v946_v52  ;;  %v535_v40 = vpop.permute.xlu0 %534  ;;  %v844_v55 = vmul.f32 %v3679_v25, %v714_v42  ;;  %vm776_vm4 = vcmp.ge.f32.partialorder %v711_v24, 0.0  ;;  %vm778_vm5 = vcmp.ge.f32.partialorder %v713_v31, 0.0 }
  0xc8   : > { %v848_v59 = vmul.f32 %v3679_v25, %v718_v21  ;;  %v846_v62 = vmul.f32 %v3679_v25, %v716_v39  ;;  %v906_v0 = vsel %vm777_vm2, %v712_v32, %v842_v57  ;;  %v905_v3 = vsel %vm776_vm4, %v711_v24, %v841_v45 }
  0xc9   : > { %v632_v4 = vmul.f32 %v3657_v8, %v3733_v37  ;;  %v717_v10 = vadd.f32 %v3671_v16, %v641_v49  ;;  %v908_v11 = vsel %vm779_vm3, %v714_v42, %v844_v55  ;;  %v907_v12 = vsel %vm778_vm5, %v713_v31, %v843_v48  ;;  %v3314_v37 = vld [vmem:[%s4959_s6 + $0x14] ss:$8 sps:$4 sm:$0xff]  }
  0xca   : > { %v646_v14 = vmul.f32 %v3657_v8, %v540_v43  ;;  %v644_v15 = vmul.f32 %v3657_v8, %v535_v40  ;;  %v954_v19 = vpack.c.bf16 %v908_v11, %v906_v0  ;;  %v953_v22 = vpack.c.bf16 %v907_v12, %v905_v3  ;;  %v3320_v11 = vld [vmem:[%s4959_s6 + $0x34] ss:$8 sps:$4 sm:$0xff]  }
  0xcb   : > { %v3862_v28 = vadd.f32 %v3671_v16, %v633_v35  ;;  %v715_v24 = vadd.f32 %v3671_v16, %v639_v58  ;;  %vm781_vm6 = vcmp.ge.f32.partialorder %v716_v39, 0.0  ;;  %vm783_vm7 = vcmp.ge.f32.partialorder %v718_v21, 0.0  ;;  %v550_v35 = vpop.permute.xlu1 %549  ;;  %v545_v48 = vpop.permute.xlu0 %544 }
  0xcc   : > { %v3870_v29 = vmul.f32 %v3679_v25, %v3832_v27  ;;  %v3873_v30 = vadd.f32 %v3666_v13, %v634_v38  ;;  %1285 = vmatprep.mubr.bf16.mxu1 %v954_v19  ;;  %v910_v31 = vsel %vm781_vm6, %v716_v39, %v846_v62  ;;  %v912_v32 = vsel %vm783_vm7, %v718_v21, %v848_v59  ;;  %v3312_v21 = vld [vmem:[%s4959_s6 + $0x10] ss:$8 sps:$4 sm:$0xff]  }
  0xcd   : > { %v847_v34 = vmul.f32 %v3679_v25, %v717_v10  ;;  %1286 = vmatmul.mubr.bf16.vlgmr.msra.gmra.mrb[0].mxu1 %v953_v22  ;;  %v956_v42 = vpack.c.bf16 %v912_v32, %v910_v31  ;;  %vm760_vm8 = vcmp.ge.f32.partialorder %v3742_v41, 0.0  ;;  %vm762_vm9 = vcmp.ge.f32.partialorder %v3728_v33, 0.0  ;;  %v3318_v32 = vld [vmem:[%s4959_s6 + $0x30] ss:$8 sps:$4 sm:$0xff]  }
  0xce   : > { %v722_v44 = vadd.f32 %v3666_v13, %v646_v14  ;;  %v720_v45 = vadd.f32 %v3666_v13, %v644_v15  ;;  %v889_v38 = vsel %vm760_vm8, %v3742_v41, %v3768_v56  ;;  %v891_v39 = vsel %vm762_vm9, %v3728_v33, %v3758_v50  ;;  %1797 = vmatpush1.bf16.msra.mxu1 %v3309_v23  ;;  %v3317_v41 = vld [vmem:[%s4959_s6 + $0x24] ss:$8 sps:$4 sm:$0xff]  }
  0xcf   : > { %v845_v46 = vmul.f32 %v3679_v25, %v715_v24  ;;  %v645_v36 = vmul.f32 %v3660_v9, %v540_v43  ;;  %1295 = vmatprep.mubr.bf16.mxu1 %v956_v42  ;;  %v945_v49 = vpack.c.bf16 %v891_v39, %v889_v38  ;;  %vm765_vm10 = vcmp.ge.f32.partialorder %v3777_v61, 0.0  ;;  %1798 = vmatprep.subr.bf16.mxu1 %v3314_v37  ;;  %v555_v14 = vpop.permute.xlu0 %554 }
  0xd0   : > { %v3895_v33 = vmul.f32 %v3679_v25, %v3844_v53  ;;  %v643_v50 = vmul.f32 %v3660_v9, %v535_v40  ;;  %vm767_vm11 = vcmp.ge.f32.partialorder %v3761_v51, 0.0  ;;  %v894_v56 = vsel %vm765_vm10, %v3777_v61, %v3802_v18 }
  0xd1   : > { %v3902_v52 = vadd.f32 %v3671_v16, %v631_v54  ;;  %v3905_v57 = vadd.f32 %v3666_v13, %v632_v4  ;;  %1246 = vmatmul.mubr.bf16.gmra.mrb[16].mxu0 %v945_v49  ;;  %v896_v58 = vsel %vm767_vm11, %v3761_v51, %v3786_v1  ;;  %vm780_vm12 = vcmp.ge.f32.partialorder %v715_v24, 0.0  ;;  %v560_v54 = vpop.permute.xlu1 %559  ;;  %v3315_v51 = vld [vmem:[%s4959_s6 + $0x20] ss:$8 sps:$4 sm:$0xff]  }
  0xd2   : > { %v852_v43 = vmul.f32 %v3679_v25, %v722_v44  ;;  %v850_v40 = vmul.f32 %v3679_v25, %v720_v45  ;;  %v948_v55 = vpack.c.bf16 %v896_v58, %v894_v56  ;;  %vm782_vm13 = vcmp.ge.f32.partialorder %v717_v10, 0.0  ;;  %1799 = vmatpush1.bf16.msra.mxu1 %v3312_v21  ;;  %v3321_v58 = vld [vmem:[%s4959_s6 + $0x40] ss:$8 sps:$4 sm:$0xff]  }
  0xd3   : > { %v3912_v61 = vadd.f32 %v3671_v16, %v645_v36  ;;  %v650_v18 = vmul.f32 %v3657_v8, %v550_v35  ;;  %v909_v59 = vsel %vm780_vm12, %v715_v24, %v845_v46  ;;  %v911_v62 = vsel %vm782_vm13, %v717_v10, %v847_v34  ;;  %1800 = vmatprep.subr.bf16.mxu1 %v3317_v41  ;;  %v565_v41 = vpop.permute.xlu0 %564 }
  0xd4   : > { %v3920_v1 = vmul.f32 %v3679_v25, %v3862_v28  ;;  %v719_v0 = vadd.f32 %v3671_v16, %v643_v50  ;;  %v648_v3 = vmul.f32 %v3657_v8, %v545_v48  ;;  %1255 = vmatprep.mubr.bf16.mxu0 %v948_v55  ;;  %v955_v4 = vpack.c.bf16 %v911_v62, %v909_v59 }
  0xd5   : > { %v3929_v10 = vmul.f32 %v3679_v25, %v3873_v30  ;;  %v649_v12 = vmul.f32 %v3660_v9, %v550_v35  ;;  %vm785_vm14 = vcmp.ge.f32.partialorder %v720_v45, 0.0  ;;  %vm787_vm15 = vcmp.ge.f32.partialorder %v722_v44, 0.0  ;;  %v570_v21 = vpop.permute.xlu1 %569 }
  0xd6   : > { %v3934_v15 = vmul.f32 %v3679_v25, %v3902_v52  ;;  %v647_v19 = vmul.f32 %v3660_v9, %v545_v48  ;;  %1296 = vmatmul.mubr.bf16.gmra.mrb[4].mxu1 %v955_v4  ;;  %v914_v22 = vsel %vm785_vm14, %v720_v45, %v850_v40  ;;  %v916_v23 = vsel %vm787_vm15, %v722_v44, %v852_v43  ;;  %v3323_v44 = vld [vmem:[%s4959_s6 + $0x44] ss:$8 sps:$4 sm:$0xff]  }
  0xd7   : > { %v851_v24 = vmul.f32 %v3679_v25, %v3912_v61  ;;  %v726_v37 = vadd.f32 %v3666_v13, %v650_v18  ;;  %v958_v31 = vpack.c.bf16 %v916_v23, %v914_v22  ;;  %vm764_vm0 = vcmp.ge.f32.partialorder %v3774_v60, 0.0  ;;  %1801 = vmatpush1.bf16.msra.mxu1 %v3315_v51  ;;  %v3326_v18 = vld [vmem:[%s4959_s6 + $0x54] ss:$8 sps:$4 sm:$0xff]  }
  0xd8   : > { %v849_v34 = vmul.f32 %v3679_v25, %v719_v0  ;;  %v724_v35 = vadd.f32 %v3666_v13, %v648_v3  ;;  %vm766_vm1 = vcmp.ge.f32.partialorder %v3753_v47, 0.0  ;;  %v893_v42 = vsel %vm764_vm0, %v3774_v60, %v3798_v17  ;;  %1802 = vmatprep.subr.bf16.mxu1 %v3320_v11 }
  0xd9   : > { %v3953_v45 = vadd.f32 %v3671_v16, %v649_v12  ;;  %v653_v38 = vmul.f32 %v3660_v9, %v560_v54  ;;  %v654_v39 = vmul.f32 %v3657_v8, %v560_v54  ;;  %1305 = vmatprep.mubr.bf16.mxu1 %v958_v31  ;;  %v895_v46 = vsel %vm766_vm1, %v3753_v47, %v3781_v63 }
  0xda   : > { %v3960_v36 = vadd.f32 %v3671_v16, %v647_v19  ;;  %v651_v60 = vmul.f32 %v3660_v9, %v555_v14  ;;  %v947_v17 = vpack.c.bf16 %v895_v46, %v893_v42  ;;  %vm769_vm2 = vcmp.ge.f32.partialorder %v3844_v53, 0.0  ;;  %v3329_v19 = vld [vmem:[%s4959_s6 + $0x64] ss:$8 sps:$4 sm:$0xff]  }
  0xdb   : > { %v856_v48 = vmul.f32 %v3679_v25, %v726_v37  ;;  %v652_v49 = vmul.f32 %v3657_v8, %v555_v14  ;;  %vm771_vm3 = vcmp.ge.f32.partialorder %v3792_v6, 0.0  ;;  %v898_v50 = vsel %vm769_vm2, %v3844_v53, %v3895_v33  ;;  %1803 = vmatpush1.bf16.msra.mxu1 %v3318_v32 }
  0xdc   : > { %v854_v47 = vmul.f32 %v3679_v25, %v724_v35  ;;  %v658_v63 = vmul.f32 %v3657_v8, %v570_v21  ;;  %1256 = vmatmul.mubr.bf16.gmra.mrb[20].mxu0 %v947_v17  ;;  %v900_v56 = vsel %vm771_vm3, %v3792_v6, %v3821_v20  ;;  %vm784_vm4 = vcmp.ge.f32.partialorder %v719_v0, 0.0  ;;  %1804 = vmatprep.subr.bf16.mxu1 %v3323_v44  ;;  %v3327_v44 = vld [vmem:[%s4959_s6 + $0x60] ss:$8 sps:$4 sm:$0xff]  }
  0xdd   : > { %v3977_v43 = vadd.f32 %v3671_v16, %v653_v38  ;;  %v730_v53 = vadd.f32 %v3666_v13, %v654_v39  ;;  %v950_v33 = vpack.c.bf16 %v900_v56, %v898_v50  ;;  %vm786_vm5 = vcmp.ge.f32.partialorder %v3912_v61, 0.0  ;;  %v575_v39 = vpop.permute.xlu0 %574 }
  0xde   : > { %v3982_v40 = vadd.f32 %v3671_v16, %v651_v60  ;;  %v656_v55 = vmul.f32 %v3657_v8, %v565_v41  ;;  %v913_v6 = vsel %vm784_vm4, %v719_v0, %v849_v34  ;;  %v915_v20 = vsel %vm786_vm5, %v3912_v61, %v851_v24  ;;  %v3324_v61 = vld [vmem:[%s4959_s6 + $0x50] ss:$8 sps:$4 sm:$0xff]  }
  0xdf   : > { %v838_v54 = vmul.f32 %v3679_v25, %v3905_v57  ;;  %v855_v59 = vmul.f32 %v3679_v25, %v3953_v45  ;;  %v728_v62 = vadd.f32 %v3666_v13, %v652_v49  ;;  %1265 = vmatprep.mubr.bf16.mxu0 %v950_v33  ;;  %v957_v51 = vpack.c.bf16 %v915_v20, %v913_v6 }
  0xe0   : > { %v853_v3 = vmul.f32 %v3679_v25, %v3960_v36  ;;  %v3997_v0 = vadd.f32 %v3666_v13, %v658_v63  ;;  %vm789_vm6 = vcmp.ge.f32.partialorder %v724_v35, 0.0  ;;  %vm791_vm7 = vcmp.ge.f32.partialorder %v726_v37, 0.0  ;;  %1805 = vmatpush1.bf16.msra.mxu1 %v3321_v58 }
  0xe1   : > { %v4004_v4 = vmul.f32 %v3679_v25, %v3977_v43  ;;  %v860_v11 = vmul.f32 %v3679_v25, %v730_v53  ;;  %1306 = vmatmul.mubr.bf16.gmra.mrb[8].mxu1 %v957_v51  ;;  %v918_v12 = vsel %vm789_vm6, %v724_v35, %v854_v47  ;;  %v920_v14 = vsel %vm791_vm7, %v726_v37, %v856_v48 }
  0xe2   : > { %v857_v22 = vmul.f32 %v3679_v25, %v3982_v40  ;;  %v4013_v23 = vadd.f32 %v3666_v13, %v656_v55  ;;  %v960_v24 = vpack.c.bf16 %v920_v14, %v918_v12  ;;  %vm768_vm8 = vcmp.ge.f32.partialorder %v3832_v27, 0.0  ;;  %1806 = vmatprep.subr.bf16.mxu1 %v3326_v18  ;;  %v585_v18 = vpop.permute.xlu0 %584 }
  0xe3   : > { %v858_v31 = vmul.f32 %v3679_v25, %v728_v62  ;;  %v657_v32 = vmul.f32 %v3660_v9, %v570_v21  ;;  %vm770_vm9 = vcmp.ge.f32.partialorder %v3789_v2, 0.0  ;;  %v897_v37 = vsel %vm768_vm8, %v3832_v27, %v3870_v29  ;;  %v3332_v29 = vld [vmem:[%s4959_s6 + $0x74] ss:$8 sps:$4 sm:$0xff]  }
  0xe4   : > { %v864_v34 = vmul.f32 %v3679_v25, %v3997_v0  ;;  %v655_v35 = vmul.f32 %v3660_v9, %v565_v41  ;;  %1315 = vmatprep.mubr.bf16.mxu1 %v960_v24  ;;  %v899_v42 = vsel %vm770_vm9, %v3789_v2, %v3814_v26  ;;  %vm773_vm10 = vcmp.ge.f32.partialorder %v3905_v57, 0.0  ;;  %1807 = vmatpush1.bf16.msra.mxu1 %v3324_v61  ;;  %v580_v26 = vpop.permute.xlu1 %579 }
  0xe5   : > { %v949_v38 = vpack.c.bf16 %v899_v42, %v897_v37  ;;  %vm775_vm11 = vcmp.ge.f32.partialorder %v3873_v30, 0.0  ;;  %v902_v27 = vsel %vm773_vm10, %v3905_v57, %v838_v54  ;;  %vm788_vm12 = vcmp.ge.f32.partialorder %v3960_v36, 0.0  ;;  %1808 = vmatprep.subr.bf16.mxu1 %v3329_v19  ;;  %v3339_v19 = vld [vmem:[%s4959_s6 + $0xa0] ss:$8 sps:$4 sm:$0xff]  }
  0xe6   : > { %v862_v2 = vmul.f32 %v3679_v25, %v4013_v23  ;;  %v904_v21 = vsel %vm775_vm11, %v3873_v30, %v3929_v10  ;;  %vm790_vm13 = vcmp.ge.f32.partialorder %v3953_v45, 0.0  ;;  %v917_v46 = vsel %vm788_vm12, %v3960_v36, %v853_v3  ;;  %v3330_v30 = vld [vmem:[%s4959_s6 + $0x70] ss:$8 sps:$4 sm:$0xff]  }
  0xe7   : > { %1266 = vmatmul.mubr.bf16.gmra.mrb[24].mxu0 %v949_v38  ;;  %v952_v57 = vpack.c.bf16 %v904_v21, %v902_v27  ;;  %v919_v60 = vsel %vm790_vm13, %v3953_v45, %v855_v59  ;;  %vm793_vm14 = vcmp.ge.f32.partialorder %v728_v62, 0.0  ;;  %vm795_vm15 = vcmp.ge.f32.partialorder %v730_v53, 0.0  ;;  %v3335_v45 = vld [vmem:[%s4959_s6 + $0x84] ss:$8 sps:$4 sm:$0xff]  }
  0xe8   : > { %v959_v17 = vpack.c.bf16 %v919_v60, %v917_v46  ;;  %v922_v48 = vsel %vm793_vm14, %v728_v62, %v858_v31  ;;  %v924_v49 = vsel %vm795_vm15, %v730_v53, %v860_v11  ;;  %vm772_vm0 = vcmp.ge.f32.partialorder %v3902_v52, 0.0  ;;  %1809 = vmatpush1.bf16.msra.mxu1 %v3327_v44  ;;  %v3338_v53 = vld [vmem:[%s4959_s6 + $0x94] ss:$8 sps:$4 sm:$0xff]   ;;  %v590_v55 = vpop.permute.xlu1 %589  ;;  %v3336_v62 = vld [vmem:[%s4959_s6 + $0x90] ss:$8 sps:$4 sm:$0xff]  }
  0xe9   : > { %v662_v10 = vmul.f32 %v3657_v8, %v580_v26  ;;  %v660_v36 = vmul.f32 %v3657_v8, %v575_v39  ;;  %1275 = vmatprep.mubr.bf16.mxu0 %v952_v57  ;;  %v962_v41 = vpack.c.bf16 %v924_v49, %v922_v48  ;;  %vm774_vm1 = vcmp.ge.f32.partialorder %v3862_v28, 0.0  ;;  %1810 = vmatprep.subr.bf16.mxu1 %v3332_v29  ;;  %v3342_v44 = vld [vmem:[%s4959_s6 + $0xb0] ss:$8 sps:$4 sm:$0xff]  }
  0xea   : > { %1316 = vmatmul.mubr.bf16.gmra.mrb[12].mxu1 %v959_v17  ;;  %v901_v50 = vsel %vm772_vm0, %v3902_v52, %v3934_v15  ;;  %v903_v47 = vsel %vm774_vm1, %v3862_v28, %v3920_v1  ;;  %vm792_vm2 = vcmp.ge.f32.partialorder %v3982_v40, 0.0  ;;  %vm794_vm3 = vcmp.ge.f32.partialorder %v3977_v43, 0.0  ;;  %v3333_v52 = vld [vmem:[%s4959_s6 + $0x80] ss:$8 sps:$4 sm:$0xff]   ;;  %v3350_v17 = vld [vmem:[%s4959_s6 + $0xd4] ss:$8 sps:$4 sm:$0xff]  }
  0xeb   : > { %1325 = vmatprep.mubr.bf16.mxu1 %v962_v41  ;;  %vm797_vm4 = vcmp.ge.f32.partialorder %v4013_v23, 0.0  ;;  %vm799_vm5 = vcmp.ge.f32.partialorder %v3997_v0, 0.0  ;;  %v733_v63 = vadd.f32 %v3671_v16, %v657_v32  ;;  %v731_v56 = vadd.f32 %v3671_v16, %v655_v35 }
  0xec   : > { %1811 = vmatpush1.bf16.msra.mxu1 %v3330_v30  ;;  %v738_v28 = vadd.f32 %v3666_v13, %v662_v10  ;;  %v951_v1 = vpack.c.bf16 %v903_v47, %v901_v50  ;;  %v921_v15 = vsel %vm792_vm2, %v3982_v40, %v857_v22  ;;  %v923_v58 = vsel %vm794_vm3, %v3977_v43, %v4004_v4  ;;  %v3341_v4 = vld [vmem:[%s4959_s6 + $0xa4] ss:$8 sps:$4 sm:$0xff]   ;;  %v3348_v10 = vld [vmem:[%s4959_s6 + $0xd0] ss:$8 sps:$4 sm:$0xff]   ;;  %v3351_v47 = vld [vmem:[%s4959_s6 + $0xe0] ss:$8 sps:$4 sm:$0xff]  }
  0xed   : > { %1812 = vmatprep.subr.bf16.mxu1 %v3335_v45  ;;  %v736_v33 = vadd.f32 %v3666_v13, %v660_v36  ;;  %v926_v6 = vsel %vm797_vm4, %v4013_v23, %v862_v2  ;;  %v928_v20 = vsel %vm799_vm5, %v3997_v0, %v864_v34  ;;  %v863_v54 = vmul.f32 %v3679_v25, %v733_v63 }
  0xee   : > { %v861_v40 = vmul.f32 %v3679_v25, %v731_v56  ;;  %v661_v43 = vmul.f32 %v3660_v9, %v580_v26  ;;  %v961_v59 = vpack.c.bf16 %v923_v58, %v921_v15  ;;  %v868_v51 = vmul.f32 %v3679_v25, %v738_v28 }
  0xef   : > { %1276 = vmatmul.mubr.bf16.gmra.mrb[28].mxu0 %v951_v1  ;;  %v659_v3 = vmul.f32 %v3660_v9, %v575_v39  ;;  %v666_v0 = vmul.f32 %v3657_v8, %v590_v55  ;;  %v964_v61 = vpack.c.bf16 %v928_v20, %v926_v6  ;;  %v866_v11 = vmul.f32 %v3679_v25, %v736_v33 }
  0xf0   : > { %1813 = vmatpush1.bf16.msra.mxu1 %v3333_v52  ;;  %v664_v12 = vmul.f32 %v3657_v8, %v585_v18  ;;  %vm796_vm6 = vcmp.ge.f32.partialorder %v731_v56, 0.0  ;;  %vm798_vm7 = vcmp.ge.f32.partialorder %v733_v63, 0.0  ;;  %vm801_vm8 = vcmp.ge.f32.partialorder %v736_v33, 0.0  ;;  %v3344_v8 = vld [vmem:[%s4959_s6 + $0xb4] ss:$8 sps:$4 sm:$0xff]  }
  0xf1   : > { %1814 = vmatprep.subr.bf16.mxu1 %v3338_v53  ;;  %vm803_vm9 = vcmp.ge.f32.partialorder %v738_v28, 0.0  ;;  %v737_v14 = vadd.f32 %v3671_v16, %v661_v43  ;;  %v735_v22 = vadd.f32 %v3671_v16, %v659_v3  ;;  %v925_v23 = vsel %vm796_vm6, %v731_v56, %v861_v40  ;;  %v3354_v52 = vld [vmem:[%s4959_s6 + $0xf0] ss:$8 sps:$4 sm:$0xff]  }
  0xf2   : > { %1326 = vmatmul.mubr.bf16.gmra.mrb[16].mxu1 %v961_v59  ;;  %v927_v24 = vsel %vm798_vm7, %v733_v63, %v863_v54  ;;  %v742_v31 = vadd.f32 %v3666_v13, %v666_v0  ;;  %v740_v32 = vadd.f32 %v3666_v13, %v664_v12  ;;  %v930_v37 = vsel %vm801_vm8, %v736_v33, %v866_v11  ;;  %v3347_v13 = vld [vmem:[%s4959_s6 + $0xc4] ss:$8 sps:$4 sm:$0xff]  }
  0xf3   : > { %1335 = vmatprep.mubr.bf16.mxu1 %v964_v61  ;;  %v932_v34 = vsel %vm803_vm9, %v738_v28, %v868_v51  ;;  %v867_v35 = vmul.f32 %v3679_v25, %v737_v14  ;;  %v963_v42 = vpack.c.bf16 %v927_v24, %v925_v23  ;;  %v865_v38 = vmul.f32 %v3679_v25, %v735_v22  ;;  %v3353_v63 = vld [vmem:[%s4959_s6 + $0xe4] ss:$8 sps:$4 sm:$0xff]   ;;  %v1001_v28 = vld [vmem:[%s4958_s5] sm:$0x3] }
  0xf4   : > { %1815 = vmatpush1.bf16.msra.mxu1 %v3336_v62  ;;  %v665_v27 = vmul.f32 %v3660_v9, %v590_v55  ;;  %v663_v29 = vmul.f32 %v3660_v9, %v585_v18  ;;  %v966_v2 = vpack.c.bf16 %v932_v34, %v930_v37  ;;  %v872_v26 = vmul.f32 %v3679_v25, %v742_v31  ;;  %v3345_v9 = vld [vmem:[%s4959_s6 + $0xc0] ss:$8 sps:$4 sm:$0xff]  }
  0xf5   : > { %1816 = vmatprep.subr.bf16.mxu1 %v3341_v4  ;;  %v870_v39 = vmul.f32 %v3679_v25, %v740_v32  ;;  %vm800_vm10 = vcmp.ge.f32.partialorder %v735_v22, 0.0  ;;  %vm802_vm11 = vcmp.ge.f32.partialorder %v737_v14, 0.0  ;;  %vm805_vm12 = vcmp.ge.f32.partialorder %v740_v32, 0.0 }
  0xf6   : > { %vm807_vm13 = vcmp.ge.f32.partialorder %v742_v31, 0.0  ;;  %v741_v21 = vadd.f32 %v3671_v16, %v665_v27  ;;  %v739_v46 = vadd.f32 %v3671_v16, %v663_v29  ;;  %v929_v57 = vsel %vm800_vm10, %v735_v22, %v865_v38 }
  0xf7   : > { %v931_v60 = vsel %vm802_vm11, %v737_v14, %v867_v35  ;;  %v934_v48 = vsel %vm805_vm12, %v740_v32, %v870_v39  ;;  %v936_v49 = vsel %vm807_vm13, %v742_v31, %v872_v26  ;;  %v4141_v1 = vrot.slane %v1001_v28, %v3654_v7  ;;  %v3357_v39 = vld [vmem:[%s4961_s8] ss:$8 sps:$4 sm:$0xff]  }
  0xf8   : > { %1817 = vmatpush1.bf16.msra.mxu1 %v3339_v19  ;;  %v965_v30 = vpack.c.bf16 %v931_v60, %v929_v57  ;;  %v871_v36 = vmul.f32 %v3679_v25, %v741_v21  ;;  %v869_v41 = vmul.f32 %v3679_v25, %v739_v46  ;;  %v968_v16 = vpack.c.bf16 %v936_v49, %v934_v48  ;;  %v3356_v25 = vld [vmem:[%s4959_s6 + $0xf4] ss:$8 sps:$4 sm:$0xff]  }
  0xf9   : > { %1818 = vmatprep.subr.bf16.mxu1 %v3344_v8  ;;  %vm804_vm14 = vcmp.ge.f32.partialorder %v739_v46, 0.0  ;;  %vm806_vm15 = vcmp.ge.f32.partialorder %v741_v21, 0.0  ;;  %v4144_v15 = vrot.slane %v1001_v28, %v3649_v5  ;;  %v4146_v53 = vstv %s3147_s14  ;;  %v3362_v57 = vld [vmem:[%s4961_s8 + $0x14] ss:$8 sps:$4 sm:$0xff]  }
  0xfa   : > { %1336 = vmatmul.mubr.bf16.gmra.mrb[20].mxu1 %v963_v42  ;;  %v933_v45 = vsel %vm804_vm14, %v739_v46, %v869_v41  ;;  %v935_v50 = vsel %vm806_vm15, %v741_v21, %v871_v36 }
  0xfb   : > { %1345 = vmatprep.mubr.bf16.mxu1 %v966_v2  ;;  %v967_v56 = vpack.c.bf16 %v935_v50, %v933_v45 }
  0xfc   : > { %1819 = vmatpush1.bf16.msra.mxu1 %v3342_v44 }
  0xfd   : > { %1820 = vmatprep.subr.bf16.mxu1 %v3347_v13 }
 0x100   : > { %1821 = vmatpush1.bf16.msra.mxu1 %v3345_v9  ;;  %v3359_v9 = vld [vmem:[%s4961_s8 + $0x4] ss:$8 sps:$4 sm:$0xff]  }
 0x101   : > { %1822 = vmatprep.subr.bf16.mxu1 %v3350_v17  ;;  %2419 = vmatprep.subr.bf16.mxu0 %v3359_v9 }
 0x102   : > { %1346 = vmatmul.mubr.bf16.gmra.mrb[24].mxu1 %v965_v30  ;;  %2420 = vmatpush1.bf16.msra.mxu0 %v3357_v39 }
 0x103   : > { %1355 = vmatprep.mubr.bf16.mxu1 %v968_v16  ;;  %2421 = vmatprep.subr.bf16.mxu0 %v3362_v57  ;;  %v3365_v16 = vld [vmem:[%s4961_s8 + $0x24] ss:$8 sps:$4 sm:$0xff]  }
 0x104   : > { %1823 = vmatpush1.bf16.msra.mxu1 %v3348_v10  ;;  %v3360_v10 = vld [vmem:[%s4961_s8 + $0x10] ss:$8 sps:$4 sm:$0xff]  }
 0x105   : > { %1824 = vmatprep.subr.bf16.mxu1 %v3353_v63 }
 0x106   : > { %2422 = vmatpush1.bf16.msra.mxu0 %v3360_v10 }
 0x107   : > { %2423 = vmatprep.subr.bf16.mxu0 %v3365_v16 }
 0x108   : > { %1825 = vmatpush1.bf16.msra.mxu1 %v3351_v47 }
 0x109   : > { %1826 = vmatprep.subr.bf16.mxu1 %v3356_v25  ;;  %v3363_v25 = vld [vmem:[%s4961_s8 + $0x20] ss:$8 sps:$4 sm:$0xff]  }
 0x10a   : > { %1356 = vmatmul.mubr.bf16.gmra.mrb[28].mxu1 %v967_v56  ;;  %2424 = vmatpush1.bf16.msra.mxu0 %v3363_v25 }
 0x10c   : > { %1827 = vmatpush1.bf16.msra.mxu1 %v3354_v52 }
 0x181   : > { %v1207_v58 = vpop.f32.mrb[0].mxu0 }
 0x182   : > { %v1208_v33 = vadd.f32 %v1207_v58, %v4141_v1  ;;  %v1209_v55 = vpop.f32.mrb[1].mxu0 }
 0x183   : > { %v1210_v6 = vadd.f32 %v1209_v55, %v4144_v15  ;;  %v1211_v20 = vpop.f32.mrb[2].mxu0 }
 0x184   : > { %v1432_v18 = vmul.f32 %v4146_v53, %v1208_v33  ;;  %v1212_v54 = vadd.f32 %v1211_v20, %v4141_v1  ;;  %v1213_v40 = vpop.f32.mrb[3].mxu0  ;;  %vm1367_vm0 = vcmp.ge.f32.partialorder %v1208_v33, 0.0 }
 0x185   : > { %v1433_v43 = vmul.f32 %v4146_v53, %v1210_v6  ;;  %v1214_v59 = vadd.f32 %v1213_v40, %v4144_v15  ;;  %vm1368_vm1 = vcmp.ge.f32.partialorder %v1210_v6, 0.0 }
 0x186   : > { %vm1369_vm2 = vcmp.ge.f32.partialorder %v1212_v54, 0.0  ;;  %v1434_v62 = vmul.f32 %v4146_v53, %v1212_v54  ;;  %v1496_v3 = vsel %vm1367_vm0, %v1208_v33, %v1432_v18  ;;  %v3368_v33 = vld [vmem:[%s4961_s8 + $0x34] ss:$8 sps:$4 sm:$0xff]  }
 0x187   : > { %vm1370_vm3 = vcmp.ge.f32.partialorder %v1214_v59, 0.0  ;;  %v1435_v51 = vmul.f32 %v4146_v53, %v1214_v59  ;;  %v1497_v11 = vsel %vm1368_vm1, %v1210_v6, %v1433_v43  ;;  %2425 = vmatprep.subr.bf16.mxu0 %v3368_v33  ;;  %v3378_v33 = vld [vmem:[%s4961_s8 + $0x70] ss:$8 sps:$4 sm:$0xff]  }
 0x188   : > { %v1498_v0 = vsel %vm1369_vm2, %v1212_v54, %v1434_v62  ;;  %v3366_v62 = vld [vmem:[%s4961_s8 + $0x30] ss:$8 sps:$4 sm:$0xff]  }
 0x189   : > { %v1560_v61 = vpack.c.bf16 %v1498_v0, %v1496_v3  ;;  %v1217_v4 = vpop.f32.mrb[4].mxu0  ;;  %v1499_v12 = vsel %vm1370_vm3, %v1214_v59, %v1435_v51  ;;  %v3371_v0 = vld [vmem:[%s4961_s8 + $0x44] ss:$8 sps:$4 sm:$0xff]   ;;  %2426 = vmatpush1.bf16.msra.mxu0 %v3366_v62 }
 0x18a   : > { %v1218_v14 = vadd.f32 %v1217_v4, %v4141_v1  ;;  %v1219_v19 = vpop.f32.mrb[5].mxu0  ;;  %v1561_v22 = vpack.c.bf16 %v1499_v12, %v1497_v11  ;;  %2427 = vmatprep.subr.bf16.mxu0 %v3371_v0 }
 0x18b   : > { %v1220_v23 = vadd.f32 %v1219_v19, %v4144_v15  ;;  %v1221_v24 = vpop.f32.mrb[6].mxu0 }
 0x18c   : > { %v1436_v8 = vmul.f32 %v4146_v53, %v1218_v14  ;;  %v1222_v31 = vadd.f32 %v1221_v24, %v4141_v1  ;;  %v1223_v32 = vpop.f32.mrb[7].mxu0  ;;  %1828 = vmatprep.mubr.bf16.mxu1 %v1561_v22  ;;  %vm1371_vm4 = vcmp.ge.f32.partialorder %v1218_v14, 0.0  ;;  %v3374_v24 = vld [vmem:[%s4961_s8 + $0x54] ss:$8 sps:$4 sm:$0xff]  }
 0x18d   : > { %v1437_v37 = vmul.f32 %v4146_v53, %v1220_v23  ;;  %v1224_v34 = vadd.f32 %v1223_v32, %v4144_v15  ;;  %1829 = vmatmul.mubr.bf16.vlgmr.msra.gmra.mrb[32].mxu1 %v1560_v61  ;;  %vm1372_vm5 = vcmp.ge.f32.partialorder %v1220_v23, 0.0 }
 0x18e   : > { %vm1373_vm6 = vcmp.ge.f32.partialorder %v1222_v31, 0.0  ;;  %v1438_v35 = vmul.f32 %v4146_v53, %v1222_v31  ;;  %v1500_v44 = vsel %vm1371_vm4, %v1218_v14, %v1436_v8  ;;  %v3369_v14 = vld [vmem:[%s4961_s8 + $0x40] ss:$8 sps:$4 sm:$0xff]  }
 0x18f   : > { %vm1374_vm7 = vcmp.ge.f32.partialorder %v1224_v34, 0.0  ;;  %v1439_v42 = vmul.f32 %v4146_v53, %v1224_v34  ;;  %v1501_v27 = vsel %vm1372_vm5, %v1220_v23, %v1437_v37  ;;  %2428 = vmatpush1.bf16.msra.mxu0 %v3369_v14  ;;  %v3381_v14 = vld [vmem:[%s4961_s8 + $0x80] ss:$8 sps:$4 sm:$0xff]  }
 0x190   : > { %v1502_v38 = vsel %vm1373_vm6, %v1222_v31, %v1438_v35  ;;  %2429 = vmatprep.subr.bf16.mxu0 %v3374_v24 }
 0x191   : > { %v1503_v29 = vsel %vm1374_vm7, %v1224_v34, %v1439_v42  ;;  %v1562_v2 = vpack.c.bf16 %v1502_v38, %v1500_v44  ;;  %v1227_v13 = vpop.f32.mrb[8].mxu0  ;;  %v3372_v42 = vld [vmem:[%s4961_s8 + $0x50] ss:$8 sps:$4 sm:$0xff]  }
 0x192   : > { %v1563_v26 = vpack.c.bf16 %v1503_v29, %v1501_v27  ;;  %v1228_v21 = vadd.f32 %v1227_v13, %v4141_v1  ;;  %v1229_v46 = vpop.f32.mrb[9].mxu0  ;;  %v3377_v27 = vld [vmem:[%s4961_s8 + $0x64] ss:$8 sps:$4 sm:$0xff]  }
 0x193   : > { %v1230_v60 = vadd.f32 %v1229_v46, %v4144_v15  ;;  %v1231_v17 = vpop.f32.mrb[10].mxu0  ;;  %2430 = vmatpush1.bf16.msra.mxu0 %v3372_v42 }
 0x194   : > { %1838 = vmatprep.mubr.bf16.mxu1 %v1563_v26  ;;  %v1440_v48 = vmul.f32 %v4146_v53, %v1228_v21  ;;  %v1232_v49 = vadd.f32 %v1231_v17, %v4141_v1  ;;  %v1233_v30 = vpop.f32.mrb[11].mxu0  ;;  %vm1375_vm8 = vcmp.ge.f32.partialorder %v1228_v21, 0.0  ;;  %v3375_v17 = vld [vmem:[%s4961_s8 + $0x60] ss:$8 sps:$4 sm:$0xff]   ;;  %2431 = vmatprep.subr.bf16.mxu0 %v3377_v27 }
 0x195   : > { %1839 = vmatmul.mubr.bf16.gmra.mrb[36].mxu1 %v1562_v2  ;;  %v1441_v36 = vmul.f32 %v4146_v53, %v1230_v60  ;;  %v1234_v41 = vadd.f32 %v1233_v30, %v4144_v15  ;;  %vm1376_vm9 = vcmp.ge.f32.partialorder %v1230_v60, 0.0 }
 0x196   : > { %vm1377_vm10 = vcmp.ge.f32.partialorder %v1232_v49, 0.0  ;;  %v1442_v45 = vmul.f32 %v4146_v53, %v1232_v49  ;;  %v1504_v47 = vsel %vm1375_vm8, %v1228_v21, %v1440_v48 }
 0x197   : > { %vm1378_vm11 = vcmp.ge.f32.partialorder %v1234_v41, 0.0  ;;  %v1443_v50 = vmul.f32 %v4146_v53, %v1234_v41  ;;  %v1505_v52 = vsel %vm1376_vm9, %v1230_v60, %v1441_v36  ;;  %v3380_v36 = vld [vmem:[%s4961_s8 + $0x74] ss:$8 sps:$4 sm:$0xff]   ;;  %2432 = vmatpush1.bf16.msra.mxu0 %v3375_v17 }
 0x198   : > { %v1506_v63 = vsel %vm1377_vm10, %v1232_v49, %v1442_v45  ;;  %2433 = vmatprep.subr.bf16.mxu0 %v3380_v36 }
 0x199   : > { %v1237_v56 = vpop.f32.mrb[12].mxu0  ;;  %v1507_v28 = vsel %vm1378_vm11, %v1234_v41, %v1443_v50  ;;  %v1564_v58 = vpack.c.bf16 %v1506_v63, %v1504_v47 }
 0x19a   : > { %v1238_v55 = vadd.f32 %v1237_v56, %v4141_v1  ;;  %v1239_v6 = vpop.f32.mrb[13].mxu0  ;;  %v1565_v20 = vpack.c.bf16 %v1507_v28, %v1505_v52 }
 0x19b   : > { %v1240_v18 = vadd.f32 %v1239_v6, %v4144_v15  ;;  %v1241_v54 = vpop.f32.mrb[14].mxu0  ;;  %2434 = vmatpush1.bf16.msra.mxu0 %v3378_v33 }
 0x19c   : > { %v1444_v40 = vmul.f32 %v4146_v53, %v1238_v55  ;;  %v1242_v43 = vadd.f32 %v1241_v54, %v4141_v1  ;;  %v1243_v59 = vpop.f32.mrb[15].mxu0  ;;  %1848 = vmatprep.mubr.bf16.mxu1 %v1565_v20  ;;  %vm1379_vm12 = vcmp.ge.f32.partialorder %v1238_v55, 0.0 }
 0x19d   : > { %v1445_v51 = vmul.f32 %v4146_v53, %v1240_v18  ;;  %v1244_v3 = vadd.f32 %v1243_v59, %v4144_v15  ;;  %1849 = vmatmul.mubr.bf16.gmra.mrb[40].mxu1 %v1564_v58  ;;  %vm1380_vm13 = vcmp.ge.f32.partialorder %v1240_v18, 0.0 }
 0x19e   : > { %vm1381_vm14 = vcmp.ge.f32.partialorder %v1242_v43, 0.0  ;;  %v1446_v61 = vmul.f32 %v4146_v53, %v1242_v43  ;;  %v1508_v11 = vsel %vm1379_vm12, %v1238_v55, %v1444_v40  ;;  %v3383_v40 = vld [vmem:[%s4961_s8 + $0x84] ss:$8 sps:$4 sm:$0xff]  }
 0x19f   : > { %vm1382_vm15 = vcmp.ge.f32.partialorder %v1244_v3, 0.0  ;;  %v1447_v4 = vmul.f32 %v4146_v53, %v1244_v3  ;;  %v1509_v19 = vsel %vm1380_vm13, %v1240_v18, %v1445_v51  ;;  %2435 = vmatprep.subr.bf16.mxu0 %v3383_v40 }
 0x1a0   : > { %v1510_v12 = vsel %vm1381_vm14, %v1242_v43, %v1446_v61  ;;  %v1287_v8 = vpop.f32.mrb[0].mxu1  ;;  %2436 = vmatpush1.bf16.msra.mxu0 %v3381_v14 }
 0x1a1   : > { %v1511_v22 = vsel %vm1382_vm15, %v1244_v3, %v1447_v4  ;;  %v1566_v23 = vpack.c.bf16 %v1510_v12, %v1508_v11  ;;  %v1288_v32 = vadd.f32 %v1287_v8, %v4141_v1  ;;  %v1289_v37 = vpop.f32.mrb[1].mxu1 }
 0x1a2   : > { %v1567_v31 = vpack.c.bf16 %v1511_v22, %v1509_v19  ;;  %v1290_v34 = vadd.f32 %v1289_v37, %v4144_v15  ;;  %v1291_v35 = vpop.f32.mrb[2].mxu1 }
 0x1a3   : > { %v1292_v44 = vadd.f32 %v1291_v35, %v4141_v1  ;;  %v1293_v38 = vpop.f32.mrb[3].mxu1  ;;  %vm1399_vm1 = vcmp.ge.f32.partialorder %v1288_v32, 0.0  ;;  %v1464_v21 = vmul.f32 %v4146_v53, %v1288_v32 }
 0x1a4   : > { %1858 = vmatprep.mubr.bf16.mxu1 %v1567_v31  ;;  %vm1400_vm0 = vcmp.ge.f32.partialorder %v1290_v34, 0.0  ;;  %v1465_v29 = vmul.f32 %v4146_v53, %v1290_v34  ;;  %v1294_v2 = vadd.f32 %v1293_v38, %v4144_v15  ;;  %v1247_v13 = vpop.f32.mrb[16].mxu0 }
 0x1a5   : > { %1859 = vmatmul.mubr.bf16.gmra.mrb[44].mxu1 %v1566_v23  ;;  %vm1401_vm2 = vcmp.ge.f32.partialorder %v1292_v44, 0.0  ;;  %v1466_v26 = vmul.f32 %v4146_v53, %v1292_v44  ;;  %v1248_v39 = vadd.f32 %v1247_v13, %v4141_v1  ;;  %v1249_v9 = vpop.f32.mrb[17].mxu0  ;;  %v4253_v58 = vsel %vm1399_vm1, %v1288_v32, %v1464_v21  ;;  %v3386_v23 = vld [vmem:[%s4961_s8 + $0x94] ss:$8 sps:$4 sm:$0xff]   ;;  %v3384_v13 = vld [vmem:[%s4961_s8 + $0x90] ss:$8 sps:$4 sm:$0xff]  }
 0x1a6   : > { %vm1402_vm3 = vcmp.ge.f32.partialorder %v1294_v2, 0.0  ;;  %v1467_v46 = vmul.f32 %v4146_v53, %v1294_v2  ;;  %v1250_v57 = vadd.f32 %v1249_v9, %v4144_v15  ;;  %v1251_v60 = vpop.f32.mrb[18].mxu0  ;;  %v4235_v10 = vsel %vm1400_vm0, %v1290_v34, %v1465_v29  ;;  %2437 = vmatprep.subr.bf16.mxu0 %v3386_v23  ;;  %v3389_v9 = vld [vmem:[%s4961_s8 + $0xa4] ss:$8 sps:$4 sm:$0xff]  }
 0x1a7   : > { %vm1383_vm4 = vcmp.ge.f32.partialorder %v1248_v39, 0.0  ;;  %v1448_v48 = vmul.f32 %v4146_v53, %v1248_v39  ;;  %v1252_v49 = vadd.f32 %v1251_v60, %v4141_v1  ;;  %v1253_v30 = vpop.f32.mrb[19].mxu0  ;;  %v4245_v50 = vsel %vm1401_vm2, %v1292_v44, %v1466_v26  ;;  %2438 = vmatpush1.bf16.msra.mxu0 %v3384_v13  ;;  %v3393_v13 = vld [vmem:[%s4961_s8 + $0xc0] ss:$8 sps:$4 sm:$0xff]  }
 0x1a8   : > { %v1449_v41 = vmul.f32 %v4146_v53, %v1250_v57  ;;  %v1254_v16 = vadd.f32 %v1253_v30, %v4144_v15  ;;  %v4242_v45 = vsel %vm1402_vm3, %v1294_v2, %v1467_v46  ;;  %vm1384_vm5 = vcmp.ge.f32.partialorder %v1250_v57, 0.0  ;;  %2439 = vmatprep.subr.bf16.mxu0 %v3389_v9 }
 0x1a9   : > { %vm1385_vm6 = vcmp.ge.f32.partialorder %v1252_v49, 0.0  ;;  %v1450_v47 = vmul.f32 %v4146_v53, %v1252_v49  ;;  %v1297_v63 = vpop.f32.mrb[4].mxu1  ;;  %v1577_v25 = vpack.c.bf16 %v4242_v45, %v4235_v10  ;;  %v1512_v20 = vsel %vm1383_vm4, %v1248_v39, %v1448_v48 }
 0x1aa   : > { %vm1386_vm7 = vcmp.ge.f32.partialorder %v1254_v16, 0.0  ;;  %v1451_v56 = vmul.f32 %v4146_v53, %v1254_v16  ;;  %v1298_v52 = vadd.f32 %v1297_v63, %v4141_v1  ;;  %v1299_v28 = vpop.f32.mrb[5].mxu1  ;;  %v1576_v54 = vpack.c.bf16 %v4245_v50, %v4253_v58 }
 0x1ab   : > { %v1300_v55 = vadd.f32 %v1299_v28, %v4144_v15  ;;  %v1301_v6 = vpop.f32.mrb[6].mxu1  ;;  %v1514_v18 = vsel %vm1385_vm6, %v1252_v49, %v1450_v47  ;;  %v1513_v51 = vsel %vm1384_vm5, %v1250_v57, %v1449_v41  ;;  %v3387_v41 = vld [vmem:[%s4961_s8 + $0xa0] ss:$8 sps:$4 sm:$0xff]   ;;  %v3392_v28 = vld [vmem:[%s4961_s8 + $0xb4] ss:$8 sps:$4 sm:$0xff]  }
 0x1ac   : > { %v1468_v43 = vmul.f32 %v4146_v53, %v1298_v52  ;;  %v1302_v59 = vadd.f32 %v1301_v6, %v4141_v1  ;;  %v1303_v62 = vpop.f32.mrb[7].mxu1  ;;  %v1515_v3 = vsel %vm1386_vm7, %v1254_v16, %v1451_v56  ;;  %vm1403_vm8 = vcmp.ge.f32.partialorder %v1298_v52, 0.0  ;;  %2440 = vmatpush1.bf16.msra.mxu0 %v3387_v41 }
 0x1ad   : > { %v1469_v0 = vmul.f32 %v4146_v53, %v1300_v55  ;;  %v1304_v61 = vadd.f32 %v1303_v62, %v4144_v15  ;;  %v1569_v4 = vpack.c.bf16 %v1515_v3, %v1513_v51  ;;  %vm1404_vm9 = vcmp.ge.f32.partialorder %v1300_v55, 0.0  ;;  %2441 = vmatprep.subr.bf16.mxu0 %v3392_v28 }
 0x1ae   : > { %vm1405_vm10 = vcmp.ge.f32.partialorder %v1302_v59, 0.0  ;;  %v1470_v11 = vmul.f32 %v4146_v53, %v1302_v59  ;;  %v1568_v12 = vpack.c.bf16 %v1514_v18, %v1512_v20  ;;  %v4281_v31 = vsel %vm1403_vm8, %v1298_v52, %v1468_v43 }
 0x1af   : > { %vm1406_vm11 = vcmp.ge.f32.partialorder %v1304_v61, 0.0  ;;  %v1471_v19 = vmul.f32 %v4146_v53, %v1304_v61  ;;  %v1257_v22 = vpop.f32.mrb[20].mxu0  ;;  %1868 = vmatprep.mubr.bf16.mxu1 %v1569_v4  ;;  %v4287_v35 = vsel %vm1404_vm9, %v1300_v55, %v1469_v0 }
 0x1b0   : > { %v1258_v24 = vadd.f32 %v1257_v22, %v4141_v1  ;;  %v1259_v8 = vpop.f32.mrb[21].mxu0  ;;  %1869 = vmatmul.mubr.bf16.gmra.mrb[48].mxu1 %v1568_v12  ;;  %v4283_v32 = vsel %vm1405_vm10, %v1302_v59, %v1470_v11  ;;  %v3390_v59 = vld [vmem:[%s4961_s8 + $0xb0] ss:$8 sps:$4 sm:$0xff]  }
 0x1b1   : > { %v1260_v37 = vadd.f32 %v1259_v8, %v4144_v15  ;;  %v1261_v34 = vpop.f32.mrb[22].mxu0  ;;  %v4289_v42 = vsel %vm1406_vm11, %v1304_v61, %v1471_v19  ;;  %v1578_v44 = vpack.c.bf16 %v4283_v32, %v4281_v31  ;;  %v3395_v61 = vld [vmem:[%s4961_s8 + $0xc4] ss:$8 sps:$4 sm:$0xff]   ;;  %2442 = vmatpush1.bf16.msra.mxu0 %v3390_v59 }
 0x1b2   : > { %v1452_v38 = vmul.f32 %v4146_v53, %v1258_v24  ;;  %v1262_v27 = vadd.f32 %v1261_v34, %v4141_v1  ;;  %v1263_v29 = vpop.f32.mrb[23].mxu0  ;;  %v1579_v2 = vpack.c.bf16 %v4289_v42, %v4287_v35  ;;  %vm1387_vm12 = vcmp.ge.f32.partialorder %v1258_v24, 0.0  ;;  %2443 = vmatprep.subr.bf16.mxu0 %v3395_v61 }
 0x1b3   : > { %v1453_v26 = vmul.f32 %v4146_v53, %v1260_v37  ;;  %v1264_v39 = vadd.f32 %v1263_v29, %v4144_v15  ;;  %vm1388_vm13 = vcmp.ge.f32.partialorder %v1260_v37, 0.0 }
 0x1b4   : > { %vm1389_vm14 = vcmp.ge.f32.partialorder %v1262_v27, 0.0  ;;  %v1454_v21 = vmul.f32 %v4146_v53, %v1262_v27  ;;  %v1307_v46 = vpop.f32.mrb[8].mxu1  ;;  %v1516_v30 = vsel %vm1387_vm12, %v1258_v24, %v1452_v38 }
 0x1b5   : > { %vm1390_vm15 = vcmp.ge.f32.partialorder %v1264_v39, 0.0  ;;  %v1455_v57 = vmul.f32 %v4146_v53, %v1264_v39  ;;  %v1308_v60 = vadd.f32 %v1307_v46, %v4141_v1  ;;  %v1309_v17 = vpop.f32.mrb[9].mxu1  ;;  %v1517_v56 = vsel %vm1388_vm13, %v1260_v37, %v1453_v26  ;;  %2444 = vmatpush1.bf16.msra.mxu0 %v3393_v13 }
 0x1b6   : > { %v1310_v48 = vadd.f32 %v1309_v17, %v4144_v15  ;;  %v1311_v49 = vpop.f32.mrb[10].mxu1  ;;  %v1518_v36 = vsel %vm1389_vm14, %v1262_v27, %v1454_v21  ;;  %v3398_v21 = vld [vmem:[%s4961_s8 + $0xd4] ss:$8 sps:$4 sm:$0xff]  }
 0x1b7   : > { %v1472_v16 = vmul.f32 %v4146_v53, %v1308_v60  ;;  %v1312_v47 = vadd.f32 %v1311_v49, %v4141_v1  ;;  %v1313_v63 = vpop.f32.mrb[11].mxu1  ;;  %v1519_v52 = vsel %vm1390_vm15, %v1264_v39, %v1455_v57  ;;  %vm1407_vm0 = vcmp.ge.f32.partialorder %v1308_v60, 0.0  ;;  %2445 = vmatprep.subr.bf16.mxu0 %v3398_v21 }
 0x1b8   : > { %v1473_v33 = vmul.f32 %v4146_v53, %v1310_v48  ;;  %v1314_v55 = vadd.f32 %v1313_v63, %v4144_v15  ;;  %v1571_v6 = vpack.c.bf16 %v1519_v52, %v1517_v56  ;;  %vm1408_vm1 = vcmp.ge.f32.partialorder %v1310_v48, 0.0  ;;  %v3396_v63 = vld [vmem:[%s4961_s8 + $0xd0] ss:$8 sps:$4 sm:$0xff]  }
 0x1b9   : > { %vm1409_vm2 = vcmp.ge.f32.partialorder %v1312_v47, 0.0  ;;  %v1474_v20 = vmul.f32 %v4146_v53, %v1312_v47  ;;  %v1570_v18 = vpack.c.bf16 %v1518_v36, %v1516_v30  ;;  %v4327_v3 = vsel %vm1407_vm0, %v1308_v60, %v1472_v16  ;;  %2446 = vmatpush1.bf16.msra.mxu0 %v3396_v63 }
 0x1ba   : > { %vm1410_vm3 = vcmp.ge.f32.partialorder %v1314_v55, 0.0  ;;  %v1475_v40 = vmul.f32 %v4146_v53, %v1314_v55  ;;  %v1267_v43 = vpop.f32.mrb[24].mxu0  ;;  %1878 = vmatprep.mubr.bf16.mxu1 %v1571_v6  ;;  %v4336_v12 = vsel %vm1408_vm1, %v1310_v48, %v1473_v33 }
 0x1bb   : > { %v1268_v62 = vadd.f32 %v1267_v43, %v4141_v1  ;;  %v1269_v51 = vpop.f32.mrb[25].mxu0  ;;  %1879 = vmatmul.mubr.bf16.gmra.mrb[52].mxu1 %v1570_v18  ;;  %v4329_v0 = vsel %vm1409_vm2, %v1312_v47, %v1474_v20 }
 0x1bc   : > { %v1270_v4 = vadd.f32 %v1269_v51, %v4144_v15  ;;  %v1271_v11 = vpop.f32.mrb[26].mxu0  ;;  %v4339_v14 = vsel %vm1410_vm3, %v1314_v55, %v1475_v40  ;;  %v1580_v19 = vpack.c.bf16 %v4329_v0, %v4327_v3  ;;  %v1624_v3 = vld [vmem:[%s4960_s7] sm:$0x3] }
 0x1bd   : > { %vm1391_vm4 = vcmp.ge.f32.partialorder %v1268_v62, 0.0  ;;  %v1456_v22 = vmul.f32 %v4146_v53, %v1268_v62  ;;  %v1272_v23 = vadd.f32 %v1271_v11, %v4141_v1  ;;  %v1273_v24 = vpop.f32.mrb[27].mxu0  ;;  %v1317_v8 = vpop.f32.mrb[12].mxu1  ;;  %v1581_v37 = vpack.c.bf16 %v4339_v14, %v4336_v12 }
 0x1be   : > { %v1457_v34 = vmul.f32 %v4146_v53, %v1270_v4  ;;  %v1274_v38 = vadd.f32 %v1273_v24, %v4144_v15  ;;  %v1318_v27 = vadd.f32 %v1317_v8, %v4141_v1  ;;  %v1319_v29 = vpop.f32.mrb[13].mxu1  ;;  %vm1392_vm5 = vcmp.ge.f32.partialorder %v1270_v4, 0.0 }
 0x1bf   : > { %vm1393_vm6 = vcmp.ge.f32.partialorder %v1272_v23, 0.0  ;;  %v1458_v26 = vmul.f32 %v4146_v53, %v1272_v23  ;;  %v1320_v39 = vadd.f32 %v1319_v29, %v4144_v15  ;;  %v1321_v9 = vpop.f32.mrb[14].mxu1  ;;  %v1520_v60 = vsel %vm1391_vm4, %v1268_v62, %v1456_v22 }
 0x1c0   : > { %vm1394_vm7 = vcmp.ge.f32.partialorder %v1274_v38, 0.0  ;;  %v1459_v46 = vmul.f32 %v4146_v53, %v1274_v38  ;;  %vm1411_vm8 = vcmp.ge.f32.partialorder %v1318_v27, 0.0  ;;  %v1323_v57 = vpop.f32.mrb[15].mxu1  ;;  %v1476_v17 = vmul.f32 %v4146_v53, %v1318_v27 }
 0x1c1   : > { %v1477_v48 = vmul.f32 %v4146_v53, %v1320_v39  ;;  %v1322_v49 = vadd.f32 %v1321_v9, %v4141_v1  ;;  %v1324_v30 = vadd.f32 %v1323_v57, %v4144_v15  ;;  %vm1412_vm9 = vcmp.ge.f32.partialorder %v1320_v39, 0.0 }
 0x1c2   : > { %v1277_v36 = vpop.f32.mrb[28].mxu0  ;;  %v1521_v41 = vsel %vm1392_vm5, %v1270_v4, %v1457_v34  ;;  %v1523_v16 = vsel %vm1394_vm7, %v1274_v38, %v1459_v46  ;;  %v1522_v47 = vsel %vm1393_vm6, %v1272_v23, %v1458_v26  ;;  %v4380_v61 = vsel %vm1411_vm8, %v1318_v27, %v1476_v17 }
 0x1c3   : > { %vm1413_vm10 = vcmp.ge.f32.partialorder %v1322_v49, 0.0  ;;  %v1478_v56 = vmul.f32 %v4146_v53, %v1322_v49  ;;  %vm1414_vm11 = vcmp.ge.f32.partialorder %v1324_v30, 0.0  ;;  %v1479_v52 = vmul.f32 %v4146_v53, %v1324_v30  ;;  %v1279_v28 = vpop.f32.mrb[29].mxu0 }
 0x1c4   : > { %v1278_v33 = vadd.f32 %v1277_v36, %v4141_v1  ;;  %v1280_v55 = vadd.f32 %v1279_v28, %v4144_v15  ;;  %v1281_v6 = vpop.f32.mrb[30].mxu0  ;;  %v1573_v20 = vpack.c.bf16 %v1523_v16, %v1521_v41  ;;  %v1572_v18 = vpack.c.bf16 %v1522_v47, %v1520_v60 }
 0x1c5   : > { %v1282_v40 = vadd.f32 %v1281_v6, %v4141_v1  ;;  %v1283_v43 = vpop.f32.mrb[31].mxu0  ;;  %v1327_v59 = vpop.f32.mrb[16].mxu1  ;;  %v4375_v62 = vsel %vm1412_vm9, %v1320_v39, %v1477_v48  ;;  %v4377_v51 = vsel %vm1414_vm11, %v1324_v30, %v1479_v52  ;;  %v4388_v38 = vsel %vm1413_vm10, %v1322_v49, %v1478_v56 }
 0x1c6   : > { %vm1395_vm12 = vcmp.ge.f32.partialorder %v1278_v33, 0.0  ;;  %v1460_v4 = vmul.f32 %v4146_v53, %v1278_v33  ;;  %vm1396_vm13 = vcmp.ge.f32.partialorder %v1280_v55, 0.0  ;;  %v1461_v11 = vmul.f32 %v4146_v53, %v1280_v55  ;;  %1888 = vmatprep.mubr.bf16.mxu1 %v1573_v20  ;;  %v1329_v22 = vpop.f32.mrb[17].mxu1 }
 0x1c7   : > { %v1462_v23 = vmul.f32 %v4146_v53, %v1282_v40  ;;  %v1284_v24 = vadd.f32 %v1283_v43, %v4144_v15  ;;  %v1328_v8 = vadd.f32 %v1327_v59, %v4141_v1  ;;  %1889 = vmatmul.mubr.bf16.gmra.mrb[56].mxu1 %v1572_v18  ;;  %v1331_v34 = vpop.f32.mrb[18].mxu1  ;;  %vm1397_vm14 = vcmp.ge.f32.partialorder %v1282_v40, 0.0 }
 0x1c8   : > { %v1330_v27 = vadd.f32 %v1329_v22, %v4144_v15  ;;  %v1332_v29 = vadd.f32 %v1331_v34, %v4141_v1  ;;  %v1333_v13 = vpop.f32.mrb[19].mxu1  ;;  %v1525_v26 = vsel %vm1396_vm13, %v1280_v55, %v1461_v11  ;;  %v1524_v21 = vsel %vm1395_vm12, %v1278_v33, %v1460_v4 }
 0x1c9   : > { %vm1398_vm15 = vcmp.ge.f32.partialorder %v1284_v24, 0.0  ;;  %v1463_v39 = vmul.f32 %v4146_v53, %v1284_v24  ;;  %v1480_v9 = vmul.f32 %v4146_v53, %v1328_v8  ;;  %vm1415_vm0 = vcmp.ge.f32.partialorder %v1328_v8, 0.0 }
 0x1ca   : > { %v1481_v46 = vmul.f32 %v4146_v53, %v1330_v27  ;;  %vm1417_vm1 = vcmp.ge.f32.partialorder %v1332_v29, 0.0  ;;  %v1482_v57 = vmul.f32 %v4146_v53, %v1332_v29  ;;  %v1334_v60 = vadd.f32 %v1333_v13, %v4144_v15 }
 0x1cb   : > { %v1527_v17 = vsel %vm1398_vm15, %v1284_v24, %v1463_v39  ;;  %v1526_v48 = vsel %vm1397_vm14, %v1282_v40, %v1462_v23  ;;  %v1583_v49 = vpack.c.bf16 %v4377_v51, %v4375_v62  ;;  %vm1416_vm2 = vcmp.ge.f32.partialorder %v1330_v27, 0.0 }
 0x1cc   : > { %v1575_v30 = vpack.c.bf16 %v1527_v17, %v1525_v26  ;;  %v1574_v36 = vpack.c.bf16 %v1526_v48, %v1524_v21  ;;  %v1582_v41 = vpack.c.bf16 %v4388_v38, %v4380_v61  ;;  %vm1418_vm3 = vcmp.ge.f32.partialorder %v1334_v60, 0.0 }
 0x1cd   : > { %v1483_v16 = vmul.f32 %v4146_v53, %v1334_v60  ;;  %v1337_v47 = vpop.f32.mrb[20].mxu1  ;;  %v4403_v63 = vsel %vm1415_vm0, %v1328_v8, %v1480_v9  ;;  %v4405_v56 = vsel %vm1417_vm1, %v1332_v29, %v1482_v57  ;;  %v4412_v20 = vsel %vm1416_vm2, %v1330_v27, %v1481_v46 }
 0x1ce   : > { %1898 = vmatprep.mubr.bf16.mxu1 %v1575_v30  ;;  %v1338_v52 = vadd.f32 %v1337_v47, %v4141_v1  ;;  %v1339_v28 = vpop.f32.mrb[21].mxu1  ;;  %v1584_v33 = vpack.c.bf16 %v4405_v56, %v4403_v63  ;;  %v4498_v0 = vrot.slane %v1624_v3, %v3654_v7  ;;  %v4503_v51 = vstv %s3180_s13 }
 0x1cf   : > { %1899 = vmatmul.mubr.bf16.gmra.mrb[60].mxu1 %v1574_v36  ;;  %v1340_v55 = vadd.f32 %v1339_v28, %v4144_v15  ;;  %v1341_v6 = vpop.f32.mrb[22].mxu1  ;;  %v4414_v18 = vsel %vm1418_vm3, %v1334_v60, %v1483_v16 }
 0x1d0   : > { %v1484_v40 = vmul.f32 %v4146_v53, %v1338_v52  ;;  %1908 = vmatprep.mubr.bf16.mxu1 %v1577_v25  ;;  %v1342_v43 = vadd.f32 %v1341_v6, %v4141_v1  ;;  %v1343_v59 = vpop.f32.mrb[23].mxu1  ;;  %v1585_v4 = vpack.c.bf16 %v4414_v18, %v4412_v20  ;;  %vm1419_vm4 = vcmp.ge.f32.partialorder %v1338_v52, 0.0 }
 0x1d1   : > { %v1485_v11 = vmul.f32 %v4146_v53, %v1340_v55  ;;  %v1344_v22 = vadd.f32 %v1343_v59, %v4144_v15  ;;  %vm1420_vm5 = vcmp.ge.f32.partialorder %v1340_v55, 0.0 }
 0x1d2   : > { %vm1421_vm6 = vcmp.ge.f32.partialorder %v1342_v43, 0.0  ;;  %v1486_v23 = vmul.f32 %v4146_v53, %v1342_v43  ;;  %v4427_v10 = vsel %vm1419_vm4, %v1338_v52, %v1484_v40 }
 0x1d3   : > { %vm1422_vm7 = vcmp.ge.f32.partialorder %v1344_v22, 0.0  ;;  %v1487_v24 = vmul.f32 %v4146_v53, %v1344_v22  ;;  %v4431_v8 = vsel %vm1420_vm5, %v1340_v55, %v1485_v11 }
 0x1d4   : > { %v4429_v45 = vsel %vm1421_vm6, %v1342_v43, %v1486_v23  ;;  %v3404_v23 = vld [vmem:[%s4961_s8 + $0xf4] ss:$8 sps:$4 sm:$0xff]  }
 0x1d5   : > { %v1347_v25 = vpop.f32.mrb[24].mxu1  ;;  %v4433_v34 = vsel %vm1422_vm7, %v1344_v22, %v1487_v24  ;;  %v1586_v27 = vpack.c.bf16 %v4429_v45, %v4427_v10 }
 0x1d6   : > { %v1348_v29 = vadd.f32 %v1347_v25, %v4141_v1  ;;  %v1349_v13 = vpop.f32.mrb[25].mxu1  ;;  %v1587_v26 = vpack.c.bf16 %v4433_v34, %v4431_v8 }
 0x1d7   : > { %1909 = vmatmul.mubr.bf16.gmra.mrb[64].mxu1 %v1576_v54  ;;  %v1350_v39 = vadd.f32 %v1349_v13, %v4144_v15  ;;  %v1351_v9 = vpop.f32.mrb[26].mxu1 }
 0x1d8   : > { %v1488_v21 = vmul.f32 %v4146_v53, %v1348_v29  ;;  %1918 = vmatprep.mubr.bf16.mxu1 %v1579_v2  ;;  %v1352_v46 = vadd.f32 %v1351_v9, %v4141_v1  ;;  %v1353_v57 = vpop.f32.mrb[27].mxu1  ;;  %vm1423_vm8 = vcmp.ge.f32.partialorder %v1348_v29, 0.0 }
 0x1d9   : > { %v1489_v60 = vmul.f32 %v4146_v53, %v1350_v39  ;;  %v1354_v17 = vadd.f32 %v1353_v57, %v4144_v15  ;;  %vm1424_vm9 = vcmp.ge.f32.partialorder %v1350_v39, 0.0 }
 0x1da   : > { %vm1425_vm10 = vcmp.ge.f32.partialorder %v1352_v46, 0.0  ;;  %v1490_v50 = vmul.f32 %v4146_v53, %v1352_v46  ;;  %v1552_v54 = vsel %vm1423_vm8, %v1348_v29, %v1488_v21 }
 0x1db   : > { %vm1426_vm11 = vcmp.ge.f32.partialorder %v1354_v17, 0.0  ;;  %v1491_v58 = vmul.f32 %v4146_v53, %v1354_v17  ;;  %v1553_v35 = vsel %vm1424_vm9, %v1350_v39, %v1489_v60 }
 0x1dc   : > { %v1554_v48 = vsel %vm1425_vm10, %v1352_v46, %v1490_v50 }
 0x1dd   : > { %v1357_v30 = vpop.f32.mrb[28].mxu1  ;;  %v1555_v42 = vsel %vm1426_vm11, %v1354_v17, %v1491_v58  ;;  %v1588_v2 = vpack.c.bf16 %v1554_v48, %v1552_v54 }
 0x1de   : > { %v1358_v36 = vadd.f32 %v1357_v30, %v4141_v1  ;;  %v1359_v16 = vpop.f32.mrb[29].mxu1  ;;  %v1589_v47 = vpack.c.bf16 %v1555_v42, %v1553_v35 }
 0x1df   : > { %1919 = vmatmul.mubr.bf16.gmra.mrb[68].mxu1 %v1578_v44  ;;  %v1360_v52 = vadd.f32 %v1359_v16, %v4144_v15  ;;  %v1361_v28 = vpop.f32.mrb[30].mxu1 }
 0x1e0   : > { %v1492_v55 = vmul.f32 %v4146_v53, %v1358_v36  ;;  %1928 = vmatprep.mubr.bf16.mxu1 %v1581_v37  ;;  %v1362_v6 = vadd.f32 %v1361_v28, %v4141_v1  ;;  %v1363_v40 = vpop.f32.mrb[31].mxu1  ;;  %vm1427_vm12 = vcmp.ge.f32.partialorder %v1358_v36, 0.0  ;;  %v3399_v1 = vld [vmem:[%s4961_s8 + $0xe0] ss:$8 sps:$4 sm:$0xff]  }
 0x1e1   : > { %v1493_v43 = vmul.f32 %v4146_v53, %v1360_v52  ;;  %v1364_v59 = vadd.f32 %v1363_v40, %v4144_v15  ;;  %vm1428_vm13 = vcmp.ge.f32.partialorder %v1360_v52, 0.0  ;;  %v3401_v15 = vld [vmem:[%s4961_s8 + $0xe4] ss:$8 sps:$4 sm:$0xff]  }
 0x1e2   : > { %vm1429_vm14 = vcmp.ge.f32.partialorder %v1362_v6, 0.0  ;;  %v1494_v31 = vmul.f32 %v4146_v53, %v1362_v6  ;;  %v1556_v44 = vsel %vm1427_vm12, %v1358_v36, %v1492_v55  ;;  %2447 = vmatprep.subr.bf16.mxu0 %v3401_v15 }
 0x1e3   : > { %vm1430_vm15 = vcmp.ge.f32.partialorder %v1364_v59, 0.0  ;;  %v1495_v32 = vmul.f32 %v4146_v53, %v1364_v59  ;;  %v1557_v22 = vsel %vm1428_vm13, %v1360_v52, %v1493_v43  ;;  %2448 = vmatpush1.bf16.msra.mxu0 %v3399_v1  ;;  %v3402_v53 = vld [vmem:[%s4961_s8 + $0xf0] ss:$8 sps:$4 sm:$0xff]  }
 0x1e4   : > { %v1558_v11 = vsel %vm1429_vm14, %v1362_v6, %v1494_v31  ;;  %2449 = vmatprep.subr.bf16.mxu0 %v3404_v23 }
 0x1e5   : > { %v1559_v12 = vsel %vm1430_vm15, %v1364_v59, %v1495_v32  ;;  %v1590_v14 = vpack.c.bf16 %v1558_v11, %v1556_v44 }
 0x1e6   : > { %v1591_v37 = vpack.c.bf16 %v1559_v12, %v1557_v22 }
 0x1e7   : > { %1929 = vmatmul.mubr.bf16.gmra.mrb[72].mxu1 %v1580_v19  ;;  %2450 = vmatpush1.bf16.msra.mxu0 %v3402_v53  ;;  %v4501_v19 = vrot.slane %v1624_v3, %v3649_v5 }
 0x1e8   : > { %1938 = vmatprep.mubr.bf16.mxu1 %v1583_v49 }
 0x1ef   : > { %1939 = vmatmul.mubr.bf16.gmra.mrb[76].mxu1 %v1582_v41 }
 0x1f0   : > { %1948 = vmatprep.mubr.bf16.mxu1 %v1585_v4 }
 0x1f7   : > { %1949 = vmatmul.mubr.bf16.gmra.mrb[80].mxu1 %v1584_v33 }
 0x1f8   : > { %1958 = vmatprep.mubr.bf16.mxu1 %v1587_v26 }
 0x1ff   : > { %1959 = vmatmul.mubr.bf16.gmra.mrb[84].mxu1 %v1586_v27 }
 0x200   : > { %1968 = vmatprep.mubr.bf16.mxu1 %v1589_v47 }
 0x207   : > { %1969 = vmatmul.mubr.bf16.gmra.mrb[88].mxu1 %v1588_v2 }
 0x208   : > { %1978 = vmatprep.mubr.bf16.mxu1 %v1591_v37 }
 0x20f   : > { %1979 = vmatmul.mubr.bf16.gmra.mrb[92].mxu1 %v1590_v14 }
 0x260   : > { %v1830_v62 = vpop.f32.mrb[32].mxu1 }
 0x261   : > { %v1831_v61 = vadd.f32 %v1830_v62, %v4498_v0  ;;  %v1832_v38 = vpop.f32.mrb[33].mxu1 }
 0x262   : > { %v1833_v49 = vadd.f32 %v1832_v38, %v4501_v19  ;;  %v1834_v41 = vpop.f32.mrb[34].mxu1 }
 0x263   : > { %v2055_v63 = vmul.f32 %v4503_v51, %v1831_v61  ;;  %v1835_v56 = vadd.f32 %v1834_v41, %v4498_v0  ;;  %v1836_v33 = vpop.f32.mrb[35].mxu1  ;;  %vm1990_vm0 = vcmp.ge.f32.partialorder %v1831_v61, 0.0 }
 0x264   : > { %v2056_v20 = vmul.f32 %v4503_v51, %v1833_v49  ;;  %v1837_v18 = vadd.f32 %v1836_v33, %v4501_v19  ;;  %vm1991_vm1 = vcmp.ge.f32.partialorder %v1833_v49, 0.0 }
 0x265   : > { %vm1992_vm2 = vcmp.ge.f32.partialorder %v1835_v56, 0.0  ;;  %v2057_v4 = vmul.f32 %v4503_v51, %v1835_v56  ;;  %v2119_v10 = vsel %vm1990_vm0, %v1831_v61, %v2055_v63 }
 0x266   : > { %vm1993_vm3 = vcmp.ge.f32.partialorder %v1837_v18, 0.0  ;;  %v2058_v24 = vmul.f32 %v4503_v51, %v1837_v18  ;;  %v2120_v34 = vsel %vm1991_vm1, %v1833_v49, %v2056_v20 }
 0x267   : > { %v2121_v45 = vsel %vm1992_vm2, %v1835_v56, %v2057_v4 }
 0x268   : > { %v2183_v25 = vpack.c.bf16 %v2121_v45, %v2119_v10  ;;  %v1840_v8 = vpop.f32.mrb[36].mxu1  ;;  %v2122_v27 = vsel %vm1993_vm3, %v1837_v18, %v2058_v24 }
 0x269   : > { %v1841_v29 = vadd.f32 %v1840_v8, %v4498_v0  ;;  %v1842_v13 = vpop.f32.mrb[37].mxu1  ;;  %v2184_v26 = vpack.c.bf16 %v2122_v27, %v2120_v34 }
 0x26a   : > { %v1843_v39 = vadd.f32 %v1842_v13, %v4501_v19  ;;  %v1844_v9 = vpop.f32.mrb[38].mxu1 }
 0x26b   : > { %v2059_v21 = vmul.f32 %v4503_v51, %v1841_v29  ;;  %v1845_v46 = vadd.f32 %v1844_v9, %v4498_v0  ;;  %v1846_v57 = vpop.f32.mrb[39].mxu1  ;;  %2451 = vmatprep.mubr.bf16.mxu0 %v2184_v26  ;;  %vm1994_vm4 = vcmp.ge.f32.partialorder %v1841_v29, 0.0 }
 0x26c   : > { %v2060_v60 = vmul.f32 %v4503_v51, %v1843_v39  ;;  %v1847_v17 = vadd.f32 %v1846_v57, %v4501_v19  ;;  %2452 = vmatmul.mubr.bf16.vlgmr.msra.gmra.mrb[32].mxu0 %v2183_v25  ;;  %vm1995_vm5 = vcmp.ge.f32.partialorder %v1843_v39, 0.0 }
 0x26d   : > { %vm1996_vm6 = vcmp.ge.f32.partialorder %v1845_v46, 0.0  ;;  %v2061_v50 = vmul.f32 %v4503_v51, %v1845_v46  ;;  %v2123_v54 = vsel %vm1994_vm4, %v1841_v29, %v2059_v21 }
 0x26e   : > { %vm1997_vm7 = vcmp.ge.f32.partialorder %v1847_v17, 0.0  ;;  %v2062_v58 = vmul.f32 %v4503_v51, %v1847_v17  ;;  %v2124_v30 = vsel %vm1995_vm5, %v1843_v39, %v2060_v60 }
 0x26f   : > { %v2125_v48 = vsel %vm1996_vm6, %v1845_v46, %v2061_v50 }
 0x270   : > { %v2126_v35 = vsel %vm1997_vm7, %v1847_v17, %v2062_v58  ;;  %v2185_v42 = vpack.c.bf16 %v2125_v48, %v2123_v54  ;;  %v1850_v2 = vpop.f32.mrb[40].mxu1 }
 0x271   : > { %v2186_v36 = vpack.c.bf16 %v2126_v35, %v2124_v30  ;;  %v1851_v16 = vadd.f32 %v1850_v2, %v4498_v0  ;;  %v1852_v47 = vpop.f32.mrb[41].mxu1 }
 0x272   : > { %v1853_v52 = vadd.f32 %v1852_v47, %v4501_v19  ;;  %v1854_v28 = vpop.f32.mrb[42].mxu1 }
 0x273   : > { %2461 = vmatprep.mubr.bf16.mxu0 %v2186_v36  ;;  %v2063_v55 = vmul.f32 %v4503_v51, %v1851_v16  ;;  %v1855_v6 = vadd.f32 %v1854_v28, %v4498_v0  ;;  %v1856_v40 = vpop.f32.mrb[43].mxu1  ;;  %vm1998_vm8 = vcmp.ge.f32.partialorder %v1851_v16, 0.0 }
 0x274   : > { %2462 = vmatmul.mubr.bf16.gmra.mrb[36].mxu0 %v2185_v42  ;;  %v2064_v43 = vmul.f32 %v4503_v51, %v1853_v52  ;;  %v1857_v59 = vadd.f32 %v1856_v40, %v4501_v19  ;;  %vm1999_vm9 = vcmp.ge.f32.partialorder %v1853_v52, 0.0 }
 0x275   : > { %vm2000_vm10 = vcmp.ge.f32.partialorder %v1855_v6, 0.0  ;;  %v2065_v31 = vmul.f32 %v4503_v51, %v1855_v6  ;;  %v2127_v44 = vsel %vm1998_vm8, %v1851_v16, %v2063_v55 }
 0x276   : > { %vm2001_vm11 = vcmp.ge.f32.partialorder %v1857_v59, 0.0  ;;  %v2066_v32 = vmul.f32 %v4503_v51, %v1857_v59  ;;  %v2128_v12 = vsel %vm1999_vm9, %v1853_v52, %v2064_v43 }
 0x277   : > { %v2129_v11 = vsel %vm2000_vm10, %v1855_v6, %v2065_v31 }
 0x278   : > { %v1860_v22 = vpop.f32.mrb[44].mxu1  ;;  %v2130_v14 = vsel %vm2001_vm11, %v1857_v59, %v2066_v32  ;;  %v2187_v1 = vpack.c.bf16 %v2129_v11, %v2127_v44 }
 0x279   : > { %v1861_v15 = vadd.f32 %v1860_v22, %v4498_v0  ;;  %v1862_v37 = vpop.f32.mrb[45].mxu1  ;;  %v2188_v23 = vpack.c.bf16 %v2130_v14, %v2128_v12 }
 0x27a   : > { %v1863_v53 = vadd.f32 %v1862_v37, %v4501_v19  ;;  %v1864_v3 = vpop.f32.mrb[46].mxu1 }
 0x27b   : > { %v2067_v62 = vmul.f32 %v4503_v51, %v1861_v15  ;;  %v1865_v61 = vadd.f32 %v1864_v3, %v4498_v0  ;;  %v1866_v38 = vpop.f32.mrb[47].mxu1  ;;  %2471 = vmatprep.mubr.bf16.mxu0 %v2188_v23  ;;  %vm2002_vm12 = vcmp.ge.f32.partialorder %v1861_v15, 0.0 }
 0x27c   : > { %v2068_v49 = vmul.f32 %v4503_v51, %v1863_v53  ;;  %v1867_v41 = vadd.f32 %v1866_v38, %v4501_v19  ;;  %2472 = vmatmul.mubr.bf16.gmra.mrb[40].mxu0 %v2187_v1  ;;  %vm2003_vm13 = vcmp.ge.f32.partialorder %v1863_v53, 0.0 }
 0x27d   : > { %vm2004_vm14 = vcmp.ge.f32.partialorder %v1865_v61, 0.0  ;;  %v2069_v63 = vmul.f32 %v4503_v51, %v1865_v61  ;;  %v2131_v33 = vsel %vm2002_vm12, %v1861_v15, %v2067_v62 }
 0x27e   : > { %vm2005_vm15 = vcmp.ge.f32.partialorder %v1867_v41, 0.0  ;;  %v2070_v56 = vmul.f32 %v4503_v51, %v1867_v41  ;;  %v2132_v18 = vsel %vm2003_vm13, %v1863_v53, %v2068_v49 }
 0x27f   : > { %v2133_v20 = vsel %vm2004_vm14, %v1865_v61, %v2069_v63 }
 0x280   : > { %v2134_v4 = vsel %vm2005_vm15, %v1867_v41, %v2070_v56  ;;  %v2189_v24 = vpack.c.bf16 %v2133_v20, %v2131_v33 }
 0x281   : > { %v2190_v10 = vpack.c.bf16 %v2134_v4, %v2132_v18 }
 0x283   : > { %2481 = vmatprep.mubr.bf16.mxu0 %v2190_v10  ;;  %v1870_v45 = vpop.f32.mrb[48].mxu1 }
 0x284   : > { %2482 = vmatmul.mubr.bf16.gmra.mrb[44].mxu0 %v2189_v24  ;;  %v1871_v25 = vadd.f32 %v1870_v45, %v4498_v0  ;;  %v1872_v8 = vpop.f32.mrb[49].mxu1 }
 0x285   : > { %v1873_v34 = vadd.f32 %v1872_v8, %v4501_v19  ;;  %v1874_v27 = vpop.f32.mrb[50].mxu1 }
 0x286   : > { %v2071_v29 = vmul.f32 %v4503_v51, %v1871_v25  ;;  %v1875_v13 = vadd.f32 %v1874_v27, %v4498_v0  ;;  %v1876_v26 = vpop.f32.mrb[51].mxu1  ;;  %vm2006_vm0 = vcmp.ge.f32.partialorder %v1871_v25, 0.0 }
 0x287   : > { %v2072_v39 = vmul.f32 %v4503_v51, %v1873_v34  ;;  %v1877_v9 = vadd.f32 %v1876_v26, %v4501_v19  ;;  %vm2007_vm1 = vcmp.ge.f32.partialorder %v1873_v34, 0.0 }
 0x288   : > { %vm2008_vm2 = vcmp.ge.f32.partialorder %v1875_v13, 0.0  ;;  %v2073_v21 = vmul.f32 %v4503_v51, %v1875_v13  ;;  %v2135_v57 = vsel %vm2006_vm0, %v1871_v25, %v2071_v29 }
 0x289   : > { %vm2009_vm3 = vcmp.ge.f32.partialorder %v1877_v9, 0.0  ;;  %v2074_v46 = vmul.f32 %v4503_v51, %v1877_v9  ;;  %v2136_v17 = vsel %vm2007_vm1, %v1873_v34, %v2072_v39 }
 0x28a   : > { %v2137_v60 = vsel %vm2008_vm2, %v1875_v13, %v2073_v21 }
 0x28b   : > { %v2138_v50 = vsel %vm2009_vm3, %v1877_v9, %v2074_v46  ;;  %v2191_v58 = vpack.c.bf16 %v2137_v60, %v2135_v57 }
 0x28c   : > { %v2192_v54 = vpack.c.bf16 %v2138_v50, %v2136_v17 }
 0x28e   : > { %v1880_v48 = vpop.f32.mrb[52].mxu1  ;;  %2491 = vmatprep.mubr.bf16.mxu0 %v2192_v54 }
 0x28f   : > { %v1881_v30 = vadd.f32 %v1880_v48, %v4498_v0  ;;  %v1882_v35 = vpop.f32.mrb[53].mxu1  ;;  %2492 = vmatmul.mubr.bf16.gmra.mrb[48].mxu0 %v2191_v58 }
 0x290   : > { %v1883_v42 = vadd.f32 %v1882_v35, %v4501_v19  ;;  %v1884_v2 = vpop.f32.mrb[54].mxu1 }
 0x291   : > { %v2075_v36 = vmul.f32 %v4503_v51, %v1881_v30  ;;  %v1885_v16 = vadd.f32 %v1884_v2, %v4498_v0  ;;  %v1886_v47 = vpop.f32.mrb[55].mxu1  ;;  %vm2010_vm4 = vcmp.ge.f32.partialorder %v1881_v30, 0.0 }
 0x292   : > { %v2076_v52 = vmul.f32 %v4503_v51, %v1883_v42  ;;  %v1887_v28 = vadd.f32 %v1886_v47, %v4501_v19  ;;  %vm2011_vm5 = vcmp.ge.f32.partialorder %v1883_v42, 0.0 }
 0x293   : > { %vm2012_vm6 = vcmp.ge.f32.partialorder %v1885_v16, 0.0  ;;  %v2077_v55 = vmul.f32 %v4503_v51, %v1885_v16  ;;  %v2139_v40 = vsel %vm2010_vm4, %v1881_v30, %v2075_v36 }
 0x294   : > { %vm2013_vm7 = vcmp.ge.f32.partialorder %v1887_v28, 0.0  ;;  %v2078_v6 = vmul.f32 %v4503_v51, %v1887_v28  ;;  %v2140_v59 = vsel %vm2011_vm5, %v1883_v42, %v2076_v52 }
 0x295   : > { %v2141_v43 = vsel %vm2012_vm6, %v1885_v16, %v2077_v55 }
 0x296   : > { %v2142_v31 = vsel %vm2013_vm7, %v1887_v28, %v2078_v6  ;;  %v2193_v32 = vpack.c.bf16 %v2141_v43, %v2139_v40 }
 0x297   : > { %v2194_v44 = vpack.c.bf16 %v2142_v31, %v2140_v59 }
 0x299   : > { %2501 = vmatprep.mubr.bf16.mxu0 %v2194_v44 }
 0x29a   : > { %v1890_v11 = vpop.f32.mrb[56].mxu1  ;;  %2502 = vmatmul.mubr.bf16.gmra.mrb[52].mxu0 %v2193_v32 }
 0x29b   : > { %v1891_v22 = vadd.f32 %v1890_v11, %v4498_v0  ;;  %v1892_v12 = vpop.f32.mrb[57].mxu1 }
 0x29c   : > { %v1893_v14 = vadd.f32 %v1892_v12, %v4501_v19  ;;  %v1894_v1 = vpop.f32.mrb[58].mxu1 }
 0x29d   : > { %v2079_v15 = vmul.f32 %v4503_v51, %v1891_v22  ;;  %v1895_v37 = vadd.f32 %v1894_v1, %v4498_v0  ;;  %v1896_v23 = vpop.f32.mrb[59].mxu1  ;;  %vm2014_vm8 = vcmp.ge.f32.partialorder %v1891_v22, 0.0 }
 0x29e   : > { %v2080_v53 = vmul.f32 %v4503_v51, %v1893_v14  ;;  %v1897_v3 = vadd.f32 %v1896_v23, %v4501_v19  ;;  %vm2015_vm9 = vcmp.ge.f32.partialorder %v1893_v14, 0.0 }
 0x29f   : > { %vm2016_vm10 = vcmp.ge.f32.partialorder %v1895_v37, 0.0  ;;  %v2081_v62 = vmul.f32 %v4503_v51, %v1895_v37  ;;  %v2143_v38 = vsel %vm2014_vm8, %v1891_v22, %v2079_v15 }
 0x2a0   : > { %vm2017_vm11 = vcmp.ge.f32.partialorder %v1897_v3, 0.0  ;;  %v2082_v61 = vmul.f32 %v4503_v51, %v1897_v3  ;;  %v2144_v63 = vsel %vm2015_vm9, %v1893_v14, %v2080_v53 }
 0x2a1   : > { %v2145_v49 = vsel %vm2016_vm10, %v1895_v37, %v2081_v62 }
 0x2a2   : > { %v1900_v41 = vpop.f32.mrb[60].mxu1  ;;  %v2146_v56 = vsel %vm2017_vm11, %v1897_v3, %v2082_v61  ;;  %v2195_v33 = vpack.c.bf16 %v2145_v49, %v2143_v38 }
 0x2a3   : > { %v1901_v20 = vadd.f32 %v1900_v41, %v4498_v0  ;;  %v1902_v18 = vpop.f32.mrb[61].mxu1  ;;  %v2196_v4 = vpack.c.bf16 %v2146_v56, %v2144_v63 }
 0x2a4   : > { %v1903_v24 = vadd.f32 %v1902_v18, %v4501_v19  ;;  %v1904_v10 = vpop.f32.mrb[62].mxu1 }
 0x2a5   : > { %v2083_v45 = vmul.f32 %v4503_v51, %v1901_v20  ;;  %v1905_v25 = vadd.f32 %v1904_v10, %v4498_v0  ;;  %v1906_v8 = vpop.f32.mrb[63].mxu1  ;;  %2511 = vmatprep.mubr.bf16.mxu0 %v2196_v4  ;;  %vm2018_vm12 = vcmp.ge.f32.partialorder %v1901_v20, 0.0 }
 0x2a6   : > { %v2084_v34 = vmul.f32 %v4503_v51, %v1903_v24  ;;  %v1907_v27 = vadd.f32 %v1906_v8, %v4501_v19  ;;  %2512 = vmatmul.mubr.bf16.gmra.mrb[56].mxu0 %v2195_v33  ;;  %vm2019_vm13 = vcmp.ge.f32.partialorder %v1903_v24, 0.0 }
 0x2a7   : > { %vm2020_vm14 = vcmp.ge.f32.partialorder %v1905_v25, 0.0  ;;  %v2085_v29 = vmul.f32 %v4503_v51, %v1905_v25  ;;  %v2147_v26 = vsel %vm2018_vm12, %v1901_v20, %v2083_v45 }
 0x2a8   : > { %vm2021_vm15 = vcmp.ge.f32.partialorder %v1907_v27, 0.0  ;;  %v2086_v13 = vmul.f32 %v4503_v51, %v1907_v27  ;;  %v2148_v21 = vsel %vm2019_vm13, %v1903_v24, %v2084_v34 }
 0x2a9   : > { %v2149_v39 = vsel %vm2020_vm14, %v1905_v25, %v2085_v29 }
 0x2aa   : > { %v1910_v9 = vpop.f32.mrb[64].mxu1  ;;  %v2150_v46 = vsel %vm2021_vm15, %v1907_v27, %v2086_v13  ;;  %v2197_v57 = vpack.c.bf16 %v2149_v39, %v2147_v26 }
 0x2ab   : > { %v1911_v60 = vadd.f32 %v1910_v9, %v4498_v0  ;;  %v1912_v17 = vpop.f32.mrb[65].mxu1  ;;  %v2198_v50 = vpack.c.bf16 %v2150_v46, %v2148_v21 }
 0x2ac   : > { %v1913_v58 = vadd.f32 %v1912_v17, %v4501_v19  ;;  %v1914_v54 = vpop.f32.mrb[66].mxu1 }
 0x2ad   : > { %v2087_v48 = vmul.f32 %v4503_v51, %v1911_v60  ;;  %v1915_v30 = vadd.f32 %v1914_v54, %v4498_v0  ;;  %v1916_v35 = vpop.f32.mrb[67].mxu1  ;;  %2521 = vmatprep.mubr.bf16.mxu0 %v2198_v50  ;;  %vm2022_vm0 = vcmp.ge.f32.partialorder %v1911_v60, 0.0 }
 0x2ae   : > { %v2088_v42 = vmul.f32 %v4503_v51, %v1913_v58  ;;  %v1917_v2 = vadd.f32 %v1916_v35, %v4501_v19  ;;  %2522 = vmatmul.mubr.bf16.gmra.mrb[60].mxu0 %v2197_v57  ;;  %vm2023_vm1 = vcmp.ge.f32.partialorder %v1913_v58, 0.0 }
 0x2af   : > { %vm2024_vm2 = vcmp.ge.f32.partialorder %v1915_v30, 0.0  ;;  %v2089_v36 = vmul.f32 %v4503_v51, %v1915_v30  ;;  %v2151_v47 = vsel %vm2022_vm0, %v1911_v60, %v2087_v48 }
 0x2b0   : > { %vm2025_vm3 = vcmp.ge.f32.partialorder %v1917_v2, 0.0  ;;  %v2090_v16 = vmul.f32 %v4503_v51, %v1917_v2  ;;  %v2152_v55 = vsel %vm2023_vm1, %v1913_v58, %v2088_v42 }
 0x2b1   : > { %v2153_v52 = vsel %vm2024_vm2, %v1915_v30, %v2089_v36 }
 0x2b2   : > { %v1920_v28 = vpop.f32.mrb[68].mxu1  ;;  %v2154_v6 = vsel %vm2025_vm3, %v1917_v2, %v2090_v16  ;;  %v2199_v40 = vpack.c.bf16 %v2153_v52, %v2151_v47 }
 0x2b3   : > { %v1921_v43 = vadd.f32 %v1920_v28, %v4498_v0  ;;  %v1922_v59 = vpop.f32.mrb[69].mxu1  ;;  %v2200_v31 = vpack.c.bf16 %v2154_v6, %v2152_v55 }
 0x2b4   : > { %v1923_v32 = vadd.f32 %v1922_v59, %v4501_v19  ;;  %v1924_v44 = vpop.f32.mrb[70].mxu1 }
 0x2b5   : > { %v2091_v11 = vmul.f32 %v4503_v51, %v1921_v43  ;;  %v1925_v22 = vadd.f32 %v1924_v44, %v4498_v0  ;;  %v1926_v12 = vpop.f32.mrb[71].mxu1  ;;  %2531 = vmatprep.mubr.bf16.mxu0 %v2200_v31  ;;  %vm2026_vm4 = vcmp.ge.f32.partialorder %v1921_v43, 0.0 }
 0x2b6   : > { %v2092_v14 = vmul.f32 %v4503_v51, %v1923_v32  ;;  %v1927_v1 = vadd.f32 %v1926_v12, %v4501_v19  ;;  %2532 = vmatmul.mubr.bf16.gmra.mrb[64].mxu0 %v2199_v40  ;;  %vm2027_vm5 = vcmp.ge.f32.partialorder %v1923_v32, 0.0 }
 0x2b7   : > { %vm2028_vm6 = vcmp.ge.f32.partialorder %v1925_v22, 0.0  ;;  %v2093_v15 = vmul.f32 %v4503_v51, %v1925_v22  ;;  %v2155_v23 = vsel %vm2026_vm4, %v1921_v43, %v2091_v11 }
 0x2b8   : > { %vm2029_vm7 = vcmp.ge.f32.partialorder %v1927_v1, 0.0  ;;  %v2094_v37 = vmul.f32 %v4503_v51, %v1927_v1  ;;  %v2156_v62 = vsel %vm2027_vm5, %v1923_v32, %v2092_v14 }
 0x2b9   : > { %v2157_v53 = vsel %vm2028_vm6, %v1925_v22, %v2093_v15 }
 0x2ba   : > { %v1930_v3 = vpop.f32.mrb[72].mxu1  ;;  %v2158_v61 = vsel %vm2029_vm7, %v1927_v1, %v2094_v37  ;;  %v2201_v38 = vpack.c.bf16 %v2157_v53, %v2155_v23 }
 0x2bb   : > { %v1931_v49 = vadd.f32 %v1930_v3, %v4498_v0  ;;  %v1932_v41 = vpop.f32.mrb[73].mxu1  ;;  %v2202_v63 = vpack.c.bf16 %v2158_v61, %v2156_v62 }
 0x2bc   : > { %v1933_v56 = vadd.f32 %v1932_v41, %v4501_v19  ;;  %v1934_v33 = vpop.f32.mrb[74].mxu1 }
 0x2bd   : > { %v2095_v20 = vmul.f32 %v4503_v51, %v1931_v49  ;;  %v1935_v18 = vadd.f32 %v1934_v33, %v4498_v0  ;;  %v1936_v4 = vpop.f32.mrb[75].mxu1  ;;  %2541 = vmatprep.mubr.bf16.mxu0 %v2202_v63  ;;  %vm2030_vm8 = vcmp.ge.f32.partialorder %v1931_v49, 0.0 }
 0x2be   : > { %v2096_v24 = vmul.f32 %v4503_v51, %v1933_v56  ;;  %v1937_v10 = vadd.f32 %v1936_v4, %v4501_v19  ;;  %2542 = vmatmul.mubr.bf16.gmra.mrb[68].mxu0 %v2201_v38  ;;  %vm2031_vm9 = vcmp.ge.f32.partialorder %v1933_v56, 0.0 }
 0x2bf   : > { %vm2032_vm10 = vcmp.ge.f32.partialorder %v1935_v18, 0.0  ;;  %v2097_v45 = vmul.f32 %v4503_v51, %v1935_v18  ;;  %v2159_v8 = vsel %vm2030_vm8, %v1931_v49, %v2095_v20 }
 0x2c0   : > { %vm2033_vm11 = vcmp.ge.f32.partialorder %v1937_v10, 0.0  ;;  %v2098_v25 = vmul.f32 %v4503_v51, %v1937_v10  ;;  %v2160_v29 = vsel %vm2031_vm9, %v1933_v56, %v2096_v24 }
 0x2c1   : > { %v2161_v34 = vsel %vm2032_vm10, %v1935_v18, %v2097_v45 }
 0x2c2   : > { %v1940_v27 = vpop.f32.mrb[76].mxu1  ;;  %v2162_v13 = vsel %vm2033_vm11, %v1937_v10, %v2098_v25  ;;  %v2203_v26 = vpack.c.bf16 %v2161_v34, %v2159_v8 }
 0x2c3   : > { %v1941_v39 = vadd.f32 %v1940_v27, %v4498_v0  ;;  %v1942_v9 = vpop.f32.mrb[77].mxu1  ;;  %v2204_v21 = vpack.c.bf16 %v2162_v13, %v2160_v29 }
 0x2c4   : > { %v1943_v46 = vadd.f32 %v1942_v9, %v4501_v19  ;;  %v1944_v57 = vpop.f32.mrb[78].mxu1 }
 0x2c5   : > { %v2099_v60 = vmul.f32 %v4503_v51, %v1941_v39  ;;  %v1945_v17 = vadd.f32 %v1944_v57, %v4498_v0  ;;  %v1946_v50 = vpop.f32.mrb[79].mxu1  ;;  %2551 = vmatprep.mubr.bf16.mxu0 %v2204_v21  ;;  %vm2034_vm12 = vcmp.ge.f32.partialorder %v1941_v39, 0.0 }
 0x2c6   : > { %v2100_v58 = vmul.f32 %v4503_v51, %v1943_v46  ;;  %v1947_v54 = vadd.f32 %v1946_v50, %v4501_v19  ;;  %2552 = vmatmul.mubr.bf16.gmra.mrb[72].mxu0 %v2203_v26  ;;  %vm2035_vm13 = vcmp.ge.f32.partialorder %v1943_v46, 0.0 }
 0x2c7   : > { %vm2036_vm14 = vcmp.ge.f32.partialorder %v1945_v17, 0.0  ;;  %v2101_v48 = vmul.f32 %v4503_v51, %v1945_v17  ;;  %v2163_v35 = vsel %vm2034_vm12, %v1941_v39, %v2099_v60 }
 0x2c8   : > { %vm2037_vm15 = vcmp.ge.f32.partialorder %v1947_v54, 0.0  ;;  %v2102_v30 = vmul.f32 %v4503_v51, %v1947_v54  ;;  %v2164_v36 = vsel %vm2035_vm13, %v1943_v46, %v2100_v58 }
 0x2c9   : > { %v2165_v42 = vsel %vm2036_vm14, %v1945_v17, %v2101_v48 }
 0x2ca   : > { %v1950_v2 = vpop.f32.mrb[80].mxu1  ;;  %v2166_v16 = vsel %vm2037_vm15, %v1947_v54, %v2102_v30  ;;  %v2205_v47 = vpack.c.bf16 %v2165_v42, %v2163_v35 }
 0x2cb   : > { %v1951_v52 = vadd.f32 %v1950_v2, %v4498_v0  ;;  %v1952_v28 = vpop.f32.mrb[81].mxu1  ;;  %v2206_v55 = vpack.c.bf16 %v2166_v16, %v2164_v36 }
 0x2cc   : > { %v1953_v6 = vadd.f32 %v1952_v28, %v4501_v19  ;;  %v1954_v40 = vpop.f32.mrb[82].mxu1 }
 0x2cd   : > { %v2103_v43 = vmul.f32 %v4503_v51, %v1951_v52  ;;  %v1955_v59 = vadd.f32 %v1954_v40, %v4498_v0  ;;  %v1956_v31 = vpop.f32.mrb[83].mxu1  ;;  %2561 = vmatprep.mubr.bf16.mxu0 %v2206_v55  ;;  %vm2038_vm0 = vcmp.ge.f32.partialorder %v1951_v52, 0.0 }
 0x2ce   : > { %v2104_v32 = vmul.f32 %v4503_v51, %v1953_v6  ;;  %v1957_v44 = vadd.f32 %v1956_v31, %v4501_v19  ;;  %2562 = vmatmul.mubr.bf16.gmra.mrb[76].mxu0 %v2205_v47  ;;  %vm2039_vm1 = vcmp.ge.f32.partialorder %v1953_v6, 0.0 }
 0x2cf   : > { %vm2040_vm2 = vcmp.ge.f32.partialorder %v1955_v59, 0.0  ;;  %v2105_v11 = vmul.f32 %v4503_v51, %v1955_v59  ;;  %v2167_v12 = vsel %vm2038_vm0, %v1951_v52, %v2103_v43 }
 0x2d0   : > { %vm2041_vm3 = vcmp.ge.f32.partialorder %v1957_v44, 0.0  ;;  %v2106_v22 = vmul.f32 %v4503_v51, %v1957_v44  ;;  %v2168_v15 = vsel %vm2039_vm1, %v1953_v6, %v2104_v32 }
 0x2d1   : > { %v2169_v14 = vsel %vm2040_vm2, %v1955_v59, %v2105_v11 }
 0x2d2   : > { %v1960_v1 = vpop.f32.mrb[84].mxu1  ;;  %v2170_v37 = vsel %vm2041_vm3, %v1957_v44, %v2106_v22  ;;  %v2207_v23 = vpack.c.bf16 %v2169_v14, %v2167_v12 }
 0x2d3   : > { %v1961_v53 = vadd.f32 %v1960_v1, %v4498_v0  ;;  %v1962_v3 = vpop.f32.mrb[85].mxu1  ;;  %v2208_v62 = vpack.c.bf16 %v2170_v37, %v2168_v15  ;;  %v4645_v15 = vstv %s3213_s16 }
 0x2d4   : > { %v1963_v61 = vadd.f32 %v1962_v3, %v4501_v19  ;;  %v1964_v38 = vpop.f32.mrb[86].mxu1 }
 0x2d5   : > { %v2107_v49 = vmul.f32 %v4503_v51, %v1961_v53  ;;  %v1965_v41 = vadd.f32 %v1964_v38, %v4498_v0  ;;  %v1966_v63 = vpop.f32.mrb[87].mxu1  ;;  %2571 = vmatprep.mubr.bf16.mxu0 %v2208_v62  ;;  %vm2042_vm4 = vcmp.ge.f32.partialorder %v1961_v53, 0.0 }
 0x2d6   : > { %v2108_v56 = vmul.f32 %v4503_v51, %v1963_v61  ;;  %v1967_v33 = vadd.f32 %v1966_v63, %v4501_v19  ;;  %2572 = vmatmul.mubr.bf16.gmra.mrb[80].mxu0 %v2207_v23  ;;  %vm2043_vm5 = vcmp.ge.f32.partialorder %v1963_v61, 0.0 }
 0x2d7   : > { %vm2044_vm6 = vcmp.ge.f32.partialorder %v1965_v41, 0.0  ;;  %v2109_v20 = vmul.f32 %v4503_v51, %v1965_v41  ;;  %v2171_v4 = vsel %vm2042_vm4, %v1961_v53, %v2107_v49 }
 0x2d8   : > { %vm2045_vm7 = vcmp.ge.f32.partialorder %v1967_v33, 0.0  ;;  %v2110_v18 = vmul.f32 %v4503_v51, %v1967_v33  ;;  %v2172_v45 = vsel %vm2043_vm5, %v1963_v61, %v2108_v56 }
 0x2d9   : > { %v2173_v24 = vsel %vm2044_vm6, %v1965_v41, %v2109_v20 }
 0x2da   : > { %v1970_v10 = vpop.f32.mrb[88].mxu1  ;;  %v2174_v25 = vsel %vm2045_vm7, %v1967_v33, %v2110_v18  ;;  %v2209_v8 = vpack.c.bf16 %v2173_v24, %v2171_v4 }
 0x2db   : > { %v1971_v34 = vadd.f32 %v1970_v10, %v4498_v0  ;;  %v1972_v27 = vpop.f32.mrb[89].mxu1  ;;  %v2210_v29 = vpack.c.bf16 %v2174_v25, %v2172_v45 }
 0x2dc   : > { %v1973_v13 = vadd.f32 %v1972_v27, %v4501_v19  ;;  %v1974_v26 = vpop.f32.mrb[90].mxu1 }
 0x2dd   : > { %v2111_v39 = vmul.f32 %v4503_v51, %v1971_v34  ;;  %v1975_v9 = vadd.f32 %v1974_v26, %v4498_v0  ;;  %v1976_v21 = vpop.f32.mrb[91].mxu1  ;;  %2581 = vmatprep.mubr.bf16.mxu0 %v2210_v29  ;;  %vm2046_vm8 = vcmp.ge.f32.partialorder %v1971_v34, 0.0 }
 0x2de   : > { %v2112_v46 = vmul.f32 %v4503_v51, %v1973_v13  ;;  %v1977_v57 = vadd.f32 %v1976_v21, %v4501_v19  ;;  %2582 = vmatmul.mubr.bf16.gmra.mrb[84].mxu0 %v2209_v8  ;;  %vm2047_vm9 = vcmp.ge.f32.partialorder %v1973_v13, 0.0 }
 0x2df   : > { %vm2048_vm10 = vcmp.ge.f32.partialorder %v1975_v9, 0.0  ;;  %v2113_v60 = vmul.f32 %v4503_v51, %v1975_v9  ;;  %v2175_v50 = vsel %vm2046_vm8, %v1971_v34, %v2111_v39 }
 0x2e0   : > { %vm2049_vm11 = vcmp.ge.f32.partialorder %v1977_v57, 0.0  ;;  %v2114_v17 = vmul.f32 %v4503_v51, %v1977_v57  ;;  %v2176_v48 = vsel %vm2047_vm9, %v1973_v13, %v2112_v46 }
 0x2e1   : > { %v2177_v58 = vsel %vm2048_vm10, %v1975_v9, %v2113_v60 }
 0x2e2   : > { %v1980_v54 = vpop.f32.mrb[92].mxu1  ;;  %v2178_v30 = vsel %vm2049_vm11, %v1977_v57, %v2114_v17  ;;  %v2211_v35 = vpack.c.bf16 %v2177_v58, %v2175_v50 }
 0x2e3   : > { %v1981_v42 = vadd.f32 %v1980_v54, %v4498_v0  ;;  %v1982_v2 = vpop.f32.mrb[93].mxu1  ;;  %v2212_v36 = vpack.c.bf16 %v2178_v30, %v2176_v48 }
 0x2e4   : > { %v1983_v16 = vadd.f32 %v1982_v2, %v4501_v19  ;;  %v1984_v47 = vpop.f32.mrb[94].mxu1 }
 0x2e5   : > { %v2115_v52 = vmul.f32 %v4503_v51, %v1981_v42  ;;  %v1985_v28 = vadd.f32 %v1984_v47, %v4498_v0  ;;  %v1986_v55 = vpop.f32.mrb[95].mxu1  ;;  %2591 = vmatprep.mubr.bf16.mxu0 %v2212_v36  ;;  %vm2050_vm12 = vcmp.ge.f32.partialorder %v1981_v42, 0.0 }
 0x2e6   : > { %v2116_v6 = vmul.f32 %v4503_v51, %v1983_v16  ;;  %v1987_v40 = vadd.f32 %v1986_v55, %v4501_v19  ;;  %2592 = vmatmul.mubr.bf16.gmra.mrb[88].mxu0 %v2211_v35  ;;  %vm2051_vm13 = vcmp.ge.f32.partialorder %v1983_v16, 0.0  ;;  %v2247_v19 = vld [vmem:[%s4962_s9] sm:$0x3] }
 0x2e7   : > { %vm2052_vm14 = vcmp.ge.f32.partialorder %v1985_v28, 0.0  ;;  %v2117_v43 = vmul.f32 %v4503_v51, %v1985_v28  ;;  %v2179_v31 = vsel %vm2050_vm12, %v1981_v42, %v2115_v52  ;;  %v4637_v12 = vrot.slane %v2247_v19, %v3654_v7 }
 0x2e8   : > { %vm2053_vm15 = vcmp.ge.f32.partialorder %v1987_v40, 0.0  ;;  %v2118_v59 = vmul.f32 %v4503_v51, %v1987_v40  ;;  %v2180_v44 = vsel %vm2051_vm13, %v1983_v16, %v2116_v6  ;;  %v4640_v14 = vrot.slane %v2247_v19, %v3649_v5  ;;  %v2806_v51 = vld [vmem:[%s4963_s10] sm:$0x3] }
 0x2e9   : > { %v2181_v32 = vsel %vm2052_vm14, %v1985_v28, %v2117_v43  ;;  %v4650_v62 = vrot.slane %v2806_v51, %v3654_v7  ;;  %v4655_v41 = vrot.slane %v2806_v51, %v3649_v5 }
 0x2ea   : > { %v2182_v11 = vsel %vm2053_vm15, %v1987_v40, %v2118_v59  ;;  %v2213_v0 = vpack.c.bf16 %v2181_v32, %v2179_v31 }
 0x2eb   : > { %v2214_v22 = vpack.c.bf16 %v2182_v11, %v2180_v44 }
 0x2ed   : > { %2601 = vmatprep.mubr.bf16.mxu0 %v2214_v22 }
 0x2ee   : > { %2602 = vmatmul.mubr.bf16.gmra.mrb[92].mxu0 %v2213_v0 }
 0x33f   : > { %v2453_v1 = vpop.f32.mrb[32].mxu0 }
 0x340   : > { %v2454_v37 = vadd.f32 %v2453_v1, %v4637_v12  ;;  %v2455_v23 = vpop.f32.mrb[33].mxu0 }
 0x341   : > { %v2456_v53 = vadd.f32 %v2455_v23, %v4640_v14  ;;  %v2457_v3 = vpop.f32.mrb[34].mxu0 }
 0x342   : > { %vm2613_vm0 = vcmp.ge.f32.partialorder %v2454_v37, 0.0  ;;  %v2678_v61 = vmul.f32 %v4645_v15, %v2454_v37  ;;  %v2458_v38 = vadd.f32 %v2457_v3, %v4637_v12  ;;  %v2459_v49 = vpop.f32.mrb[35].mxu0 }
 0x343   : > { %vm2614_vm1 = vcmp.ge.f32.partialorder %v2456_v53, 0.0  ;;  %v2679_v63 = vmul.f32 %v4645_v15, %v2456_v53  ;;  %v2460_v56 = vadd.f32 %v2459_v49, %v4640_v14 }
 0x344   : > { %vm2615_vm2 = vcmp.ge.f32.partialorder %v2458_v38, 0.0  ;;  %v2680_v33 = vmul.f32 %v4645_v15, %v2458_v38  ;;  %v2742_v20 = vsel %vm2613_vm0, %v2454_v37, %v2678_v61 }
 0x345   : > { %vm2616_vm3 = vcmp.ge.f32.partialorder %v2460_v56, 0.0  ;;  %v2681_v7 = vmul.f32 %v4645_v15, %v2460_v56  ;;  %v2743_v18 = vsel %vm2614_vm1, %v2456_v53, %v2679_v63  ;;  %v2818_v4 = vmul.f32 %v4650_v62, %v2742_v20 }
 0x346   : > { %v2819_v24 = vmul.f32 %v4655_v41, %v2743_v18  ;;  %v2744_v10 = vsel %vm2615_vm2, %v2458_v38, %v2680_v33 }
 0x347   : > { %v2463_v5 = vpop.f32.mrb[36].mxu0  ;;  %v2745_v45 = vsel %vm2616_vm3, %v2460_v56, %v2681_v7  ;;  %v2820_v25 = vmul.f32 %v4650_v62, %v2744_v10 }
 0x348   : > { %v2464_v8 = vadd.f32 %v2463_v5, %v4637_v12  ;;  %v2465_v34 = vpop.f32.mrb[37].mxu0  ;;  %v2882_v27 = vadd.f32 %v2819_v24, %v2818_v4  ;;  %v2821_v29 = vmul.f32 %v4655_v41, %v2745_v45 }
 0x349   : > { %v2466_v13 = vadd.f32 %v2465_v34, %v4640_v14  ;;  %v2467_v26 = vpop.f32.mrb[38].mxu0 }
 0x34a   : > { %vm2617_vm4 = vcmp.ge.f32.partialorder %v2464_v8, 0.0  ;;  %v2682_v39 = vmul.f32 %v4645_v15, %v2464_v8  ;;  %v2468_v9 = vadd.f32 %v2467_v26, %v4637_v12  ;;  %v2469_v21 = vpop.f32.mrb[39].mxu0  ;;  %2883 = vadd.xlane.f32.xlu0 %v2882_v27  ;;  %v2885_v46 = vadd.f32 %v2821_v29, %v2820_v25 }
 0x34b   : > { %vm2618_vm5 = vcmp.ge.f32.partialorder %v2466_v13, 0.0  ;;  %v2683_v57 = vmul.f32 %v4645_v15, %v2466_v13  ;;  %v2470_v60 = vadd.f32 %v2469_v21, %v4640_v14 }
 0x34c   : > { %vm2619_vm6 = vcmp.ge.f32.partialorder %v2468_v9, 0.0  ;;  %v2684_v17 = vmul.f32 %v4645_v15, %v2468_v9  ;;  %2886 = vadd.xlane.f32.xlu1 %v2885_v46  ;;  %v2746_v50 = vsel %vm2617_vm4, %v2464_v8, %v2682_v39 }
 0x34d   : > { %vm2620_vm7 = vcmp.ge.f32.partialorder %v2470_v60, 0.0  ;;  %v2685_v58 = vmul.f32 %v4645_v15, %v2470_v60  ;;  %v2747_v54 = vsel %vm2618_vm5, %v2466_v13, %v2683_v57  ;;  %v2822_v48 = vmul.f32 %v4650_v62, %v2746_v50 }
 0x34e   : > { %v2823_v30 = vmul.f32 %v4655_v41, %v2747_v54  ;;  %v2748_v35 = vsel %vm2619_vm6, %v2468_v9, %v2684_v17 }
 0x34f   : > { %v2749_v42 = vsel %vm2620_vm7, %v2470_v60, %v2685_v58  ;;  %v2824_v2 = vmul.f32 %v4650_v62, %v2748_v35  ;;  %v2473_v36 = vpop.f32.mrb[40].mxu0 }
 0x350   : > { %v2888_v16 = vadd.f32 %v2823_v30, %v2822_v48  ;;  %v2825_v47 = vmul.f32 %v4655_v41, %v2749_v42  ;;  %v2474_v52 = vadd.f32 %v2473_v36, %v4637_v12  ;;  %v2475_v28 = vpop.f32.mrb[41].mxu0 }
 0x351   : > { %v2476_v55 = vadd.f32 %v2475_v28, %v4640_v14  ;;  %v2477_v6 = vpop.f32.mrb[42].mxu0 }
 0x352   : > { %2889 = vadd.xlane.f32.xlu0 %v2888_v16  ;;  %v2891_v40 = vadd.f32 %v2825_v47, %v2824_v2  ;;  %vm2621_vm8 = vcmp.ge.f32.partialorder %v2474_v52, 0.0  ;;  %v2686_v43 = vmul.f32 %v4645_v15, %v2474_v52  ;;  %v2478_v59 = vadd.f32 %v2477_v6, %v4637_v12  ;;  %v2479_v31 = vpop.f32.mrb[43].mxu0 }
 0x353   : > { %vm2622_vm9 = vcmp.ge.f32.partialorder %v2476_v55, 0.0  ;;  %v2687_v32 = vmul.f32 %v4645_v15, %v2476_v55  ;;  %v2480_v44 = vadd.f32 %v2479_v31, %v4640_v14 }
 0x354   : > { %vm2623_vm10 = vcmp.ge.f32.partialorder %v2478_v59, 0.0  ;;  %v2688_v11 = vmul.f32 %v4645_v15, %v2478_v59  ;;  %v2750_v0 = vsel %vm2621_vm8, %v2474_v52, %v2686_v43 }
 0x355   : > { %vm2624_vm11 = vcmp.ge.f32.partialorder %v2480_v44, 0.0  ;;  %v2689_v22 = vmul.f32 %v4645_v15, %v2480_v44  ;;  %v2751_v19 = vsel %vm2622_vm9, %v2476_v55, %v2687_v32  ;;  %v2826_v51 = vmul.f32 %v4650_v62, %v2750_v0 }
 0x356   : > { %2892 = vadd.xlane.f32.xlu0 %v2891_v40  ;;  %v2827_v1 = vmul.f32 %v4655_v41, %v2751_v19  ;;  %v2752_v37 = vsel %vm2623_vm10, %v2478_v59, %v2688_v11 }
 0x357   : > { %v2483_v23 = vpop.f32.mrb[44].mxu0  ;;  %v2753_v53 = vsel %vm2624_vm11, %v2480_v44, %v2689_v22  ;;  %v2828_v3 = vmul.f32 %v4650_v62, %v2752_v37 }
 0x358   : > { %v2484_v61 = vadd.f32 %v2483_v23, %v4637_v12  ;;  %v2485_v38 = vpop.f32.mrb[45].mxu0  ;;  %v2894_v49 = vadd.f32 %v2827_v1, %v2826_v51  ;;  %v2829_v63 = vmul.f32 %v4655_v41, %v2753_v53 }
 0x359   : > { %v2486_v56 = vadd.f32 %v2485_v38, %v4640_v14  ;;  %v2487_v33 = vpop.f32.mrb[46].mxu0 }
 0x35a   : > { %vm2625_vm12 = vcmp.ge.f32.partialorder %v2484_v61, 0.0  ;;  %v2690_v20 = vmul.f32 %v4645_v15, %v2484_v61  ;;  %v2488_v7 = vadd.f32 %v2487_v33, %v4637_v12  ;;  %v2489_v18 = vpop.f32.mrb[47].mxu0  ;;  %2895 = vadd.xlane.f32.xlu1 %v2894_v49  ;;  %v2897_v4 = vadd.f32 %v2829_v63, %v2828_v3 }
 0x35b   : > { %vm2626_vm13 = vcmp.ge.f32.partialorder %v2486_v56, 0.0  ;;  %v2691_v24 = vmul.f32 %v4645_v15, %v2486_v56  ;;  %v2490_v10 = vadd.f32 %v2489_v18, %v4640_v14 }
 0x35c   : > { %vm2627_vm14 = vcmp.ge.f32.partialorder %v2488_v7, 0.0  ;;  %v2692_v5 = vmul.f32 %v4645_v15, %v2488_v7  ;;  %2898 = vadd.xlane.f32.xlu0 %v2897_v4  ;;  %v2754_v45 = vsel %vm2625_vm12, %v2484_v61, %v2690_v20 }
 0x35d   : > { %vm2628_vm15 = vcmp.ge.f32.partialorder %v2490_v10, 0.0  ;;  %v2693_v25 = vmul.f32 %v4645_v15, %v2490_v10  ;;  %v2755_v8 = vsel %vm2626_vm13, %v2486_v56, %v2691_v24  ;;  %v2830_v34 = vmul.f32 %v4650_v62, %v2754_v45 }
 0x35e   : > { %v2831_v27 = vmul.f32 %v4655_v41, %v2755_v8  ;;  %v2756_v29 = vsel %vm2627_vm14, %v2488_v7, %v2692_v5 }
 0x35f   : > { %v2757_v13 = vsel %vm2628_vm15, %v2490_v10, %v2693_v25  ;;  %v2832_v26 = vmul.f32 %v4650_v62, %v2756_v29 }
 0x360   : > { %v2900_v39 = vadd.f32 %v2831_v27, %v2830_v34  ;;  %v2833_v9 = vmul.f32 %v4655_v41, %v2757_v13 }
 0x362   : > { %2901 = vadd.xlane.f32.xlu1 %v2900_v39  ;;  %v2903_v21 = vadd.f32 %v2833_v9, %v2832_v26  ;;  %v2493_v46 = vpop.f32.mrb[48].mxu0 }
 0x363   : > { %v2494_v57 = vadd.f32 %v2493_v46, %v4637_v12  ;;  %v2495_v60 = vpop.f32.mrb[49].mxu0 }
 0x364   : > { %2904 = vadd.xlane.f32.xlu0 %v2903_v21  ;;  %v2496_v17 = vadd.f32 %v2495_v60, %v4640_v14  ;;  %v2497_v50 = vpop.f32.mrb[50].mxu0 }
 0x365   : > { %vm2629_vm0 = vcmp.ge.f32.partialorder %v2494_v57, 0.0  ;;  %v2694_v58 = vmul.f32 %v4645_v15, %v2494_v57  ;;  %v2498_v54 = vadd.f32 %v2497_v50, %v4637_v12  ;;  %v2499_v48 = vpop.f32.mrb[51].mxu0 }
 0x366   : > { %vm2630_vm1 = vcmp.ge.f32.partialorder %v2496_v17, 0.0  ;;  %v2695_v30 = vmul.f32 %v4645_v15, %v2496_v17  ;;  %v2500_v35 = vadd.f32 %v2499_v48, %v4640_v14 }
 0x367   : > { %vm2631_vm2 = vcmp.ge.f32.partialorder %v2498_v54, 0.0  ;;  %v2696_v42 = vmul.f32 %v4645_v15, %v2498_v54  ;;  %v2758_v2 = vsel %vm2629_vm0, %v2494_v57, %v2694_v58 }
 0x368   : > { %vm2632_vm3 = vcmp.ge.f32.partialorder %v2500_v35, 0.0  ;;  %v2697_v36 = vmul.f32 %v4645_v15, %v2500_v35  ;;  %v2759_v16 = vsel %vm2630_vm1, %v2496_v17, %v2695_v30  ;;  %v2834_v47 = vmul.f32 %v4650_v62, %v2758_v2 }
 0x369   : > { %v2835_v52 = vmul.f32 %v4655_v41, %v2759_v16  ;;  %v2760_v28 = vsel %vm2631_vm2, %v2498_v54, %v2696_v42 }
 0x36a   : > { %v2761_v55 = vsel %vm2632_vm3, %v2500_v35, %v2697_v36  ;;  %v2836_v6 = vmul.f32 %v4650_v62, %v2760_v28 }
 0x36b   : > { %v2906_v40 = vadd.f32 %v2835_v52, %v2834_v47  ;;  %v2837_v43 = vmul.f32 %v4655_v41, %v2761_v55 }
 0x36d   : > { %v2503_v59 = vpop.f32.mrb[52].mxu0  ;;  %2907 = vadd.xlane.f32.xlu1 %v2906_v40  ;;  %v2909_v31 = vadd.f32 %v2837_v43, %v2836_v6 }
 0x36e   : > { %v2504_v32 = vadd.f32 %v2503_v59, %v4637_v12  ;;  %v2505_v44 = vpop.f32.mrb[53].mxu0 }
 0x36f   : > { %v2506_v11 = vadd.f32 %v2505_v44, %v4640_v14  ;;  %v2507_v0 = vpop.f32.mrb[54].mxu0  ;;  %2910 = vadd.xlane.f32.xlu0 %v2909_v31 }
 0x370   : > { %vm2633_vm4 = vcmp.ge.f32.partialorder %v2504_v32, 0.0  ;;  %v2698_v22 = vmul.f32 %v4645_v15, %v2504_v32  ;;  %v2508_v19 = vadd.f32 %v2507_v0, %v4637_v12  ;;  %v2509_v51 = vpop.f32.mrb[55].mxu0 }
 0x371   : > { %vm2634_vm5 = vcmp.ge.f32.partialorder %v2506_v11, 0.0  ;;  %v2699_v1 = vmul.f32 %v4645_v15, %v2506_v11  ;;  %v2510_v37 = vadd.f32 %v2509_v51, %v4640_v14 }
 0x372   : > { %vm2635_vm6 = vcmp.ge.f32.partialorder %v2508_v19, 0.0  ;;  %v2700_v23 = vmul.f32 %v4645_v15, %v2508_v19  ;;  %v2762_v53 = vsel %vm2633_vm4, %v2504_v32, %v2698_v22 }
 0x373   : > { %vm2636_vm7 = vcmp.ge.f32.partialorder %v2510_v37, 0.0  ;;  %v2701_v3 = vmul.f32 %v4645_v15, %v2510_v37  ;;  %v2763_v61 = vsel %vm2634_vm5, %v2506_v11, %v2699_v1  ;;  %v2838_v38 = vmul.f32 %v4650_v62, %v2762_v53 }
 0x374   : > { %v2839_v49 = vmul.f32 %v4655_v41, %v2763_v61  ;;  %v2764_v63 = vsel %vm2635_vm6, %v2508_v19, %v2700_v23 }
 0x375   : > { %v2765_v56 = vsel %vm2636_vm7, %v2510_v37, %v2701_v3  ;;  %v2840_v33 = vmul.f32 %v4650_v62, %v2764_v63 }
 0x376   : > { %v2912_v20 = vadd.f32 %v2839_v49, %v2838_v38  ;;  %v2841_v7 = vmul.f32 %v4655_v41, %v2765_v56 }
 0x378   : > { %2913 = vadd.xlane.f32.xlu1 %v2912_v20  ;;  %v2915_v18 = vadd.f32 %v2841_v7, %v2840_v33 }
 0x379   : > { %v2513_v4 = vpop.f32.mrb[56].mxu0 }
 0x37a   : > { %v2514_v24 = vadd.f32 %v2513_v4, %v4637_v12  ;;  %v2515_v10 = vpop.f32.mrb[57].mxu0  ;;  %2916 = vadd.xlane.f32.xlu0 %v2915_v18 }
 0x37b   : > { %v2516_v5 = vadd.f32 %v2515_v10, %v4640_v14  ;;  %v2517_v45 = vpop.f32.mrb[58].mxu0 }
 0x37c   : > { %vm2637_vm8 = vcmp.ge.f32.partialorder %v2514_v24, 0.0  ;;  %v2702_v25 = vmul.f32 %v4645_v15, %v2514_v24  ;;  %v2518_v8 = vadd.f32 %v2517_v45, %v4637_v12  ;;  %v2519_v34 = vpop.f32.mrb[59].mxu0 }
 0x37d   : > { %vm2638_vm9 = vcmp.ge.f32.partialorder %v2516_v5, 0.0  ;;  %v2703_v27 = vmul.f32 %v4645_v15, %v2516_v5  ;;  %v2520_v29 = vadd.f32 %v2519_v34, %v4640_v14 }
 0x37e   : > { %vm2639_vm10 = vcmp.ge.f32.partialorder %v2518_v8, 0.0  ;;  %v2704_v13 = vmul.f32 %v4645_v15, %v2518_v8  ;;  %v2766_v26 = vsel %vm2637_vm8, %v2514_v24, %v2702_v25 }
 0x37f   : > { %vm2640_vm11 = vcmp.ge.f32.partialorder %v2520_v29, 0.0  ;;  %v2705_v39 = vmul.f32 %v4645_v15, %v2520_v29  ;;  %v2767_v9 = vsel %vm2638_vm9, %v2516_v5, %v2703_v27  ;;  %v2842_v21 = vmul.f32 %v4650_v62, %v2766_v26 }
 0x380   : > { %v2843_v46 = vmul.f32 %v4655_v41, %v2767_v9  ;;  %v2768_v57 = vsel %vm2639_vm10, %v2518_v8, %v2704_v13 }
 0x381   : > { %v2523_v60 = vpop.f32.mrb[60].mxu0  ;;  %v2769_v17 = vsel %vm2640_vm11, %v2520_v29, %v2705_v39  ;;  %v2844_v50 = vmul.f32 %v4650_v62, %v2768_v57 }
 0x382   : > { %v2524_v58 = vadd.f32 %v2523_v60, %v4637_v12  ;;  %v2525_v54 = vpop.f32.mrb[61].mxu0  ;;  %v2918_v48 = vadd.f32 %v2843_v46, %v2842_v21  ;;  %v2845_v30 = vmul.f32 %v4655_v41, %v2769_v17 }
 0x383   : > { %v2526_v35 = vadd.f32 %v2525_v54, %v4640_v14  ;;  %v2527_v42 = vpop.f32.mrb[62].mxu0 }
 0x384   : > { %vm2641_vm12 = vcmp.ge.f32.partialorder %v2524_v58, 0.0  ;;  %v2706_v2 = vmul.f32 %v4645_v15, %v2524_v58  ;;  %v2528_v36 = vadd.f32 %v2527_v42, %v4637_v12  ;;  %v2529_v16 = vpop.f32.mrb[63].mxu0  ;;  %2919 = vadd.xlane.f32.xlu1 %v2918_v48  ;;  %v2921_v47 = vadd.f32 %v2845_v30, %v2844_v50 }
 0x385   : > { %vm2642_vm13 = vcmp.ge.f32.partialorder %v2526_v35, 0.0  ;;  %v2707_v52 = vmul.f32 %v4645_v15, %v2526_v35  ;;  %v2530_v28 = vadd.f32 %v2529_v16, %v4640_v14 }
 0x386   : > { %vm2643_vm14 = vcmp.ge.f32.partialorder %v2528_v36, 0.0  ;;  %v2708_v55 = vmul.f32 %v4645_v15, %v2528_v36  ;;  %2922 = vadd.xlane.f32.xlu0 %v2921_v47  ;;  %v2770_v6 = vsel %vm2641_vm12, %v2524_v58, %v2706_v2 }
 0x387   : > { %vm2644_vm15 = vcmp.ge.f32.partialorder %v2530_v28, 0.0  ;;  %v2709_v40 = vmul.f32 %v4645_v15, %v2530_v28  ;;  %v2771_v43 = vsel %vm2642_vm13, %v2526_v35, %v2707_v52  ;;  %v2846_v59 = vmul.f32 %v4650_v62, %v2770_v6 }
 0x388   : > { %v2847_v31 = vmul.f32 %v4655_v41, %v2771_v43  ;;  %v2772_v32 = vsel %vm2643_vm14, %v2528_v36, %v2708_v55 }
 0x389   : > { %v2533_v44 = vpop.f32.mrb[64].mxu0  ;;  %v2773_v11 = vsel %vm2644_vm15, %v2530_v28, %v2709_v40  ;;  %v2848_v0 = vmul.f32 %v4650_v62, %v2772_v32 }
 0x38a   : > { %v2534_v22 = vadd.f32 %v2533_v44, %v4637_v12  ;;  %v2535_v19 = vpop.f32.mrb[65].mxu0  ;;  %v2924_v51 = vadd.f32 %v2847_v31, %v2846_v59  ;;  %v2849_v1 = vmul.f32 %v4655_v41, %v2773_v11 }
 0x38b   : > { %v2536_v37 = vadd.f32 %v2535_v19, %v4640_v14  ;;  %v2537_v23 = vpop.f32.mrb[66].mxu0 }
 0x38c   : > { %vm2645_vm0 = vcmp.ge.f32.partialorder %v2534_v22, 0.0  ;;  %v2710_v53 = vmul.f32 %v4645_v15, %v2534_v22  ;;  %v2538_v3 = vadd.f32 %v2537_v23, %v4637_v12  ;;  %v2539_v61 = vpop.f32.mrb[67].mxu0  ;;  %2925 = vadd.xlane.f32.xlu1 %v2924_v51  ;;  %v2927_v38 = vadd.f32 %v2849_v1, %v2848_v0 }
 0x38d   : > { %vm2646_vm1 = vcmp.ge.f32.partialorder %v2536_v37, 0.0  ;;  %v2711_v49 = vmul.f32 %v4645_v15, %v2536_v37  ;;  %v2540_v63 = vadd.f32 %v2539_v61, %v4640_v14 }
 0x38e   : > { %vm2647_vm2 = vcmp.ge.f32.partialorder %v2538_v3, 0.0  ;;  %v2712_v56 = vmul.f32 %v4645_v15, %v2538_v3  ;;  %2928 = vadd.xlane.f32.xlu0 %v2927_v38  ;;  %v2774_v33 = vsel %vm2645_vm0, %v2534_v22, %v2710_v53 }
 0x38f   : > { %vm2648_vm3 = vcmp.ge.f32.partialorder %v2540_v63, 0.0  ;;  %v2713_v20 = vmul.f32 %v4645_v15, %v2540_v63  ;;  %v2775_v7 = vsel %vm2646_vm1, %v2536_v37, %v2711_v49  ;;  %v2850_v18 = vmul.f32 %v4650_v62, %v2774_v33 }
 0x390   : > { %v2851_v4 = vmul.f32 %v4655_v41, %v2775_v7  ;;  %v2776_v24 = vsel %vm2647_vm2, %v2538_v3, %v2712_v56 }
 0x391   : > { %v2543_v10 = vpop.f32.mrb[68].mxu0  ;;  %v2777_v5 = vsel %vm2648_vm3, %v2540_v63, %v2713_v20  ;;  %v2852_v45 = vmul.f32 %v4650_v62, %v2776_v24 }
 0x392   : > { %v2544_v25 = vadd.f32 %v2543_v10, %v4637_v12  ;;  %v2545_v8 = vpop.f32.mrb[69].mxu0  ;;  %v2930_v34 = vadd.f32 %v2851_v4, %v2850_v18  ;;  %v2853_v27 = vmul.f32 %v4655_v41, %v2777_v5 }
 0x393   : > { %v2546_v29 = vadd.f32 %v2545_v8, %v4640_v14  ;;  %v2547_v13 = vpop.f32.mrb[70].mxu0 }
 0x394   : > { %vm2649_vm4 = vcmp.ge.f32.partialorder %v2544_v25, 0.0  ;;  %v2714_v26 = vmul.f32 %v4645_v15, %v2544_v25  ;;  %v2548_v39 = vadd.f32 %v2547_v13, %v4637_v12  ;;  %v2549_v9 = vpop.f32.mrb[71].mxu0  ;;  %2931 = vadd.xlane.f32.xlu1 %v2930_v34  ;;  %v2933_v21 = vadd.f32 %v2853_v27, %v2852_v45 }
 0x395   : > { %vm2650_vm5 = vcmp.ge.f32.partialorder %v2546_v29, 0.0  ;;  %v2715_v46 = vmul.f32 %v4645_v15, %v2546_v29  ;;  %v2550_v57 = vadd.f32 %v2549_v9, %v4640_v14 }
 0x396   : > { %vm2651_vm6 = vcmp.ge.f32.partialorder %v2548_v39, 0.0  ;;  %v2716_v60 = vmul.f32 %v4645_v15, %v2548_v39  ;;  %2934 = vadd.xlane.f32.xlu0 %v2933_v21  ;;  %v2778_v17 = vsel %vm2649_vm4, %v2544_v25, %v2714_v26 }
 0x397   : > { %vm2652_vm7 = vcmp.ge.f32.partialorder %v2550_v57, 0.0  ;;  %v2717_v50 = vmul.f32 %v4645_v15, %v2550_v57  ;;  %v2779_v58 = vsel %vm2650_vm5, %v2546_v29, %v2715_v46  ;;  %v2854_v54 = vmul.f32 %v4650_v62, %v2778_v17 }
 0x398   : > { %v2855_v48 = vmul.f32 %v4655_v41, %v2779_v58  ;;  %v2780_v30 = vsel %vm2651_vm6, %v2548_v39, %v2716_v60 }
 0x399   : > { %v2553_v35 = vpop.f32.mrb[72].mxu0  ;;  %v2781_v42 = vsel %vm2652_vm7, %v2550_v57, %v2717_v50  ;;  %v2856_v2 = vmul.f32 %v4650_v62, %v2780_v30 }
 0x39a   : > { %v2554_v36 = vadd.f32 %v2553_v35, %v4637_v12  ;;  %v2555_v16 = vpop.f32.mrb[73].mxu0  ;;  %v2936_v47 = vadd.f32 %v2855_v48, %v2854_v54  ;;  %v2857_v52 = vmul.f32 %v4655_v41, %v2781_v42 }
 0x39b   : > { %v2556_v28 = vadd.f32 %v2555_v16, %v4640_v14  ;;  %v2557_v55 = vpop.f32.mrb[74].mxu0 }
 0x39c   : > { %vm2653_vm8 = vcmp.ge.f32.partialorder %v2554_v36, 0.0  ;;  %v2718_v6 = vmul.f32 %v4645_v15, %v2554_v36  ;;  %v2558_v40 = vadd.f32 %v2557_v55, %v4637_v12  ;;  %v2559_v43 = vpop.f32.mrb[75].mxu0  ;;  %2937 = vadd.xlane.f32.xlu1 %v2936_v47  ;;  %v2939_v59 = vadd.f32 %v2857_v52, %v2856_v2 }
 0x39d   : > { %vm2654_vm9 = vcmp.ge.f32.partialorder %v2556_v28, 0.0  ;;  %v2719_v31 = vmul.f32 %v4645_v15, %v2556_v28  ;;  %v2560_v32 = vadd.f32 %v2559_v43, %v4640_v14 }
 0x39e   : > { %vm2655_vm10 = vcmp.ge.f32.partialorder %v2558_v40, 0.0  ;;  %v2720_v44 = vmul.f32 %v4645_v15, %v2558_v40  ;;  %2940 = vadd.xlane.f32.xlu0 %v2939_v59  ;;  %v2782_v11 = vsel %vm2653_vm8, %v2554_v36, %v2718_v6 }
 0x39f   : > { %vm2656_vm11 = vcmp.ge.f32.partialorder %v2560_v32, 0.0  ;;  %v2721_v0 = vmul.f32 %v4645_v15, %v2560_v32  ;;  %v2783_v22 = vsel %vm2654_vm9, %v2556_v28, %v2719_v31  ;;  %v2858_v19 = vmul.f32 %v4650_v62, %v2782_v11 }
 0x3a0   : > { %v2859_v51 = vmul.f32 %v4655_v41, %v2783_v22  ;;  %v2784_v1 = vsel %vm2655_vm10, %v2558_v40, %v2720_v44 }
 0x3a1   : > { %v2563_v37 = vpop.f32.mrb[76].mxu0  ;;  %v2785_v23 = vsel %vm2656_vm11, %v2560_v32, %v2721_v0  ;;  %v2860_v53 = vmul.f32 %v4650_v62, %v2784_v1 }
 0x3a2   : > { %v2564_v3 = vadd.f32 %v2563_v37, %v4637_v12  ;;  %v2565_v61 = vpop.f32.mrb[77].mxu0  ;;  %v2942_v38 = vadd.f32 %v2859_v51, %v2858_v19  ;;  %v2861_v49 = vmul.f32 %v4655_v41, %v2785_v23 }
 0x3a3   : > { %v2566_v63 = vadd.f32 %v2565_v61, %v4640_v14  ;;  %v2567_v56 = vpop.f32.mrb[78].mxu0 }
 0x3a4   : > { %vm2657_vm12 = vcmp.ge.f32.partialorder %v2564_v3, 0.0  ;;  %v2722_v33 = vmul.f32 %v4645_v15, %v2564_v3  ;;  %v2568_v20 = vadd.f32 %v2567_v56, %v4637_v12  ;;  %v2569_v7 = vpop.f32.mrb[79].mxu0  ;;  %2943 = vadd.xlane.f32.xlu1 %v2942_v38  ;;  %v2945_v18 = vadd.f32 %v2861_v49, %v2860_v53 }
 0x3a5   : > { %vm2658_vm13 = vcmp.ge.f32.partialorder %v2566_v63, 0.0  ;;  %v2723_v4 = vmul.f32 %v4645_v15, %v2566_v63  ;;  %v2570_v24 = vadd.f32 %v2569_v7, %v4640_v14 }
 0x3a6   : > { %vm2659_vm14 = vcmp.ge.f32.partialorder %v2568_v20, 0.0  ;;  %v2724_v10 = vmul.f32 %v4645_v15, %v2568_v20  ;;  %2946 = vadd.xlane.f32.xlu0 %v2945_v18  ;;  %v2786_v5 = vsel %vm2657_vm12, %v2564_v3, %v2722_v33 }
 0x3a7   : > { %vm2660_vm15 = vcmp.ge.f32.partialorder %v2570_v24, 0.0  ;;  %v2725_v45 = vmul.f32 %v4645_v15, %v2570_v24  ;;  %v2787_v25 = vsel %vm2658_vm13, %v2566_v63, %v2723_v4  ;;  %v2862_v8 = vmul.f32 %v4650_v62, %v2786_v5 }
 0x3a8   : > { %v2863_v34 = vmul.f32 %v4655_v41, %v2787_v25  ;;  %v2788_v27 = vsel %vm2659_vm14, %v2568_v20, %v2724_v10 }
 0x3a9   : > { %v2573_v29 = vpop.f32.mrb[80].mxu0  ;;  %v2789_v13 = vsel %vm2660_vm15, %v2570_v24, %v2725_v45  ;;  %v2864_v26 = vmul.f32 %v4650_v62, %v2788_v27 }
 0x3aa   : > { %v2574_v39 = vadd.f32 %v2573_v29, %v4637_v12  ;;  %v2575_v9 = vpop.f32.mrb[81].mxu0  ;;  %v2948_v21 = vadd.f32 %v2863_v34, %v2862_v8  ;;  %v2865_v46 = vmul.f32 %v4655_v41, %v2789_v13 }
 0x3ab   : > { %v2576_v57 = vadd.f32 %v2575_v9, %v4640_v14  ;;  %v2577_v60 = vpop.f32.mrb[82].mxu0 }
 0x3ac   : > { %vm2661_vm0 = vcmp.ge.f32.partialorder %v2574_v39, 0.0  ;;  %v2726_v17 = vmul.f32 %v4645_v15, %v2574_v39  ;;  %v2578_v50 = vadd.f32 %v2577_v60, %v4637_v12  ;;  %v2579_v58 = vpop.f32.mrb[83].mxu0  ;;  %2949 = vadd.xlane.f32.xlu1 %v2948_v21  ;;  %v2951_v54 = vadd.f32 %v2865_v46, %v2864_v26 }
 0x3ad   : > { %vm2662_vm1 = vcmp.ge.f32.partialorder %v2576_v57, 0.0  ;;  %v2727_v48 = vmul.f32 %v4645_v15, %v2576_v57  ;;  %v2580_v30 = vadd.f32 %v2579_v58, %v4640_v14 }
 0x3ae   : > { %vm2663_vm2 = vcmp.ge.f32.partialorder %v2578_v50, 0.0  ;;  %v2728_v35 = vmul.f32 %v4645_v15, %v2578_v50  ;;  %2952 = vadd.xlane.f32.xlu0 %v2951_v54  ;;  %v2790_v42 = vsel %vm2661_vm0, %v2574_v39, %v2726_v17  ;;  %vm3017_vm0 = vcmask 7168  }
 0x3af   : > { %vm2664_vm3 = vcmp.ge.f32.partialorder %v2580_v30, 0.0  ;;  %v2729_v2 = vmul.f32 %v4645_v15, %v2580_v30  ;;  %v2791_v36 = vsel %vm2662_vm1, %v2576_v57, %v2727_v48  ;;  %v2866_v16 = vmul.f32 %v4650_v62, %v2790_v42 }
 0x3b0   : > { %v2867_v47 = vmul.f32 %v4655_v41, %v2791_v36  ;;  %v2792_v52 = vsel %vm2663_vm2, %v2578_v50, %v2728_v35 }
 0x3b1   : > { %v2583_v28 = vpop.f32.mrb[84].mxu0  ;;  %v2793_v55 = vsel %vm2664_vm3, %v2580_v30, %v2729_v2  ;;  %v2868_v6 = vmul.f32 %v4650_v62, %v2792_v52 }
 0x3b2   : > { %v2584_v40 = vadd.f32 %v2583_v28, %v4637_v12  ;;  %v2585_v43 = vpop.f32.mrb[85].mxu0  ;;  %v2954_v59 = vadd.f32 %v2867_v47, %v2866_v16  ;;  %v2869_v31 = vmul.f32 %v4655_v41, %v2793_v55 }
 0x3b3   : > { %v2586_v32 = vadd.f32 %v2585_v43, %v4640_v14  ;;  %v2587_v44 = vpop.f32.mrb[86].mxu0 }
 0x3b4   : > { %vm2665_vm4 = vcmp.ge.f32.partialorder %v2584_v40, 0.0  ;;  %v2730_v11 = vmul.f32 %v4645_v15, %v2584_v40  ;;  %v2588_v0 = vadd.f32 %v2587_v44, %v4637_v12  ;;  %v2589_v22 = vpop.f32.mrb[87].mxu0  ;;  %2955 = vadd.xlane.f32.xlu1 %v2954_v59  ;;  %v2957_v19 = vadd.f32 %v2869_v31, %v2868_v6 }
 0x3b5   : > { %vm2666_vm5 = vcmp.ge.f32.partialorder %v2586_v32, 0.0  ;;  %v2731_v51 = vmul.f32 %v4645_v15, %v2586_v32  ;;  %v2590_v1 = vadd.f32 %v2589_v22, %v4640_v14 }
 0x3b6   : > { %vm2667_vm6 = vcmp.ge.f32.partialorder %v2588_v0, 0.0  ;;  %v2732_v37 = vmul.f32 %v4645_v15, %v2588_v0  ;;  %2958 = vadd.xlane.f32.xlu0 %v2957_v19  ;;  %v2794_v23 = vsel %vm2665_vm4, %v2584_v40, %v2730_v11 }
 0x3b7   : > { %vm2668_vm7 = vcmp.ge.f32.partialorder %v2590_v1, 0.0  ;;  %v2733_v53 = vmul.f32 %v4645_v15, %v2590_v1  ;;  %v2795_v3 = vsel %vm2666_vm5, %v2586_v32, %v2731_v51  ;;  %v2870_v61 = vmul.f32 %v4650_v62, %v2794_v23 }
 0x3b8   : > { %v2871_v38 = vmul.f32 %v4655_v41, %v2795_v3  ;;  %v2796_v49 = vsel %vm2667_vm6, %v2588_v0, %v2732_v37  ;;  %v4845_v0 = vld [vmem:[#allocation4] ss:$0 sm:$0xff] }
 0x3b9   : > { %v2593_v63 = vpop.f32.mrb[88].mxu0  ;;  %v2797_v56 = vsel %vm2668_vm7, %v2590_v1, %v2733_v53  ;;  %v2872_v33 = vmul.f32 %v4650_v62, %v2796_v49 }
 0x3ba   : > { %v2594_v20 = vadd.f32 %v2593_v63, %v4637_v12  ;;  %v2595_v7 = vpop.f32.mrb[89].mxu0  ;;  %v2960_v18 = vadd.f32 %v2871_v38, %v2870_v61  ;;  %v2873_v4 = vmul.f32 %v4655_v41, %v2797_v56 }
 0x3bb   : > { %v2596_v24 = vadd.f32 %v2595_v7, %v4640_v14  ;;  %v2597_v10 = vpop.f32.mrb[90].mxu0 }
 0x3bc   : > { %vm2669_vm8 = vcmp.ge.f32.partialorder %v2594_v20, 0.0  ;;  %v2734_v5 = vmul.f32 %v4645_v15, %v2594_v20  ;;  %v2598_v45 = vadd.f32 %v2597_v10, %v4637_v12  ;;  %v2599_v25 = vpop.f32.mrb[91].mxu0  ;;  %2961 = vadd.xlane.f32.xlu1 %v2960_v18  ;;  %v2963_v8 = vadd.f32 %v2873_v4, %v2872_v33 }
 0x3bd   : > { %vm2670_vm9 = vcmp.ge.f32.partialorder %v2596_v24, 0.0  ;;  %v2735_v34 = vmul.f32 %v4645_v15, %v2596_v24  ;;  %v2600_v27 = vadd.f32 %v2599_v25, %v4640_v14 }
 0x3be   : > { %vm2671_vm10 = vcmp.ge.f32.partialorder %v2598_v45, 0.0  ;;  %v2736_v29 = vmul.f32 %v4645_v15, %v2598_v45  ;;  %2964 = vadd.xlane.f32.xlu0 %v2963_v8  ;;  %v2798_v13 = vsel %vm2669_vm8, %v2594_v20, %v2734_v5 }
 0x3bf   : > { %vm2672_vm11 = vcmp.ge.f32.partialorder %v2600_v27, 0.0  ;;  %v2737_v26 = vmul.f32 %v4645_v15, %v2600_v27  ;;  %v2799_v39 = vsel %vm2670_vm9, %v2596_v24, %v2735_v34  ;;  %v2874_v9 = vmul.f32 %v4650_v62, %v2798_v13 }
 0x3c0   : > { %v2875_v21 = vmul.f32 %v4655_v41, %v2799_v39  ;;  %v2800_v46 = vsel %vm2671_vm10, %v2598_v45, %v2736_v29 }
 0x3c1   : > { %v2603_v57 = vpop.f32.mrb[92].mxu0  ;;  %v2801_v60 = vsel %vm2672_vm11, %v2600_v27, %v2737_v26  ;;  %v2876_v17 = vmul.f32 %v4650_v62, %v2800_v46 }
 0x3c2   : > { %v2604_v50 = vadd.f32 %v2603_v57, %v4637_v12  ;;  %v2605_v58 = vpop.f32.mrb[93].mxu0  ;;  %v2966_v54 = vadd.f32 %v2875_v21, %v2874_v9  ;;  %v2877_v48 = vmul.f32 %v4655_v41, %v2801_v60 }
 0x3c3   : > { %v2606_v30 = vadd.f32 %v2605_v58, %v4640_v14  ;;  %v2607_v35 = vpop.f32.mrb[94].mxu0 }
 0x3c4   : > { %vm2673_vm12 = vcmp.ge.f32.partialorder %v2604_v50, 0.0  ;;  %v2738_v42 = vmul.f32 %v4645_v15, %v2604_v50  ;;  %v2608_v2 = vadd.f32 %v2607_v35, %v4637_v12  ;;  %2967 = vadd.xlane.f32.xlu1 %v2966_v54  ;;  %v2609_v36 = vpop.f32.mrb[95].mxu0  ;;  %v2969_v16 = vadd.f32 %v2877_v48, %v2876_v17 }
 0x3c5   : > { %vm2674_vm13 = vcmp.ge.f32.partialorder %v2606_v30, 0.0  ;;  %v2739_v47 = vmul.f32 %v4645_v15, %v2606_v30  ;;  %v2610_v52 = vadd.f32 %v2609_v36, %v4640_v14 }
 0x3c6   : > { %vm2675_vm14 = vcmp.ge.f32.partialorder %v2608_v2, 0.0  ;;  %v2740_v28 = vmul.f32 %v4645_v15, %v2608_v2  ;;  %2970 = vadd.xlane.f32.xlu0 %v2969_v16  ;;  %v2802_v55 = vsel %vm2673_vm12, %v2604_v50, %v2738_v42 }
 0x3c7   : > { %vm2676_vm15 = vcmp.ge.f32.partialorder %v2610_v52, 0.0  ;;  %v2741_v6 = vmul.f32 %v4645_v15, %v2610_v52  ;;  %v2803_v40 = vsel %vm2674_vm13, %v2606_v30, %v2739_v47  ;;  %v2878_v12 = vmul.f32 %v4650_v62, %v2802_v55 }
 0x3c8   : > { %v2879_v43 = vmul.f32 %v4655_v41, %v2803_v40  ;;  %v2804_v59 = vsel %vm2675_vm14, %v2608_v2, %v2740_v28 }
 0x3c9   : > { %v2805_v31 = vsel %vm2676_vm15, %v2610_v52, %v2741_v6  ;;  %v2880_v32 = vmul.f32 %v4650_v62, %v2804_v59 }
 0x3ca   : > { %v2972_v44 = vadd.f32 %v2879_v43, %v2878_v12  ;;  %v2881_v14 = vmul.f32 %v4655_v41, %v2805_v31 }
 0x3cc   : > { %2973 = vadd.xlane.f32.xlu1 %v2972_v44  ;;  %v2975_v11 = vadd.f32 %v2881_v14, %v2880_v32 }
 0x3ce   : > { %2976 = vadd.xlane.f32.xlu0 %v2975_v11 }
 0x3d7   : > { %v2884_v15 = vpop.xlane.xlu0 %2883 }
 0x3d8   : > { %v2985_v62 = vadd.f32 %v4845_v0, %v2884_v15 }
 0x3d9   : > { %v2887_v41 = vpop.xlane.xlu1 %2886 }
 0x3da   : > { %3018 = vst.msk [vmem:[%s4852_s23] sm:$0xff] %vm3017_vm0, %v2985_v62  ;;  %v2986_v22 = vadd.f32 %v4845_v0, %v2887_v41 }
 0x3dc   : > { %3019 = vst.msk [vmem:[%s4852_s23 + $0x8] sm:$0xff] %vm3017_vm0, %v2986_v22 }
 0x3df   : > { %v2890_v19 = vpop.xlane.xlu0 %2889 }
 0x3e0   : > { %v2987_v51 = vadd.f32 %v4845_v0, %v2890_v19 }
 0x3e2   : > { %3020 = vst.msk [vmem:[%s4852_s23 + $0x10] sm:$0xff] %vm3017_vm0, %v2987_v51 }
 0x3e3   : > { %v2893_v1 = vpop.xlane.xlu0 %2892 }
 0x3e4   : > { %v2988_v37 = vadd.f32 %v4845_v0, %v2893_v1 }
 0x3e6   : > { %3021 = vst.msk [vmem:[%s4852_s23 + $0x18] sm:$0xff] %vm3017_vm0, %v2988_v37 }
 0x3e7   : > { %v2896_v23 = vpop.xlane.xlu1 %2895 }
 0x3e8   : > { %v2989_v53 = vadd.f32 %v4845_v0, %v2896_v23 }
 0x3e9   : > { %v2899_v3 = vpop.xlane.xlu0 %2898 }
 0x3ea   : > { %3022 = vst.msk [vmem:[%s4852_s23 + $0x20] sm:$0xff] %vm3017_vm0, %v2989_v53  ;;  %v2990_v61 = vadd.f32 %v4845_v0, %v2899_v3 }
 0x3ec   : > { %3023 = vst.msk [vmem:[%s4852_s23 + $0x28] sm:$0xff] %vm3017_vm0, %v2990_v61 }
 0x3ef   : > { %v2902_v38 = vpop.xlane.xlu1 %2901 }
 0x3f0   : > { %v2991_v49 = vadd.f32 %v4845_v0, %v2902_v38 }
 0x3f1   : > { %v2905_v63 = vpop.xlane.xlu0 %2904 }
 0x3f2   : > { %3024 = vst.msk [vmem:[%s4852_s23 + $0x30] sm:$0xff] %vm3017_vm0, %v2991_v49  ;;  %v2992_v56 = vadd.f32 %v4845_v0, %v2905_v63 }
 0x3f4   : > { %3025 = vst.msk [vmem:[%s4852_s23 + $0x38] sm:$0xff] %vm3017_vm0, %v2992_v56 }
 0x3fa   : > { %v2908_v33 = vpop.xlane.xlu1 %2907 }
 0x3fb   : > { %v2993_v20 = vadd.f32 %v4845_v0, %v2908_v33 }
 0x3fc   : > { %v2911_v7 = vpop.xlane.xlu0 %2910 }
 0x3fd   : > { %3026 = vst.msk [vmem:[%s4852_s23 + $0x40] sm:$0xff] %vm3017_vm0, %v2993_v20  ;;  %v2994_v18 = vadd.f32 %v4845_v0, %v2911_v7 }
 0x3ff   : > { %3027 = vst.msk [vmem:[%s4852_s23 + $0x48] sm:$0xff] %vm3017_vm0, %v2994_v18 }
 0x405   : > { %v2914_v4 = vpop.xlane.xlu1 %2913 }
 0x406   : > { %v2995_v24 = vadd.f32 %v4845_v0, %v2914_v4 }
 0x407   : > { %v2917_v10 = vpop.xlane.xlu0 %2916 }
 0x408   : > { %3028 = vst.msk [vmem:[%s4852_s23 + $0x50] sm:$0xff] %vm3017_vm0, %v2995_v24  ;;  %v2996_v5 = vadd.f32 %v4845_v0, %v2917_v10 }
 0x40a   : > { %3029 = vst.msk [vmem:[%s4852_s23 + $0x58] sm:$0xff] %vm3017_vm0, %v2996_v5 }
 0x411   : > { %v2920_v45 = vpop.xlane.xlu1 %2919 }
 0x412   : > { %v2997_v25 = vadd.f32 %v4845_v0, %v2920_v45 }
 0x413   : > { %v2923_v8 = vpop.xlane.xlu0 %2922 }
 0x414   : > { %3030 = vst.msk [vmem:[%s4852_s23 + $0x60] sm:$0xff] %vm3017_vm0, %v2997_v25  ;;  %v2998_v34 = vadd.f32 %v4845_v0, %v2923_v8 }
 0x416   : > { %3031 = vst.msk [vmem:[%s4852_s23 + $0x68] sm:$0xff] %vm3017_vm0, %v2998_v34 }
 0x419   : > { %v2926_v27 = vpop.xlane.xlu1 %2925 }
 0x41a   : > { %v2999_v29 = vadd.f32 %v4845_v0, %v2926_v27 }
 0x41b   : > { %v2929_v13 = vpop.xlane.xlu0 %2928 }
 0x41c   : > { %3032 = vst.msk [vmem:[%s4852_s23 + $0x70] sm:$0xff] %vm3017_vm0, %v2999_v29  ;;  %v3000_v26 = vadd.f32 %v4845_v0, %v2929_v13 }
 0x41e   : > { %3033 = vst.msk [vmem:[%s4852_s23 + $0x78] sm:$0xff] %vm3017_vm0, %v3000_v26 }
 0x421   : > { %v2932_v39 = vpop.xlane.xlu1 %2931 }
 0x422   : > { %v3001_v9 = vadd.f32 %v4845_v0, %v2932_v39 }
 0x423   : > { %v2935_v21 = vpop.xlane.xlu0 %2934 }
 0x424   : > { %3034 = vst.msk [vmem:[%s4852_s23 + $0x80] sm:$0xff] %vm3017_vm0, %v3001_v9  ;;  %v3002_v46 = vadd.f32 %v4845_v0, %v2935_v21 }
 0x426   : > { %3035 = vst.msk [vmem:[%s4852_s23 + $0x88] sm:$0xff] %vm3017_vm0, %v3002_v46 }
 0x429   : > { %v2938_v57 = vpop.xlane.xlu1 %2937 }
 0x42a   : > { %v3003_v60 = vadd.f32 %v4845_v0, %v2938_v57 }
 0x42b   : > { %v2941_v17 = vpop.xlane.xlu0 %2940 }
 0x42c   : > { %3036 = vst.msk [vmem:[%s4852_s23 + $0x90] sm:$0xff] %vm3017_vm0, %v3003_v60  ;;  %v3004_v50 = vadd.f32 %v4845_v0, %v2941_v17 }
 0x42e   : > { %3037 = vst.msk [vmem:[%s4852_s23 + $0x98] sm:$0xff] %vm3017_vm0, %v3004_v50 }
 0x431   : > { %v2944_v58 = vpop.xlane.xlu1 %2943 }
 0x432   : > { %v3005_v54 = vadd.f32 %v4845_v0, %v2944_v58 }
 0x433   : > { %v2947_v48 = vpop.xlane.xlu0 %2946 }
 0x434   : > { %3038 = vst.msk [vmem:[%s4852_s23 + $0xa0] sm:$0xff] %vm3017_vm0, %v3005_v54  ;;  %v3006_v30 = vadd.f32 %v4845_v0, %v2947_v48 }
 0x436   : > { %3039 = vst.msk [vmem:[%s4852_s23 + $0xa8] sm:$0xff] %vm3017_vm0, %v3006_v30 }
 0x439   : > { %v2950_v35 = vpop.xlane.xlu1 %2949 }
 0x43a   : > { %v3007_v42 = vadd.f32 %v4845_v0, %v2950_v35 }
 0x43b   : > { %v2953_v2 = vpop.xlane.xlu0 %2952 }
 0x43c   : > { %3040 = vst.msk [vmem:[%s4852_s23 + $0xb0] sm:$0xff] %vm3017_vm0, %v3007_v42  ;;  %v3008_v36 = vadd.f32 %v4845_v0, %v2953_v2 }
 0x43e   : > { %3041 = vst.msk [vmem:[%s4852_s23 + $0xb8] sm:$0xff] %vm3017_vm0, %v3008_v36 }
 0x441   : > { %v2956_v16 = vpop.xlane.xlu1 %2955 }
 0x442   : > { %v3009_v47 = vadd.f32 %v4845_v0, %v2956_v16 }
 0x443   : > { %v2959_v52 = vpop.xlane.xlu0 %2958 }
 0x444   : > { %3042 = vst.msk [vmem:[%s4852_s23 + $0xc0] sm:$0xff] %vm3017_vm0, %v3009_v47  ;;  %v3010_v28 = vadd.f32 %v4845_v0, %v2959_v52 }
 0x446   : > { %3043 = vst.msk [vmem:[%s4852_s23 + $0xc8] sm:$0xff] %vm3017_vm0, %v3010_v28 }
 0x449   : > { %v2962_v55 = vpop.xlane.xlu1 %2961 }
 0x44a   : > { %v3011_v6 = vadd.f32 %v4845_v0, %v2962_v55 }
 0x44b   : > { %v2965_v40 = vpop.xlane.xlu0 %2964 }
 0x44c   : > { %3044 = vst.msk [vmem:[%s4852_s23 + $0xd0] sm:$0xff] %vm3017_vm0, %v3011_v6  ;;  %v3012_v12 = vadd.f32 %v4845_v0, %v2965_v40 }
 0x44e   : > { %3045 = vst.msk [vmem:[%s4852_s23 + $0xd8] sm:$0xff] %vm3017_vm0, %v3012_v12 }
 0x451   : > { %v2968_v43 = vpop.xlane.xlu1 %2967 }
 0x452   : > { %v3013_v59 = vadd.f32 %v4845_v0, %v2968_v43 }
 0x453   : > { %v2971_v31 = vpop.xlane.xlu0 %2970 }
 0x454   : > { %3046 = vst.msk [vmem:[%s4852_s23 + $0xe0] sm:$0xff] %vm3017_vm0, %v3013_v59  ;;  %v3014_v32 = vadd.f32 %v4845_v0, %v2971_v31 }
 0x456   : > { %3047 = vst.msk [vmem:[%s4852_s23 + $0xe8] sm:$0xff] %vm3017_vm0, %v3014_v32 }
 0x459   : > { %v2974_v44 = vpop.xlane.xlu1 %2973 }
 0x45a   : > { %v3015_v14 = vadd.f32 %v4845_v0, %v2974_v44 }
 0x45b   : > { %v2977_v11 = vpop.xlane.xlu0 %2976 }
 0x45c   : > { %3048 = vst.msk [vmem:[%s4852_s23 + $0xf0] sm:$0xff] %vm3017_vm0, %v3015_v14  ;;  %v3016_v15 = vadd.f32 %v4845_v0, %v2977_v11 }
 0x45e   : > { %3049 = vst.msk [vmem:[%s4852_s23 + $0xf8] sm:$0xff] %vm3017_vm0, %v3016_v15 }
 0x45f PF: > { %s30_s28 = sadd.s32 1, %s3425_s28  }
 0x460   : > { %p27_p9 = scmp.ge.s32.totalorder %s30_s28, 4  }
 0x462   :  { %29 = sbr.rel (!%p27_p9) target bundleno = 16 (0x10), region = 94 }

</bundles_post_ra>
